<compile_context>
chip_gen: v7x
topology: tpu7x:2x2x1
jax: 0.10.0
libtpu: 0.0.40
codegen_flags: <defaults>
</compile_context>

<pallas_src>
from functools import partial

import jax
import jax.numpy as jnp
import numpy as np
from jax.experimental import pallas as pl
from jax.experimental.pallas import tpu as pltpu

EPS = 1e-5
LANE = 128
# Per-image working sets here are a few MiB, so 32 MiB scoped VMEM is ample and
# safe on v5e/v6e (128 MiB physical) as well as v7x (64 MiB physical).
VMEM_LIMIT = 32 * 1024 * 1024


def _round_up(x, m):
    return (x + m - 1) // m * m


# ----------------------------------------------------------------------------
# Optional single-buffering for grid-invariant (weight) blocks.
# ----------------------------------------------------------------------------
_BUFFERED1 = None


def _probe_buffered1():
    try:
        def _copy(x_ref, o_ref):
            o_ref[...] = x_ref[...]

        fn = pl.pallas_call(
            _copy,
            out_shape=jax.ShapeDtypeStruct((8, 128), jnp.float32),
            grid=(1,),
            in_specs=[pl.BlockSpec((8, 128), lambda i: (0, 0),
                                   pipeline_mode=pl.Buffered(1))],
            out_specs=pl.BlockSpec((8, 128), lambda i: (0, 0)),
        )
        jax.block_until_ready(fn(jnp.zeros((8, 128), jnp.float32)))
        return True
    except Exception:
        return False


def _buffered1_ok():
    global _BUFFERED1
    if _BUFFERED1 is None:
        _BUFFERED1 = _probe_buffered1()
    return _BUFFERED1


def _resident_spec(block_shape, index_map):
    """Spec for blocks whose index never changes (weights): single-buffer them
    when supported so large (K, Cp) blocks do not take 2x VMEM (v7x)."""
    if _buffered1_ok():
        return pl.BlockSpec(block_shape, index_map, pipeline_mode=pl.Buffered(1))
    return pl.BlockSpec(block_shape, index_map)


# ----------------------------------------------------------------------------
# Kernel A: fused 3x3 / stride-1 / pad-1 conv + BN partial stats
#           (optionally applies the previous stage's BN -> relu -> act-quant
#            to its input block first).
# One image per grid step; the padded-flattened layout makes every tap a
# constant row shift, so the conv is 9 shifted bf16 MXU matmuls in VMEM.
# ----------------------------------------------------------------------------
def _make_conv3x3_kernel(Wout, Np, in_transform, levels):
    inv_levels = 1.0 / levels
    shift0 = _round_up(Wout + 3, 16)      # >= max |row shift|, aligned store

    def kernel(*refs):
        if in_transform:
            mask_ref, x_ref, w_ref, sc_ref, sh_ref, y_ref, s_ref, xe_ref = refs
        else:
            mask_ref, x_ref, w_ref, y_ref, s_ref, xe_ref = refs
        mask = mask_ref[...]                               # (Np, 1) f32
        x = x_ref[...]                                     # (Np, Cin) bf16
        if in_transform:
            # previous stage: folded BatchNorm -> relu -> activation quant,
            # then re-zero the spatial border rows of the padded layout.
            xf = x.astype(jnp.float32) * sc_ref[...] + sh_ref[...]
            xf = jnp.maximum(xf, 0.0)
            xf = jnp.round(jnp.clip(xf, 0.0, 1.0) * levels) * inv_levels
            x = (xf * mask).astype(jnp.bfloat16)
        # Stage the input with `shift0` zero guard rows on both sides so every
        # tap's shifted read is a full-size, in-bounds VMEM slice.
        xe_ref[...] = jnp.zeros(xe_ref.shape, xe_ref.dtype)
        xe_ref[shift0:shift0 + Np, :] = x
        acc = None
        for kh in range(3):
            for kw in range(3):
                d = (kh - 1) * (Wout + 2) + (kw - 1)       # constant row shift
                lhs = xe_ref[shift0 + d:shift0 + d + Np, :]
                contrib = jnp.dot(lhs, w_ref[kh * 3 + kw],
                                  preferred_element_type=jnp.float32)
                acc = contrib if acc is None else acc + contrib
        y_ref[...] = acc.astype(jnp.bfloat16)              # pre-BN output, bf16
        am = acc * mask                                    # stats: interior rows only
        s_ref[...] = jnp.concatenate(
            [jnp.sum(am, axis=0, keepdims=True),
             jnp.sum(am * am, axis=0, keepdims=True)], axis=0)

    return kernel


def conv3x3_fused(x_pf, w_taps, Wout, mask, in_scale=None, in_shift=None, abit=4):
    """x_pf: (B, Np, Cin) bf16 padded-flattened input; w_taps: (9, Cin, Cp) bf16.
    Returns (pre-BN conv output (B, Np, Cp) bf16, per-image [sum,sumsq] (B,2,Cp))."""
    B, Np, Cin = x_pf.shape
    Cp = w_taps.shape[-1]
    in_transform = in_scale is not None
    kernel = _make_conv3x3_kernel(Wout, Np, in_transform, float(2 ** abit - 1))

    in_specs = [pl.BlockSpec((Np, 1), lambda b: (0, 0)),              # interior mask
                pl.BlockSpec((None, Np, Cin), lambda b: (b, 0, 0)),   # one image
                _resident_spec((9, Cin, Cp), lambda b: (0, 0, 0))]    # weights
    inputs = [mask, x_pf, w_taps]
    if in_transform:
        vec = pl.BlockSpec((1, Cin), lambda b: (0, 0))
        in_specs += [vec, vec]
        inputs += [in_scale, in_shift]

    return pl.pallas_call(
        kernel,
        out_shape=(jax.ShapeDtypeStruct((B, Np, Cp), jnp.bfloat16),
                   jax.ShapeDtypeStruct((B, 2, Cp), jnp.float32)),
        grid=(B,),
        in_specs=in_specs,
        out_specs=(pl.BlockSpec((None, Np, Cp), lambda b: (b, 0, 0)),
                   pl.BlockSpec((None, 2, Cp), lambda b: (b, 0, 0))),
        scratch_shapes=[pltpu.VMEM(
            (Np + 2 * _round_up(Wout + 3, 16), Cin), jnp.bfloat16)],
        compiler_params=pltpu.CompilerParams(
            dimension_semantics=("parallel",), vmem_limit_bytes=VMEM_LIMIT),
    )(*inputs)


# ----------------------------------------------------------------------------
# Kernel B: plain (rows, K) @ (K, Cp) + BN partial stats.
# Used for the 1x1 identity conv and for the strided conv1 (im2col fallback).
# Input rows live in the padded-flattened layout with all-zero border rows, so
# the statistics are exact without masking (no conv bias).
# ----------------------------------------------------------------------------
def _matmul_stats_kernel(x_ref, w_ref, y_ref, s_ref):
    acc = jnp.dot(x_ref[...], w_ref[...], preferred_element_type=jnp.float32)
    y_ref[...] = acc.astype(jnp.bfloat16)
    s_ref[...] = jnp.concatenate(
        [jnp.sum(acc, axis=0, keepdims=True),
         jnp.sum(acc * acc, axis=0, keepdims=True)], axis=0)


def matmul_stats(x_rows, w_mat):
    B, Nr, K = x_rows.shape
    Cp = w_mat.shape[1]
    return pl.pallas_call(
        _matmul_stats_kernel,
        out_shape=(jax.ShapeDtypeStruct((B, Nr, Cp), jnp.bfloat16),
                   jax.ShapeDtypeStruct((B, 2, Cp), jnp.float32)),
        grid=(B,),
        in_specs=[pl.BlockSpec((None, Nr, K), lambda b: (b, 0, 0)),
                  _resident_spec((K, Cp), lambda b: (0, 0))],
        out_specs=(pl.BlockSpec((None, Nr, Cp), lambda b: (b, 0, 0)),
                   pl.BlockSpec((None, 2, Cp), lambda b: (b, 0, 0))),
        compiler_params=pltpu.CompilerParams(
            dimension_semantics=("parallel",), vmem_limit_bytes=VMEM_LIMIT),
    )(x_rows, w_mat)


# ----------------------------------------------------------------------------
# Kernel C: final sweep — BN2, residual add (with the identity's BN3 + quant
# fused in for the resize branch), and the last activation quant.
# ----------------------------------------------------------------------------
def _make_final_kernel(resize, levels):
    inv_levels = 1.0 / levels

    def quant(v):
        return jnp.round(jnp.clip(v, 0.0, 1.0) * levels) * inv_levels

    def kernel(*refs):
        if resize:
            y_ref, sc2_ref, sh2_ref, id_ref, sc3_ref, sh3_ref, o_ref = refs
            idv = quant(id_ref[...].astype(jnp.float32) * sc3_ref[...]
                        + sh3_ref[...])                    # act_q3(bn3(id conv))
        else:
            y_ref, sc2_ref, sh2_ref, id_ref, o_ref = refs
            idv = id_ref[...].astype(jnp.float32)          # pass-through identity
        t = y_ref[...].astype(jnp.float32) * sc2_ref[...] + sh2_ref[...]   # bn2
        o_ref[...] = quant(t + idv)                        # residual add + act_q2

    return kernel


def final_apply(y2, scale2, shift2, identity, scale3, shift3, abit=4):
    B, Np, Cp = y2.shape
    resize = scale3 is not None
    kernel = _make_final_kernel(resize, float(2 ** abit - 1))
    row = pl.BlockSpec((None, Np, Cp), lambda b: (b, 0, 0))
    vec = pl.BlockSpec((1, Cp), lambda b: (0, 0))
    in_specs = [row, vec, vec, row]
    inputs = [y2, scale2, shift2, identity]
    if resize:
        in_specs += [vec, vec]
        inputs += [scale3, shift3]
    return pl.pallas_call(
        kernel,
        out_shape=jax.ShapeDtypeStruct((B, Np, Cp), jnp.float32),
        grid=(B,),
        in_specs=in_specs,
        out_specs=row,
        compiler_params=pltpu.CompilerParams(
            dimension_semantics=("parallel",), vmem_limit_bytes=VMEM_LIMIT),
    )(*inputs)


# ----------------------------------------------------------------------------
# Glue (plain JAX): weight quantization, layouts, BN folding.
# ----------------------------------------------------------------------------
def weight_quant(w, wbit):
    """DoReFa-style weight quantizer assumed for Conv2d_Q."""
    if wbit >= 32:
        return w
    t = jnp.tanh(w)
    t = t / (2.0 * jnp.max(jnp.abs(t))) + 0.5
    n = 2.0 ** wbit - 1.0
    return 2.0 * (jnp.round(t * n) / n) - 1.0


def _pad_flat(x_nhwc):
    """(B,H,W,C) -> (B,(H+2)*(W+2),C) bf16 with zero spatial border rows."""
    B, H, W, C = x_nhwc.shape
    xp = jnp.pad(x_nhwc, ((0, 0), (1, 1), (1, 1), (0, 0)))
    return xp.reshape(B, (H + 2) * (W + 2), C).astype(jnp.bfloat16)


def _interior_mask(Ho, Wo):
    hh = jnp.arange(Ho + 2)
    ww = jnp.arange(Wo + 2)
    m = ((hh[:, None] >= 1) & (hh[:, None] <= Ho)
         & (ww[None, :] >= 1) & (ww[None, :] <= Wo))
    return m.astype(jnp.float32).reshape((Ho + 2) * (Wo + 2), 1)


def _im2col3x3_strided(x_nhwc, stride):
    """3x3/pad-1 patches for stride>1, in padded-flattened layout (zero borders)."""
    B, H, W, C = x_nhwc.shape
    xp = jnp.pad(x_nhwc, ((0, 0), (1, 1), (1, 1), (0, 0)))
    Ho = (H + 2 - 3) // stride + 1
    Wo = (W + 2 - 3) // stride + 1
    cols = [xp[:, kh:kh + (Ho - 1) * stride + 1:stride,
               kw:kw + (Wo - 1) * stride + 1:stride, :]
            for kh in range(3) for kw in range(3)]
    patches = jnp.concatenate(cols, axis=-1)              # (B, Ho, Wo, 9C)
    return _pad_flat(patches), (Ho, Wo)


def _w3x3_taps(w_oihw, Cin_eff, Cp):
    """[Cout,Cin,3,3] -> [9, Cin_eff, Cp] bf16 (zero-padded rows/cols)."""
    Cout, Cin = w_oihw.shape[0], w_oihw.shape[1]
    w = jnp.transpose(w_oihw, (2, 3, 1, 0)).reshape(9, Cin, Cout)
    w = jnp.pad(w, ((0, 0), (0, Cin_eff - Cin), (0, Cp - Cout)))
    return w.astype(jnp.bfloat16)


def _w_to_mat(w_oihw, Cp):
    """[Cout,Cin,kh,kw] -> [kh*kw*Cin, Cp] bf16 ((kh,kw,c) row order)."""
    Cout, Cin, kh, kw = w_oihw.shape
    w = jnp.transpose(w_oihw, (2, 3, 1, 0)).reshape(kh * kw * Cin, Cout)
    return jnp.pad(w, ((0, 0), (0, Cp - Cout))).astype(jnp.bfloat16)


def _fold_bn(stats, m_rows, gamma, beta, Cout, Cp):
    """Training-mode BatchNorm (biased variance) folded to one (scale, shift)."""
    s1 = jnp.sum(stats[:, 0, :], axis=0)
    s2 = jnp.sum(stats[:, 1, :], axis=0)
    mean = s1 / m_rows
    var = jnp.maximum(s2 / m_rows - mean * mean, 0.0)
    g = jnp.pad(gamma.astype(jnp.float32), (0, Cp - Cout))
    b = jnp.pad(beta.astype(jnp.float32), (0, Cp - Cout))
    scale = g * jax.lax.rsqrt(var + EPS)
    shift = b - mean * scale
    return scale.reshape(1, Cp), shift.reshape(1, Cp)


# ----------------------------------------------------------------------------
# ResBlock_Q forward
# ----------------------------------------------------------------------------
@partial(jax.jit, static_argnums=(2, 3, 4))
def resblock_q_forward(x_nchw, params, wbit, abit, stride):
    x = jnp.transpose(x_nchw, (0, 2, 3, 1)).astype(jnp.float32)   # NCHW -> NHWC
    B, H, W, Cin = x.shape
    Cout = params["w1"].shape[0]
    Cp = _round_up(Cout, LANE)
    resize = (Cin != Cout) or (stride != 1)
    Ho = (H + 2 - 3) // stride + 1
    Wo = (W + 2 - 3) // stride + 1
    m_rows = B * Ho * Wo
    mask = _interior_mask(Ho, Wo)

    # ---- conv1: pre-BN output (bf16, padded-flattened layout) + batch stats ----
    if stride == 1:
        x_pf = _pad_flat(x)
        w1 = _w3x3_taps(weight_quant(params["w1"], wbit), Cin, Cp)
        y1, st1 = conv3x3_fused(x_pf, w1, W, mask)
    else:
        # TODO(synk): strided 3x3 conv still builds patches with XLA im2col.
        p1, _ = _im2col3x3_strided(x, stride)
        w1 = _w_to_mat(weight_quant(params["w1"], wbit), Cp)
        y1, st1 = matmul_stats(p1, w1)
    scale1, shift1 = _fold_bn(st1, m_rows, params["g1"], params["beta1"], Cout, Cp)

    # ---- identity branch ----
    if resize:
        x_sub = x[:, ::stride, ::stride, :]                       # 1x1 conv stride s
        yid, st3 = matmul_stats(_pad_flat(x_sub),
                                _w_to_mat(weight_quant(params["w_id"], wbit), Cp))
        sc3, sh3 = _fold_bn(st3, m_rows, params["g3"], params["beta3"], Cout, Cp)
        identity = yid
    else:
        identity = jnp.pad(x_pf, ((0, 0), (0, 0), (0, Cp - Cin)))  # bf16 pass-through
        sc3 = sh3 = None

    # ---- conv2: conv1's BN + relu + act-quant fused into its input load ----
    w2 = _w3x3_taps(weight_quant(params["w2"], wbit), Cp, Cp)
    y2, st2 = conv3x3_fused(y1, w2, Wo, mask,
                            in_scale=scale1, in_shift=shift1, abit=abit)
    scale2, shift2 = _fold_bn(st2, m_rows, params["g2"], params["beta2"], Cout, Cp)

    # ---- BN2 + residual add (+ fused BN3/quant of the identity) + act-quant ----
    out_pf = final_apply(y2, scale2, shift2, identity, sc3, sh3, abit=abit)
    out = out_pf.reshape(B, Ho + 2, Wo + 2, Cp)[:, 1:Ho + 1, 1:Wo + 1, :Cout]
    return jnp.transpose(out, (0, 3, 1, 2))                       # -> NCHW


# ----------------------------------------------------------------------------
# Pure-JAX f32 reference (lax.conv) used only to sanity-check the kernels.
# ----------------------------------------------------------------------------
def ref_forward(x, params, wbit, abit, stride):
    def conv(x, w, b, s, pad):
        y = jax.lax.conv_general_dilated(x, w, (s, s), [(pad, pad), (pad, pad)],
                                         dimension_numbers=("NCHW", "OIHW", "NCHW"))
        return y + b.reshape(1, -1, 1, 1)

    def bn(y, g, be):
        mean = jnp.mean(y, axis=(0, 2, 3), keepdims=True)
        var = jnp.mean((y - mean) ** 2, axis=(0, 2, 3), keepdims=True)
        return (y - mean) * jax.lax.rsqrt(var + EPS) * g.reshape(1, -1, 1, 1) \
            + be.reshape(1, -1, 1, 1)

    def aq(y):
        n = 2.0 ** abit - 1.0
        return jnp.round(jnp.clip(y, 0.0, 1.0) * n) / n

    Cin, Cout = x.shape[1], params["w1"].shape[0]
    if (Cin != Cout) or (stride != 1):
        ident = aq(bn(conv(x, weight_quant(params["w_id"], wbit),
                           params["b_id"], stride, 0),
                      params["g3"], params["beta3"]))
    else:
        ident = x
    h = jnp.maximum(bn(conv(x, weight_quant(params["w1"], wbit),
                            params["b1"], stride, 1),
                       params["g1"], params["beta1"]), 0.0)
    h = aq(h)
    h = bn(conv(h, weight_quant(params["w2"], wbit), params["b2"], 1, 1),
           params["g2"], params["beta2"])
    return aq(h + ident)


# ----------------------------------------------------------------------------
if __name__ == "__main__":
    _ = _buffered1_ok()        # probe pipeline_mode support once, eagerly

    def make_params(key, Cin, Cout):
        ks = jax.random.split(key, 12)
        return {
            "w1":   0.3 * jax.random.normal(ks[0], (Cout, Cin, 3, 3), jnp.float32),
            "b1":   0.05 * jax.random.normal(ks[1], (Cout,), jnp.float32),
            "g1":   1.0 + 0.1 * jax.random.normal(ks[2], (Cout,), jnp.float32),
            "beta1": 0.1 * jax.random.normal(ks[3], (Cout,), jnp.float32),
            "w2":   0.3 * jax.random.normal(ks[4], (Cout, Cout, 3, 3), jnp.float32),
            "b2":   0.05 * jax.random.normal(ks[5], (Cout,), jnp.float32),
            "g2":   1.0 + 0.1 * jax.random.normal(ks[6], (Cout,), jnp.float32),
            "beta2": 0.1 * jax.random.normal(ks[7], (Cout,), jnp.float32),
            "w_id": 0.3 * jax.random.normal(ks[8], (Cout, Cin, 1, 1), jnp.float32),
            "b_id": 0.05 * jax.random.normal(ks[9], (Cout,), jnp.float32),
            "g3":   1.0 + 0.1 * jax.random.normal(ks[10], (Cout,), jnp.float32),
            "beta3": 0.1 * jax.random.normal(ks[11], (Cout,), jnp.float32),
        }

    wbit, abit = 4, 4
    bin_w = 1.0 / (2 ** abit - 1)   # one activation-quant bin

    # case 1: resize branch (Cin != Cout, stride 2) -> strided conv1 + 1x1
    #         identity through the matmul kernel, conv2 through the fused 3x3
    #         kernel (with conv1's BN/relu/quant applied on load), resize-mode
    #         final add.
    B, Cin, H, W, Cout, stride = 2, 4, 16, 16, 8, 2
    params = make_params(jax.random.PRNGKey(0), Cin, Cout)
    x = jax.random.normal(jax.random.PRNGKey(1), (B, Cin, H, W), jnp.float32)
    out = jax.block_until_ready(resblock_q_forward(x, params, wbit, abit, stride))
    assert out.shape == (B, Cout, H // stride, W // stride)
    assert bool(jnp.all(jnp.isfinite(out)))
    ref = jax.block_until_ready(ref_forward(x, params, wbit, abit, stride))
    diff = np.abs(np.asarray(out) - np.asarray(ref))
    # bf16 matmuls + bf16 intermediates + chained 4-bit requantization:
    # allow a few quantization-bin flips.
    assert diff.max() <= 5 * bin_w + 1e-3, float(diff.max())
    assert np.mean(diff <= bin_w + 1e-4) > 0.75, float(np.mean(diff <= bin_w + 1e-4))

    # case 2: pass-through identity (Cin == Cout, stride 1), 10x10 spatial ->
    #         both convs through the fused 3x3 kernel, bf16 pass-through
    #         identity in the final kernel.
    B2, C2, H2 = 2, 8, 10
    params2 = make_params(jax.random.PRNGKey(2), C2, C2)
    x2 = jax.random.normal(jax.random.PRNGKey(3), (B2, C2, H2, H2), jnp.float32)
    out2 = jax.block_until_ready(resblock_q_forward(x2, params2, wbit, abit, 1))
    assert out2.shape == (B2, C2, H2, H2)
    assert bool(jnp.all(jnp.isfinite(out2)))
    ref2 = jax.block_until_ready(ref_forward(x2, params2, wbit, abit, 1))
    diff2 = np.abs(np.asarray(out2) - np.asarray(ref2))
    assert diff2.max() <= 5 * bin_w + 1e-3, float(diff2.max())
    assert np.mean(diff2 <= bin_w + 1e-4) > 0.75, float(np.mean(diff2 <= bin_w + 1e-4))

    print("KERNEL_OK")
</pallas_src>

<mosaic_0001>
module attributes {stable_mosaic.version = 11 : i64} {
  func.func @_copy(%arg0: i32, %arg1: memref<8x128xf32, #tpu.memory_space<vmem>>, %arg2: memref<8x128xf32, #tpu.memory_space<vmem>>) attributes {dimension_semantics = [#tpu.dimension_semantics<arbitrary>], iteration_bounds = array<i64: 1>, scalar_prefetch = 0 : i64, scratch_operands = 0 : i64, tpu.core_type = #tpu.core_type<tc>, window_params = [{pipeline_mode = #tpu.pipeline_mode<synchronous>, transform_indices = @transform_0, window_bounds = array<i64: 8, 128>}, {pipeline_mode = #tpu.pipeline_mode<synchronous>, transform_indices = @transform_1, window_bounds = array<i64: 8, 128>}]} {
    %c0 = arith.constant 0 : index
    %c0_0 = arith.constant 0 : index
    %0 = vector.load %arg1[%c0, %c0_0] : memref<8x128xf32, #tpu.memory_space<vmem>>, vector<8x128xf32>
    %c0_1 = arith.constant 0 : index
    %c0_2 = arith.constant 0 : index
    %1 = vector.load %arg2[%c0_1, %c0_2] : memref<8x128xf32, #tpu.memory_space<vmem>>, vector<8x128xf32>
    tpu.vector_store %arg2[%c0_1, %c0_2], %0 {strides = array<i32>} : memref<8x128xf32, #tpu.memory_space<vmem>>, vector<8x128xf32>,
    return
  }
  func.func @transform_0(%arg0: i32) -> (i32, i32) {
    %c0_i32 = arith.constant 0 : i32
    %c0_i32_0 = arith.constant 0 : i32
    %c0_i32_1 = arith.constant 0 : i32
    return %c0_i32, %c0_i32_0 : i32, i32
  }
  func.func @transform_1(%arg0: i32) -> (i32, i32) {
    %c0_i32 = arith.constant 0 : i32
    %c0_i32_0 = arith.constant 0 : i32
    %c0_i32_1 = arith.constant 0 : i32
    return %c0_i32, %c0_i32_0 : i32, i32
  }
}

module attributes {stable_mosaic.version = 11 : i64} {
  func.func @_matmul_stats_kernel(%arg0: i32, %arg1: memref<1x100x36xbf16, #tpu.memory_space<vmem>>, %arg2: memref<36x128xbf16, #tpu.memory_space<vmem>>, %arg3: memref<1x100x128xbf16, #tpu.memory_space<vmem>>, %arg4: memref<1x2x128xf32, #tpu.memory_space<vmem>>) attributes {dimension_semantics = [#tpu.dimension_semantics<parallel>], iteration_bounds = array<i64: 2>, scalar_prefetch = 0 : i64, scratch_operands = 0 : i64, tpu.core_type = #tpu.core_type<tc>, window_params = [{transform_indices = @transform_0, window_bounds = array<i64: 1, 100, 36>}, {pipeline_mode = #tpu.pipeline_mode<synchronous>, transform_indices = @transform_1, window_bounds = array<i64: 36, 128>}, {transform_indices = @transform_2, window_bounds = array<i64: 1, 100, 128>}, {transform_indices = @transform_3, window_bounds = array<i64: 1, 2, 128>}]} {
    %c0 = arith.constant 0 : index
    %c0_0 = arith.constant 0 : index
    %c0_1 = arith.constant 0 : index
    %0 = vector.load %arg1[%c0, %c0_0, %c0_1] : memref<1x100x36xbf16, #tpu.memory_space<vmem>>, vector<1x100x36xbf16>
    %1 = vector.shape_cast %0 : vector<1x100x36xbf16> to vector<100x36xbf16>
    %c0_2 = arith.constant 0 : index
    %c0_3 = arith.constant 0 : index
    %2 = vector.load %arg2[%c0_2, %c0_3] : memref<36x128xbf16, #tpu.memory_space<vmem>>, vector<36x128xbf16>
    %cst = arith.constant dense<0.000000e+00> : vector<100x128xf32>
    %3 = tpu.matmul %1, %2, %cst {dimension_numbers = #tpu.dot_dimension_numbers<[1], [0], [0], [1], [0, 0, 1, 1], [], []>} : vector<100x36xbf16>, vector<36x128xbf16>, vector<100x128xf32> -> vector<100x128xf32>
    %4 = arith.truncf %3 : vector<100x128xf32> to vector<100x128xbf16>
    %c0_4 = arith.constant 0 : index
    %c0_5 = arith.constant 0 : index
    %c0_6 = arith.constant 0 : index
    %5 = vector.load %arg3[%c0_4, %c0_5, %c0_6] : memref<1x100x128xbf16, #tpu.memory_space<vmem>>, vector<1x100x128xbf16>
    %6 = vector.shape_cast %5 : vector<1x100x128xbf16> to vector<100x128xbf16>
    %7 = vector.shape_cast %4 : vector<100x128xbf16> to vector<1x100x128xbf16>
    tpu.vector_store %arg3[%c0_4, %c0_5, %c0_6], %7 {strides = array<i32>} : memref<1x100x128xbf16, #tpu.memory_space<vmem>>, vector<1x100x128xbf16>,
    %cst_7 = arith.constant dense<0.000000e+00> : vector<128xf32>
    %8 = vector.multi_reduction <add>, %3, %cst_7 [0] : vector<100x128xf32> to vector<128xf32>
    %9 = vector.shape_cast %8 : vector<128xf32> to vector<1x128xf32>
    %10 = arith.mulf %3, %3 : vector<100x128xf32>
    %cst_8 = arith.constant dense<0.000000e+00> : vector<128xf32>
    %11 = vector.multi_reduction <add>, %10, %cst_8 [0] : vector<100x128xf32> to vector<128xf32>
    %12 = vector.shape_cast %11 : vector<128xf32> to vector<1x128xf32>
    %13 = tpu.concatenate %9, %12 in 0 : vector<1x128xf32>, vector<1x128xf32> -> vector<2x128xf32>
    %c0_9 = arith.constant 0 : index
    %c0_10 = arith.constant 0 : index
    %c0_11 = arith.constant 0 : index
    %14 = vector.load %arg4[%c0_9, %c0_10, %c0_11] : memref<1x2x128xf32, #tpu.memory_space<vmem>>, vector<1x2x128xf32>
    %15 = vector.shape_cast %14 : vector<1x2x128xf32> to vector<2x128xf32>
    %16 = vector.shape_cast %13 : vector<2x128xf32> to vector<1x2x128xf32>
    tpu.vector_store %arg4[%c0_9, %c0_10, %c0_11], %16 {strides = array<i32>} : memref<1x2x128xf32, #tpu.memory_space<vmem>>, vector<1x2x128xf32>,
    return
  }
  func.func @transform_0(%arg0: i32) -> (i32, i32, i32) {
    %c0_i32 = arith.constant 0 : i32
    %c0_i32_0 = arith.constant 0 : i32
    %c0_i32_1 = arith.constant 0 : i32
    return %arg0, %c0_i32, %c0_i32_0 : i32, i32, i32
  }
  func.func @transform_1(%arg0: i32) -> (i32, i32) {
    %c0_i32 = arith.constant 0 : i32
    %c0_i32_0 = arith.constant 0 : i32
    %c0_i32_1 = arith.constant 0 : i32
    return %c0_i32, %c0_i32_0 : i32, i32
  }
  func.func @transform_2(%arg0: i32) -> (i32, i32, i32) {
    %c0_i32 = arith.constant 0 : i32
    %c0_i32_0 = arith.constant 0 : i32
    %c0_i32_1 = arith.constant 0 : i32
    return %arg0, %c0_i32, %c0_i32_0 : i32, i32, i32
  }
  func.func @transform_3(%arg0: i32) -> (i32, i32, i32) {
    %c0_i32 = arith.constant 0 : i32
    %c0_i32_0 = arith.constant 0 : i32
    %c0_i32_1 = arith.constant 0 : i32
    return %arg0, %c0_i32, %c0_i32_0 : i32, i32, i32
  }
}

module attributes {stable_mosaic.version = 11 : i64} {
  func.func @kernel(%arg0: i32, %arg1: memref<100x1xf32, #tpu.memory_space<vmem>>, %arg2: memref<1x100x128xbf16, #tpu.memory_space<vmem>>, %arg3: memref<9x128x128xbf16, #tpu.memory_space<vmem>>, %arg4: memref<1x128xf32, #tpu.memory_space<vmem>>, %arg5: memref<1x128xf32, #tpu.memory_space<vmem>>, %arg6: memref<1x100x128xbf16, #tpu.memory_space<vmem>>, %arg7: memref<1x2x128xf32, #tpu.memory_space<vmem>>, %arg8: memref<132x128xbf16, #tpu.memory_space<vmem>>) attributes {dimension_semantics = [#tpu.dimension_semantics<parallel>], iteration_bounds = array<i64: 2>, scalar_prefetch = 0 : i64, scratch_operands = 1 : i64, tpu.core_type = #tpu.core_type<tc>, window_params = [{pipeline_mode = #tpu.pipeline_mode<synchronous>, transform_indices = @transform_0, window_bounds = array<i64: 100, 1>}, {transform_indices = @transform_1, window_bounds = array<i64: 1, 100, 128>}, {pipeline_mode = #tpu.pipeline_mode<synchronous>, transform_indices = @transform_2, window_bounds = array<i64: 9, 128, 128>}, {pipeline_mode = #tpu.pipeline_mode<synchronous>, transform_indices = @transform_3, window_bounds = array<i64: 1, 128>}, {pipeline_mode = #tpu.pipeline_mode<synchronous>, transform_indices = @transform_4, window_bounds = array<i64: 1, 128>}, {transform_indices = @transform_5, window_bounds = array<i64: 1, 100, 128>}, {transform_indices = @transform_6, window_bounds = array<i64: 1, 2, 128>}]} {
    %c0 = arith.constant 0 : index
    %c0_0 = arith.constant 0 : index
    %0 = vector.load %arg1[%c0, %c0_0] : memref<100x1xf32, #tpu.memory_space<vmem>>, vector<100x1xf32>
    %c0_1 = arith.constant 0 : index
    %c0_2 = arith.constant 0 : index
    %c0_3 = arith.constant 0 : index
    %1 = vector.load %arg2[%c0_1, %c0_2, %c0_3] : memref<1x100x128xbf16, #tpu.memory_space<vmem>>, vector<1x100x128xbf16>
    %2 = vector.shape_cast %1 : vector<1x100x128xbf16> to vector<100x128xbf16>
    %3 = arith.extf %2 : vector<100x128xbf16> to vector<100x128xf32>
    %c0_4 = arith.constant 0 : index
    %c0_5 = arith.constant 0 : index
    %4 = vector.load %arg4[%c0_4, %c0_5] : memref<1x128xf32, #tpu.memory_space<vmem>>, vector<1x128xf32>
    %5 = vector.broadcast %4 : vector<1x128xf32> to vector<100x128xf32>
    %6 = arith.mulf %3, %5 : vector<100x128xf32>
    %c0_6 = arith.constant 0 : index
    %c0_7 = arith.constant 0 : index
    %7 = vector.load %arg5[%c0_6, %c0_7] : memref<1x128xf32, #tpu.memory_space<vmem>>, vector<1x128xf32>
    %8 = vector.broadcast %7 : vector<1x128xf32> to vector<100x128xf32>
    %9 = arith.addf %6, %8 : vector<100x128xf32>
    %cst = arith.constant 0.000000e+00 : f32
    %10 = vector.broadcast %cst : f32 to vector<100x128xf32>
    %11 = arith.maximumf %9, %10 : vector<100x128xf32>
    %cst_8 = arith.constant 0.000000e+00 : f32
    %cst_9 = arith.constant 1.000000e+00 : f32
    %12 = vector.broadcast %cst_8 : f32 to vector<100x128xf32>
    %13 = arith.maximumf %12, %11 : vector<100x128xf32>
    %14 = vector.broadcast %cst_9 : f32 to vector<100x128xf32>
    %15 = arith.minimumf %14, %13 : vector<100x128xf32>
    %cst_10 = arith.constant 1.500000e+01 : f32
    %16 = vector.broadcast %cst_10 : f32 to vector<100x128xf32>
    %17 = arith.mulf %15, %16 : vector<100x128xf32>
    %18 = math.roundeven %17 : vector<100x128xf32>
    %cst_11 = arith.constant 0.0666666701 : f32
    %19 = vector.broadcast %cst_11 : f32 to vector<100x128xf32>
    %20 = arith.mulf %18, %19 : vector<100x128xf32>
    %21 = vector.broadcast %0 : vector<100x1xf32> to vector<100x128xf32>
    %22 = arith.mulf %20, %21 : vector<100x128xf32>
    %23 = arith.truncf %22 : vector<100x128xf32> to vector<100x128xbf16>
    %cst_12 = arith.constant 0.000000e+00 : bf16
    %24 = vector.broadcast %cst_12 : bf16 to vector<132x128xbf16>
    %c0_13 = arith.constant 0 : index
    %c0_14 = arith.constant 0 : index
    %25 = vector.load %arg8[%c0_13, %c0_14] : memref<132x128xbf16, #tpu.memory_space<vmem>>, vector<132x128xbf16>
    tpu.vector_store %arg8[%c0_13, %c0_14], %24 {strides = array<i32>} : memref<132x128xbf16, #tpu.memory_space<vmem>>, vector<132x128xbf16>,
    %c16 = arith.constant 16 : index
    %c0_15 = arith.constant 0 : index
    %26 = vector.load %arg8[%c16, %c0_15] : memref<132x128xbf16, #tpu.memory_space<vmem>>, vector<100x128xbf16>
    tpu.vector_store %arg8[%c16, %c0_15], %23 {strides = array<i32>} : memref<132x128xbf16, #tpu.memory_space<vmem>>, vector<100x128xbf16>,
    %c5 = arith.constant 5 : index
    %c0_16 = arith.constant 0 : index
    %27 = vector.load %arg8[%c5, %c0_16] : memref<132x128xbf16, #tpu.memory_space<vmem>>, vector<100x128xbf16>
    %c0_17 = arith.constant 0 : index
    %c0_18 = arith.constant 0 : index
    %c0_19 = arith.constant 0 : index
    %28 = vector.load %arg3[%c0_17, %c0_18, %c0_19] : memref<9x128x128xbf16, #tpu.memory_space<vmem>>, vector<1x128x128xbf16>
    %29 = vector.shape_cast %28 : vector<1x128x128xbf16> to vector<128x128xbf16>
    %cst_20 = arith.constant dense<0.000000e+00> : vector<100x128xf32>
    %30 = tpu.matmul %27, %29, %cst_20 {dimension_numbers = #tpu.dot_dimension_numbers<[1], [0], [0], [1], [0, 0, 1, 1], [], []>} : vector<100x128xbf16>, vector<128x128xbf16>, vector<100x128xf32> -> vector<100x128xf32>
    %c6 = arith.constant 6 : index
    %c0_21 = arith.constant 0 : index
    %31 = vector.load %arg8[%c6, %c0_21] : memref<132x128xbf16, #tpu.memory_space<vmem>>, vector<100x128xbf16>
    %c1 = arith.constant 1 : index
    %c0_22 = arith.constant 0 : index
    %c0_23 = arith.constant 0 : index
    %32 = vector.load %arg3[%c1, %c0_22, %c0_23] : memref<9x128x128xbf16, #tpu.memory_space<vmem>>, vector<1x128x128xbf16>
    %33 = vector.shape_cast %32 : vector<1x128x128xbf16> to vector<128x128xbf16>
    %cst_24 = arith.constant dense<0.000000e+00> : vector<100x128xf32>
    %34 = tpu.matmul %31, %33, %cst_24 {dimension_numbers = #tpu.dot_dimension_numbers<[1], [0], [0], [1], [0, 0, 1, 1], [], []>} : vector<100x128xbf16>, vector<128x128xbf16>, vector<100x128xf32> -> vector<100x128xf32>
    %35 = arith.addf %30, %34 : vector<100x128xf32>
    %c7 = arith.constant 7 : index
    %c0_25 = arith.constant 0 : index
    %36 = vector.load %arg8[%c7, %c0_25] : memref<132x128xbf16, #tpu.memory_space<vmem>>, vector<100x128xbf16>
    %c2 = arith.constant 2 : index
    %c0_26 = arith.constant 0 : index
    %c0_27 = arith.constant 0 : index
    %37 = vector.load %arg3[%c2, %c0_26, %c0_27] : memref<9x128x128xbf16, #tpu.memory_space<vmem>>, vector<1x128x128xbf16>
    %38 = vector.shape_cast %37 : vector<1x128x128xbf16> to vector<128x128xbf16>
    %cst_28 = arith.constant dense<0.000000e+00> : vector<100x128xf32>
    %39 = tpu.matmul %36, %38, %cst_28 {dimension_numbers = #tpu.dot_dimension_numbers<[1], [0], [0], [1], [0, 0, 1, 1], [], []>} : vector<100x128xbf16>, vector<128x128xbf16>, vector<100x128xf32> -> vector<100x128xf32>
    %40 = arith.addf %35, %39 : vector<100x128xf32>
    %c15 = arith.constant 15 : index
    %c0_29 = arith.constant 0 : index
    %41 = vector.load %arg8[%c15, %c0_29] : memref<132x128xbf16, #tpu.memory_space<vmem>>, vector<100x128xbf16>
    %c3 = arith.constant 3 : index
    %c0_30 = arith.constant 0 : index
    %c0_31 = arith.constant 0 : index
    %42 = vector.load %arg3[%c3, %c0_30, %c0_31] : memref<9x128x128xbf16, #tpu.memory_space<vmem>>, vector<1x128x128xbf16>
    %43 = vector.shape_cast %42 : vector<1x128x128xbf16> to vector<128x128xbf16>
    %cst_32 = arith.constant dense<0.000000e+00> : vector<100x128xf32>
    %44 = tpu.matmul %41, %43, %cst_32 {dimension_numbers = #tpu.dot_dimension_numbers<[1], [0], [0], [1], [0, 0, 1, 1], [], []>} : vector<100x128xbf16>, vector<128x128xbf16>, vector<100x128xf32> -> vector<100x128xf32>
    %45 = arith.addf %40, %44 : vector<100x128xf32>
    %c16_33 = arith.constant 16 : index
    %c0_34 = arith.constant 0 : index
    %46 = vector.load %arg8[%c16_33, %c0_34] : memref<132x128xbf16, #tpu.memory_space<vmem>>, vector<100x128xbf16>
    %c4 = arith.constant 4 : index
    %c0_35 = arith.constant 0 : index
    %c0_36 = arith.constant 0 : index
    %47 = vector.load %arg3[%c4, %c0_35, %c0_36] : memref<9x128x128xbf16, #tpu.memory_space<vmem>>, vector<1x128x128xbf16>
    %48 = vector.shape_cast %47 : vector<1x128x128xbf16> to vector<128x128xbf16>
    %cst_37 = arith.constant dense<0.000000e+00> : vector<100x128xf32>
    %49 = tpu.matmul %46, %48, %cst_37 {dimension_numbers = #tpu.dot_dimension_numbers<[1], [0], [0], [1], [0, 0, 1, 1], [], []>} : vector<100x128xbf16>, vector<128x128xbf16>, vector<100x128xf32> -> vector<100x128xf32>
    %50 = arith.addf %45, %49 : vector<100x128xf32>
    %c17 = arith.constant 17 : index
    %c0_38 = arith.constant 0 : index
    %51 = vector.load %arg8[%c17, %c0_38] : memref<132x128xbf16, #tpu.memory_space<vmem>>, vector<100x128xbf16>
    %c5_39 = arith.constant 5 : index
    %c0_40 = arith.constant 0 : index
    %c0_41 = arith.constant 0 : index
    %52 = vector.load %arg3[%c5_39, %c0_40, %c0_41] : memref<9x128x128xbf16, #tpu.memory_space<vmem>>, vector<1x128x128xbf16>
    %53 = vector.shape_cast %52 : vector<1x128x128xbf16> to vector<128x128xbf16>
    %cst_42 = arith.constant dense<0.000000e+00> : vector<100x128xf32>
    %54 = tpu.matmul %51, %53, %cst_42 {dimension_numbers = #tpu.dot_dimension_numbers<[1], [0], [0], [1], [0, 0, 1, 1], [], []>} : vector<100x128xbf16>, vector<128x128xbf16>, vector<100x128xf32> -> vector<100x128xf32>
    %55 = arith.addf %50, %54 : vector<100x128xf32>
    %c25 = arith.constant 25 : index
    %c0_43 = arith.constant 0 : index
    %56 = vector.load %arg8[%c25, %c0_43] : memref<132x128xbf16, #tpu.memory_space<vmem>>, vector<100x128xbf16>
    %c6_44 = arith.constant 6 : index
    %c0_45 = arith.constant 0 : index
    %c0_46 = arith.constant 0 : index
    %57 = vector.load %arg3[%c6_44, %c0_45, %c0_46] : memref<9x128x128xbf16, #tpu.memory_space<vmem>>, vector<1x128x128xbf16>
    %58 = vector.shape_cast %57 : vector<1x128x128xbf16> to vector<128x128xbf16>
    %cst_47 = arith.constant dense<0.000000e+00> : vector<100x128xf32>
    %59 = tpu.matmul %56, %58, %cst_47 {dimension_numbers = #tpu.dot_dimension_numbers<[1], [0], [0], [1], [0, 0, 1, 1], [], []>} : vector<100x128xbf16>, vector<128x128xbf16>, vector<100x128xf32> -> vector<100x128xf32>
    %60 = arith.addf %55, %59 : vector<100x128xf32>
    %c26 = arith.constant 26 : index
    %c0_48 = arith.constant 0 : index
    %61 = vector.load %arg8[%c26, %c0_48] : memref<132x128xbf16, #tpu.memory_space<vmem>>, vector<100x128xbf16>
    %c7_49 = arith.constant 7 : index
    %c0_50 = arith.constant 0 : index
    %c0_51 = arith.constant 0 : index
    %62 = vector.load %arg3[%c7_49, %c0_50, %c0_51] : memref<9x128x128xbf16, #tpu.memory_space<vmem>>, vector<1x128x128xbf16>
    %63 = vector.shape_cast %62 : vector<1x128x128xbf16> to vector<128x128xbf16>
    %cst_52 = arith.constant dense<0.000000e+00> : vector<100x128xf32>
    %64 = tpu.matmul %61, %63, %cst_52 {dimension_numbers = #tpu.dot_dimension_numbers<[1], [0], [0], [1], [0, 0, 1, 1], [], []>} : vector<100x128xbf16>, vector<128x128xbf16>, vector<100x128xf32> -> vector<100x128xf32>
    %65 = arith.addf %60, %64 : vector<100x128xf32>
    %c27 = arith.constant 27 : index
    %c0_53 = arith.constant 0 : index
    %66 = vector.load %arg8[%c27, %c0_53] : memref<132x128xbf16, #tpu.memory_space<vmem>>, vector<100x128xbf16>
    %c8 = arith.constant 8 : index
    %c0_54 = arith.constant 0 : index
    %c0_55 = arith.constant 0 : index
    %67 = vector.load %arg3[%c8, %c0_54, %c0_55] : memref<9x128x128xbf16, #tpu.memory_space<vmem>>, vector<1x128x128xbf16>
    %68 = vector.shape_cast %67 : vector<1x128x128xbf16> to vector<128x128xbf16>
    %cst_56 = arith.constant dense<0.000000e+00> : vector<100x128xf32>
    %69 = tpu.matmul %66, %68, %cst_56 {dimension_numbers = #tpu.dot_dimension_numbers<[1], [0], [0], [1], [0, 0, 1, 1], [], []>} : vector<100x128xbf16>, vector<128x128xbf16>, vector<100x128xf32> -> vector<100x128xf32>
    %70 = arith.addf %65, %69 : vector<100x128xf32>
    %71 = arith.truncf %70 : vector<100x128xf32> to vector<100x128xbf16>
    %c0_57 = arith.constant 0 : index
    %c0_58 = arith.constant 0 : index
    %c0_59 = arith.constant 0 : index
    %72 = vector.load %arg6[%c0_57, %c0_58, %c0_59] : memref<1x100x128xbf16, #tpu.memory_space<vmem>>, vector<1x100x128xbf16>
    %73 = vector.shape_cast %72 : vector<1x100x128xbf16> to vector<100x128xbf16>
    %74 = vector.shape_cast %71 : vector<100x128xbf16> to vector<1x100x128xbf16>
    tpu.vector_store %arg6[%c0_57, %c0_58, %c0_59], %74 {strides = array<i32>} : memref<1x100x128xbf16, #tpu.memory_space<vmem>>, vector<1x100x128xbf16>,
    %75 = vector.broadcast %0 : vector<100x1xf32> to vector<100x128xf32>
    %76 = arith.mulf %70, %75 : vector<100x128xf32>
    %cst_60 = arith.constant dense<0.000000e+00> : vector<128xf32>
    %77 = vector.multi_reduction <add>, %76, %cst_60 [0] : vector<100x128xf32> to vector<128xf32>
    %78 = vector.shape_cast %77 : vector<128xf32> to vector<1x128xf32>
    %79 = arith.mulf %76, %76 : vector<100x128xf32>
    %cst_61 = arith.constant dense<0.000000e+00> : vector<128xf32>
    %80 = vector.multi_reduction <add>, %79, %cst_61 [0] : vector<100x128xf32> to vector<128xf32>
    %81 = vector.shape_cast %80 : vector<128xf32> to vector<1x128xf32>
    %82 = tpu.concatenate %78, %81 in 0 : vector<1x128xf32>, vector<1x128xf32> -> vector<2x128xf32>
    %c0_62 = arith.constant 0 : index
    %c0_63 = arith.constant 0 : index
    %c0_64 = arith.constant 0 : index
    %83 = vector.load %arg7[%c0_62, %c0_63, %c0_64] : memref<1x2x128xf32, #tpu.memory_space<vmem>>, vector<1x2x128xf32>
    %84 = vector.shape_cast %83 : vector<1x2x128xf32> to vector<2x128xf32>
    %85 = vector.shape_cast %82 : vector<2x128xf32> to vector<1x2x128xf32>
    tpu.vector_store %arg7[%c0_62, %c0_63, %c0_64], %85 {strides = array<i32>} : memref<1x2x128xf32, #tpu.memory_space<vmem>>, vector<1x2x128xf32>,
    return
  }
  func.func @transform_0(%arg0: i32) -> (i32, i32) {
    %c0_i32 = arith.constant 0 : i32
    %c0_i32_0 = arith.constant 0 : i32
    %c0_i32_1 = arith.constant 0 : i32
    return %c0_i32, %c0_i32_0 : i32, i32
  }
  func.func @transform_1(%arg0: i32) -> (i32, i32, i32) {
    %c0_i32 = arith.constant 0 : i32
    %c0_i32_0 = arith.constant 0 : i32
    %c0_i32_1 = arith.constant 0 : i32
    return %arg0, %c0_i32, %c0_i32_0 : i32, i32, i32
  }
  func.func @transform_2(%arg0: i32) -> (i32, i32, i32) {
    %c0_i32 = arith.constant 0 : i32
    %c0_i32_0 = arith.constant 0 : i32
    %c0_i32_1 = arith.constant 0 : i32
    %c0_i32_2 = arith.constant 0 : i32
    return %c0_i32, %c0_i32_0, %c0_i32_1 : i32, i32, i32
  }
  func.func @transform_3(%arg0: i32) -> (i32, i32) {
    %c0_i32 = arith.constant 0 : i32
    %c0_i32_0 = arith.constant 0 : i32
    %c0_i32_1 = arith.constant 0 : i32
    return %c0_i32, %c0_i32_0 : i32, i32
  }
  func.func @transform_4(%arg0: i32) -> (i32, i32) {
    %c0_i32 = arith.constant 0 : i32
    %c0_i32_0 = arith.constant 0 : i32
    %c0_i32_1 = arith.constant 0 : i32
    return %c0_i32, %c0_i32_0 : i32, i32
  }
  func.func @transform_5(%arg0: i32) -> (i32, i32, i32) {
    %c0_i32 = arith.constant 0 : i32
    %c0_i32_0 = arith.constant 0 : i32
    %c0_i32_1 = arith.constant 0 : i32
    return %arg0, %c0_i32, %c0_i32_0 : i32, i32, i32
  }
  func.func @transform_6(%arg0: i32) -> (i32, i32, i32) {
    %c0_i32 = arith.constant 0 : i32
    %c0_i32_0 = arith.constant 0 : i32
    %c0_i32_1 = arith.constant 0 : i32
    return %arg0, %c0_i32, %c0_i32_0 : i32, i32, i32
  }
}

module attributes {stable_mosaic.version = 11 : i64} {
  func.func @kernel(%arg0: i32, %arg1: memref<1x100x128xbf16, #tpu.memory_space<vmem>>, %arg2: memref<1x128xf32, #tpu.memory_space<vmem>>, %arg3: memref<1x128xf32, #tpu.memory_space<vmem>>, %arg4: memref<1x100x128xbf16, #tpu.memory_space<vmem>>, %arg5: memref<1x128xf32, #tpu.memory_space<vmem>>, %arg6: memref<1x128xf32, #tpu.memory_space<vmem>>, %arg7: memref<1x100x128xf32, #tpu.memory_space<vmem>>) attributes {dimension_semantics = [#tpu.dimension_semantics<parallel>], iteration_bounds = array<i64: 2>, scalar_prefetch = 0 : i64, scratch_operands = 0 : i64, tpu.core_type = #tpu.core_type<tc>, window_params = [{transform_indices = @transform_0, window_bounds = array<i64: 1, 100, 128>}, {pipeline_mode = #tpu.pipeline_mode<synchronous>, transform_indices = @transform_1, window_bounds = array<i64: 1, 128>}, {pipeline_mode = #tpu.pipeline_mode<synchronous>, transform_indices = @transform_2, window_bounds = array<i64: 1, 128>}, {transform_indices = @transform_3, window_bounds = array<i64: 1, 100, 128>}, {pipeline_mode = #tpu.pipeline_mode<synchronous>, transform_indices = @transform_4, window_bounds = array<i64: 1, 128>}, {pipeline_mode = #tpu.pipeline_mode<synchronous>, transform_indices = @transform_5, window_bounds = array<i64: 1, 128>}, {transform_indices = @transform_6, window_bounds = array<i64: 1, 100, 128>}]} {
    %c0 = arith.constant 0 : index
    %c0_0 = arith.constant 0 : index
    %c0_1 = arith.constant 0 : index
    %0 = vector.load %arg4[%c0, %c0_0, %c0_1] : memref<1x100x128xbf16, #tpu.memory_space<vmem>>, vector<1x100x128xbf16>
    %1 = vector.shape_cast %0 : vector<1x100x128xbf16> to vector<100x128xbf16>
    %2 = arith.extf %1 : vector<100x128xbf16> to vector<100x128xf32>
    %c0_2 = arith.constant 0 : index
    %c0_3 = arith.constant 0 : index
    %3 = vector.load %arg5[%c0_2, %c0_3] : memref<1x128xf32, #tpu.memory_space<vmem>>, vector<1x128xf32>
    %4 = vector.broadcast %3 : vector<1x128xf32> to vector<100x128xf32>
    %5 = arith.mulf %2, %4 : vector<100x128xf32>
    %c0_4 = arith.constant 0 : index
    %c0_5 = arith.constant 0 : index
    %6 = vector.load %arg6[%c0_4, %c0_5] : memref<1x128xf32, #tpu.memory_space<vmem>>, vector<1x128xf32>
    %7 = vector.broadcast %6 : vector<1x128xf32> to vector<100x128xf32>
    %8 = arith.addf %5, %7 : vector<100x128xf32>
    %cst = arith.constant 0.000000e+00 : f32
    %cst_6 = arith.constant 1.000000e+00 : f32
    %9 = vector.broadcast %cst : f32 to vector<100x128xf32>
    %10 = arith.maximumf %9, %8 : vector<100x128xf32>
    %11 = vector.broadcast %cst_6 : f32 to vector<100x128xf32>
    %12 = arith.minimumf %11, %10 : vector<100x128xf32>
    %cst_7 = arith.constant 1.500000e+01 : f32
    %13 = vector.broadcast %cst_7 : f32 to vector<100x128xf32>
    %14 = arith.mulf %12, %13 : vector<100x128xf32>
    %15 = math.roundeven %14 : vector<100x128xf32>
    %cst_8 = arith.constant 0.0666666701 : f32
    %16 = vector.broadcast %cst_8 : f32 to vector<100x128xf32>
    %17 = arith.mulf %15, %16 : vector<100x128xf32>
    %c0_9 = arith.constant 0 : index
    %c0_10 = arith.constant 0 : index
    %c0_11 = arith.constant 0 : index
    %18 = vector.load %arg1[%c0_9, %c0_10, %c0_11] : memref<1x100x128xbf16, #tpu.memory_space<vmem>>, vector<1x100x128xbf16>
    %19 = vector.shape_cast %18 : vector<1x100x128xbf16> to vector<100x128xbf16>
    %20 = arith.extf %19 : vector<100x128xbf16> to vector<100x128xf32>
    %c0_12 = arith.constant 0 : index
    %c0_13 = arith.constant 0 : index
    %21 = vector.load %arg2[%c0_12, %c0_13] : memref<1x128xf32, #tpu.memory_space<vmem>>, vector<1x128xf32>
    %22 = vector.broadcast %21 : vector<1x128xf32> to vector<100x128xf32>
    %23 = arith.mulf %20, %22 : vector<100x128xf32>
    %c0_14 = arith.constant 0 : index
    %c0_15 = arith.constant 0 : index
    %24 = vector.load %arg3[%c0_14, %c0_15] : memref<1x128xf32, #tpu.memory_space<vmem>>, vector<1x128xf32>
    %25 = vector.broadcast %24 : vector<1x128xf32> to vector<100x128xf32>
    %26 = arith.addf %23, %25 : vector<100x128xf32>
    %27 = arith.addf %26, %17 : vector<100x128xf32>
    %cst_16 = arith.constant 0.000000e+00 : f32
    %cst_17 = arith.constant 1.000000e+00 : f32
    %28 = vector.broadcast %cst_16 : f32 to vector<100x128xf32>
    %29 = arith.maximumf %28, %27 : vector<100x128xf32>
    %30 = vector.broadcast %cst_17 : f32 to vector<100x128xf32>
    %31 = arith.minimumf %30, %29 : vector<100x128xf32>
    %cst_18 = arith.constant 1.500000e+01 : f32
    %32 = vector.broadcast %cst_18 : f32 to vector<100x128xf32>
    %33 = arith.mulf %31, %32 : vector<100x128xf32>
    %34 = math.roundeven %33 : vector<100x128xf32>
    %cst_19 = arith.constant 0.0666666701 : f32
    %35 = vector.broadcast %cst_19 : f32 to vector<100x128xf32>
    %36 = arith.mulf %34, %35 : vector<100x128xf32>
    %c0_20 = arith.constant 0 : index
    %c0_21 = arith.constant 0 : index
    %c0_22 = arith.constant 0 : index
    %37 = vector.load %arg7[%c0_20, %c0_21, %c0_22] : memref<1x100x128xf32, #tpu.memory_space<vmem>>, vector<1x100x128xf32>
    %38 = vector.shape_cast %37 : vector<1x100x128xf32> to vector<100x128xf32>
    %39 = vector.shape_cast %36 : vector<100x128xf32> to vector<1x100x128xf32>
    tpu.vector_store %arg7[%c0_20, %c0_21, %c0_22], %39 {strides = array<i32>} : memref<1x100x128xf32, #tpu.memory_space<vmem>>, vector<1x100x128xf32>,
    return
  }
  func.func @transform_0(%arg0: i32) -> (i32, i32, i32) {
    %c0_i32 = arith.constant 0 : i32
    %c0_i32_0 = arith.constant 0 : i32
    %c0_i32_1 = arith.constant 0 : i32
    return %arg0, %c0_i32, %c0_i32_0 : i32, i32, i32
  }
  func.func @transform_1(%arg0: i32) -> (i32, i32) {
    %c0_i32 = arith.constant 0 : i32
    %c0_i32_0 = arith.constant 0 : i32
    %c0_i32_1 = arith.constant 0 : i32
    return %c0_i32, %c0_i32_0 : i32, i32
  }
  func.func @transform_2(%arg0: i32) -> (i32, i32) {
    %c0_i32 = arith.constant 0 : i32
    %c0_i32_0 = arith.constant 0 : i32
    %c0_i32_1 = arith.constant 0 : i32
    return %c0_i32, %c0_i32_0 : i32, i32
  }
  func.func @transform_3(%arg0: i32) -> (i32, i32, i32) {
    %c0_i32 = arith.constant 0 : i32
    %c0_i32_0 = arith.constant 0 : i32
    %c0_i32_1 = arith.constant 0 : i32
    return %arg0, %c0_i32, %c0_i32_0 : i32, i32, i32
  }
  func.func @transform_4(%arg0: i32) -> (i32, i32) {
    %c0_i32 = arith.constant 0 : i32
    %c0_i32_0 = arith.constant 0 : i32
    %c0_i32_1 = arith.constant 0 : i32
    return %c0_i32, %c0_i32_0 : i32, i32
  }
  func.func @transform_5(%arg0: i32) -> (i32, i32) {
    %c0_i32 = arith.constant 0 : i32
    %c0_i32_0 = arith.constant 0 : i32
    %c0_i32_1 = arith.constant 0 : i32
    return %c0_i32, %c0_i32_0 : i32, i32
  }
  func.func @transform_6(%arg0: i32) -> (i32, i32, i32) {
    %c0_i32 = arith.constant 0 : i32
    %c0_i32_0 = arith.constant 0 : i32
    %c0_i32_1 = arith.constant 0 : i32
    return %arg0, %c0_i32, %c0_i32_0 : i32, i32, i32
  }
}

module attributes {stable_mosaic.version = 11 : i64} {
  func.func @_matmul_stats_kernel(%arg0: i32, %arg1: memref<1x100x4xbf16, #tpu.memory_space<vmem>>, %arg2: memref<4x128xbf16, #tpu.memory_space<vmem>>, %arg3: memref<1x100x128xbf16, #tpu.memory_space<vmem>>, %arg4: memref<1x2x128xf32, #tpu.memory_space<vmem>>) attributes {dimension_semantics = [#tpu.dimension_semantics<parallel>], iteration_bounds = array<i64: 2>, scalar_prefetch = 0 : i64, scratch_operands = 0 : i64, tpu.core_type = #tpu.core_type<tc>, window_params = [{transform_indices = @transform_0, window_bounds = array<i64: 1, 100, 4>}, {pipeline_mode = #tpu.pipeline_mode<synchronous>, transform_indices = @transform_1, window_bounds = array<i64: 4, 128>}, {transform_indices = @transform_2, window_bounds = array<i64: 1, 100, 128>}, {transform_indices = @transform_3, window_bounds = array<i64: 1, 2, 128>}]} {
    %c0 = arith.constant 0 : index
    %c0_0 = arith.constant 0 : index
    %c0_1 = arith.constant 0 : index
    %0 = vector.load %arg1[%c0, %c0_0, %c0_1] : memref<1x100x4xbf16, #tpu.memory_space<vmem>>, vector<1x100x4xbf16>
    %1 = vector.shape_cast %0 : vector<1x100x4xbf16> to vector<100x4xbf16>
    %c0_2 = arith.constant 0 : index
    %c0_3 = arith.constant 0 : index
    %2 = vector.load %arg2[%c0_2, %c0_3] : memref<4x128xbf16, #tpu.memory_space<vmem>>, vector<4x128xbf16>
    %cst = arith.constant dense<0.000000e+00> : vector<100x128xf32>
    %3 = tpu.matmul %1, %2, %cst {dimension_numbers = #tpu.dot_dimension_numbers<[1], [0], [0], [1], [0, 0, 1, 1], [], []>} : vector<100x4xbf16>, vector<4x128xbf16>, vector<100x128xf32> -> vector<100x128xf32>
    %4 = arith.truncf %3 : vector<100x128xf32> to vector<100x128xbf16>
    %c0_4 = arith.constant 0 : index
    %c0_5 = arith.constant 0 : index
    %c0_6 = arith.constant 0 : index
    %5 = vector.load %arg3[%c0_4, %c0_5, %c0_6] : memref<1x100x128xbf16, #tpu.memory_space<vmem>>, vector<1x100x128xbf16>
    %6 = vector.shape_cast %5 : vector<1x100x128xbf16> to vector<100x128xbf16>
    %7 = vector.shape_cast %4 : vector<100x128xbf16> to vector<1x100x128xbf16>
    tpu.vector_store %arg3[%c0_4, %c0_5, %c0_6], %7 {strides = array<i32>} : memref<1x100x128xbf16, #tpu.memory_space<vmem>>, vector<1x100x128xbf16>,
    %cst_7 = arith.constant dense<0.000000e+00> : vector<128xf32>
    %8 = vector.multi_reduction <add>, %3, %cst_7 [0] : vector<100x128xf32> to vector<128xf32>
    %9 = vector.shape_cast %8 : vector<128xf32> to vector<1x128xf32>
    %10 = arith.mulf %3, %3 : vector<100x128xf32>
    %cst_8 = arith.constant dense<0.000000e+00> : vector<128xf32>
    %11 = vector.multi_reduction <add>, %10, %cst_8 [0] : vector<100x128xf32> to vector<128xf32>
    %12 = vector.shape_cast %11 : vector<128xf32> to vector<1x128xf32>
    %13 = tpu.concatenate %9, %12 in 0 : vector<1x128xf32>, vector<1x128xf32> -> vector<2x128xf32>
    %c0_9 = arith.constant 0 : index
    %c0_10 = arith.constant 0 : index
    %c0_11 = arith.constant 0 : index
    %14 = vector.load %arg4[%c0_9, %c0_10, %c0_11] : memref<1x2x128xf32, #tpu.memory_space<vmem>>, vector<1x2x128xf32>
    %15 = vector.shape_cast %14 : vector<1x2x128xf32> to vector<2x128xf32>
    %16 = vector.shape_cast %13 : vector<2x128xf32> to vector<1x2x128xf32>
    tpu.vector_store %arg4[%c0_9, %c0_10, %c0_11], %16 {strides = array<i32>} : memref<1x2x128xf32, #tpu.memory_space<vmem>>, vector<1x2x128xf32>,
    return
  }
  func.func @transform_0(%arg0: i32) -> (i32, i32, i32) {
    %c0_i32 = arith.constant 0 : i32
    %c0_i32_0 = arith.constant 0 : i32
    %c0_i32_1 = arith.constant 0 : i32
    return %arg0, %c0_i32, %c0_i32_0 : i32, i32, i32
  }
  func.func @transform_1(%arg0: i32) -> (i32, i32) {
    %c0_i32 = arith.constant 0 : i32
    %c0_i32_0 = arith.constant 0 : i32
    %c0_i32_1 = arith.constant 0 : i32
    return %c0_i32, %c0_i32_0 : i32, i32
  }
  func.func @transform_2(%arg0: i32) -> (i32, i32, i32) {
    %c0_i32 = arith.constant 0 : i32
    %c0_i32_0 = arith.constant 0 : i32
    %c0_i32_1 = arith.constant 0 : i32
    return %arg0, %c0_i32, %c0_i32_0 : i32, i32, i32
  }
  func.func @transform_3(%arg0: i32) -> (i32, i32, i32) {
    %c0_i32 = arith.constant 0 : i32
    %c0_i32_0 = arith.constant 0 : i32
    %c0_i32_1 = arith.constant 0 : i32
    return %arg0, %c0_i32, %c0_i32_0 : i32, i32, i32
  }
}

</mosaic_0001>

<bundles_post_ra>
// kernel: tpu_custom_call.1
= control target key start
LH: loop header
LB: loop body
LE: loop exit
PB: predicated region body
PF: predicated region fallthrough
CT: control target
= control target key end

     0   :  { %6 = vsyncpa [#allocation3], 0  ;;  %s124_s0 = inlined_call_operand.hbm [shape: f32[8,128], index: 0, kind: input, shape index: {}]   ;;  %s125_s1 = inlined_call_operand.hbm [shape: f32[8,128], index: 1, kind: output, shape index: {}]  }
   0x1   :  { %7 = vsyncpa [#allocation4], 0  ;;  %s88_s6 = smov [#allocation2]   ;;  %s40_s10 = scalar_lea.hbm %s124_s0, 128 }
   0x2   :  { %s14_s7 = sshll.u32 %s88_s6, 4  ;;  %p41_p0 = scmp.ne.s32.totalorder %s124_s0, %s40_s10  ;;  %s15_s7 = int_to_ptr.vmem [resolvable:$true] %s14_s7 }
   0x3   :  { %p44_p1 = scmp.lt.u32.totalorder %s40_s10, %s124_s0 }
   0x5   :  { %p46_p2 = pnand %p44_p1, %p41_p0 }
   0x7   :  { %49 = shalt.err (!%p46_p2)
}
   0x8   :  { %s50_s15 = scalar_lea.vmem %s15_s7, 128  ;;  %p55_p4 = scmp.lt.s32.totalorder %s15_s7, %s15_s7 }
   0x9   :  { %p51_p3 = scmp.ne.s32.totalorder %s15_s7, %s50_s15  ;;  %p56_p5 = scmp.lt.s32.totalorder %s50_s15, %s50_s15 }
   0xb   :  { %p57_p6 = por %p56_p5, %p55_p4 }
   0xd   :  { %p58_p7 = pnand %p57_p6, %p51_p3 }
   0xf   :  { %61 = shalt.err (!%p58_p7)
}
  0x10   :  { %17 = dma.hbm_to_vmem [thread:$0]  %s124_s0, 128, %s15_s7, [#allocation3]  }
  0x11   :  { %84 = dma.done.wait [#allocation3], 128  }
  0x12   :  { %85 = vsyncadd [#allocation3], 4294967168  ;;  %s89_s18 = smov [#allocation5]   ;;  %v21_v0 = vld [vmem:[#allocation2] sm:$0xff] }
  0x13   :  { %s29_s19 = sshll.u32 %s89_s18, 4  ;;  %22 = vst [vmem:[#allocation5] sm:$0xff] %v21_v0  ;;  %s30_s19 = int_to_ptr.vmem [resolvable:$true] %s29_s19 }
  0x14   :  { %s62_s20 = scalar_lea.vmem %s30_s19, 128  ;;  %p67_p9 = scmp.lt.s32.totalorder %s30_s19, %s30_s19 }
  0x15   :  { %p63_p8 = scmp.ne.s32.totalorder %s30_s19, %s62_s20  ;;  %p68_p10 = scmp.lt.s32.totalorder %s62_s20, %s62_s20 }
  0x17   :  { %p69_p11 = por %p68_p10, %p67_p9 }
  0x19   :  { %p70_p12 = pnand %p69_p11, %p63_p8 }
  0x1b   :  { %73 = shalt.err (!%p70_p12)
}
  0x1c   :  { %s74_s23 = scalar_lea.hbm %s125_s1, 128 }
  0x1d   :  { %p75_p13 = scmp.ne.s32.totalorder %s125_s1, %s74_s23  ;;  %p78_p0 = scmp.lt.u32.totalorder %s74_s23, %s125_s1 }
  0x1f   :  { %p80_p1 = pnand %p78_p0, %p75_p13 }
  0x21   :  { %83 = shalt.err (!%p80_p1)
}
  0x22   :  { %32 = dma.vmem_to_hbm [thread:$0]  %s30_s19, 128, %s125_s1, [#allocation4]  }
  0x23   :  { %86 = dma.done.wait [#allocation4], 128  }
  0x24   :  { %87 = vsyncadd [#allocation4], 4294967168 }
  0x25   :  { %36 = vsyncpa [#allocation3], 1 }
  0x26   :  { %37 = vsyncpa [#allocation4], 1 }

// kernel: resblock_q_forward.4
= control target key start
LH: loop header
LB: loop body
LE: loop exit
PB: predicated region body
PF: predicated region fallthrough
CT: control target
= control target key end

     0   :  { %s759_s12 = smov 0   ;;  %s815_s0 = inlined_call_operand.vmem [shape: bf16[2,100,36], index: 0, kind: input, shape index: {}]   ;;  %s816_s1 = inlined_call_operand.vmem [shape: bf16[36,128], index: 1, kind: input, shape index: {}]   ;;  %s817_s2 = inlined_call_operand.vmem [shape: bf16[2,100,128], index: 2, kind: output, shape index: {0}]   ;;  %s818_s3 = inlined_call_operand.vmem [shape: f32[2,2,128], index: 3, kind: output, shape index: {1}]  }
   0x1 LB: > { %s570_s13 = sadd.s32 4294967295, %s735_s12   ;;  %p574_p0 = scmp.ge.s32.totalorder %s735_s12, 1  ;;  %s735_s12 = sphi %s759_s12, %s14_s12  }
   0x2   : > { %p140_p1 = scmp.lt.s32.totalorder %s735_s12, 3 }
   0x4   : > { %p141_p2 = pnand %p574_p0, %p140_p1 }
   0x5   : > { %v719_v0 = vld [vmem:[%s816_s1] sm:$0xff] (!%p141_p2)   ;;  %v737_v1 = vmov (!%p141_p2), 0.0   ;;  %v720_v2 = vld [vmem:[%s816_s1 + $0x8] sm:$0xff] (!%p141_p2)   ;;  %v721_v3 = vld [vmem:[%s816_s1 + $0x10] ss:$0 sps:$4 sm:$0x33] (!%p141_p2)  }
   0x6   : > { %144 = sbr.rel (%p141_p2) target bundleno = 284 (0x11c), region = 28  ;;  %668 = vmatprep.subr.bf16.mxu0 (!%p141_p2), %v737_v1  ;;  %702 = vmatprep.subr.bf16.mxu1 (!%p141_p2), %v737_v1  ;;  %vm738_vm0 = vmmov (!%p141_p2), 0   ;;  %p168_p3 = scmp.lt.s32.totalorder (!%p141_p2), %s570_s13, 1  ;;  %vm271_vm1 = vcmask (!%p141_p2), 1041408   ;;  %vm249_vm2 = vcmask (!%p141_p2), 293888   ;;  %vm440_vm3 = vcmask (!%p141_p2), 1043456  }
   0x7   : > { %669 = vmatpush3.bf16.msra.mxu0 (!%p141_p2), %v719_v0  ;;  %705 = vmatpush3.bf16.msra.mxu1 (!%p141_p2), %v719_v0  ;;  %v273_v4 = vsel (!%p141_p2), %vm271_vm1, %v721_v3, 0  ;;  %vm481_vm4 = vcmask (!%p141_p2), 1040384  }
   0x8   : > { %670 = vmatprep.subr.bf16.mxu0 (!%p141_p2), %v737_v1  ;;  %674 = vmatprep.mubr.msk.bf16.mxu0 (!%p141_p2), %vm738_vm0, %v737_v1 }
   0x9   : > { %703 = vmatprep.subr.bf16.mxu1 (!%p141_p2), %v737_v1  ;;  %690 = vmatprep.mubr.msk.bf16.mxu1 (!%p141_p2), %vm738_vm0, %v737_v1 }
   0xb   : > { %671 = vmatpush3.bf16.msra.mxu0 (!%p141_p2), %v720_v2  ;;  %706 = vmatpush3.bf16.msra.mxu1 (!%p141_p2), %v720_v2 }
   0xc   : > { %672 = vmatprep.subr.bf16.mxu0 (!%p141_p2), %v737_v1  ;;  %704 = vmatprep.subr.bf16.mxu1 (!%p141_p2), %v737_v1 }
   0xd   : > { %s820_s13 = smov (!%p168_p3, %s570_s13), 1 }
   0xe   : > { %s708_s20 = smul.u32 52, %s820_s13  ;;  %s577_s27 = sshll.u32 %s820_s13, 1 }
   0xf   : > { %673 = vmatpush3.bf16.msra.mxu0 %v273_v4  ;;  %707 = vmatpush3.bf16.msra.mxu1 %v273_v4  ;;  %s181_s30 = scalar_lea.vmem %s818_s3, %s577_s27 }
  0x10   : > { %s172_s23 = scalar_lea.vmem %s815_s0, %s708_s20  ;;  %s799_s26 = scalar_lea.vmem %s817_s2, %s708_s20 }
  0x11   : > { %v722_v5 = vld [vmem:[%s172_s23] sm:$0xff]   ;;  %v723_v7 = vld [vmem:[%s172_s23 + $0x8] sm:$0xff]   ;;  %v724_v9 = vld [vmem:[%s172_s23 + $0x10] sm:$0xff]  }
  0x12   : > { %675 = vmatmul.mubr.msk.bf16.vlgmr.msra.gmra.mrb[0].mxu0 %vm249_vm2, %v722_v5  ;;  %v725_v6 = vld [vmem:[%s172_s23 + $0x20] sm:$0xff]   ;;  %v727_v8 = vld [vmem:[%s172_s23 + $0x28] sm:$0xff]   ;;  %v728_v10 = vld [vmem:[%s172_s23 + $0x30] ss:$0 sps:$4 sm:$0x33]  }
  0x13   : > { %678 = vmatprep.mubr.msk.bf16.mxu0 %vm738_vm0, %v737_v1  ;;  %691 = vmatmul.mubr.msk.bf16.vlgmr.msra.gmra.mrb[0].mxu1 %vm249_vm2, %v725_v6  ;;  %v726_v11 = vld [vmem:[%s172_s23 + $0x18] sm:$0xff]  }
  0x14   : > { %694 = vmatprep.mubr.msk.bf16.mxu1 %vm738_vm0, %v737_v1 }
  0x1a   : > { %679 = vmatmul.mubr.msk.bf16.gmra.mrb[4].mxu0 %vm249_vm2, %v723_v7 }
  0x1b   : > { %682 = vmatprep.mubr.msk.bf16.mxu0 %vm738_vm0, %v737_v1  ;;  %695 = vmatmul.mubr.msk.bf16.gmra.mrb[4].mxu1 %vm249_vm2, %v727_v8 }
  0x1c   : > { %698 = vmatprep.mubr.msk.bf16.mxu1 %vm738_vm0, %v737_v1 }
  0x22   : > { %683 = vmatmul.mubr.msk.bf16.gmra.mrb[8].mxu0 %vm249_vm2, %v724_v9 }
  0x23   : > { %686 = vmatprep.mubr.msk.bf16.mxu0 %vm738_vm0, %v737_v1  ;;  %699 = vmatmul.mubr.msk.bf16.gmra.mrb[8].mxu1 %vm249_vm2, %v728_v10 }
  0x2a   : > { %687 = vmatmul.mubr.msk.bf16.gmra.mrb[12].mxu0 %vm249_vm2, %v726_v11 }
  0xe5   : > { %v309_v12 = vpop.f32.mrb[0].mxu0 }
  0xe6   : > { %v676_v13 = vpop.f32.mrb[1].mxu0  ;;  %v341_v15 = vpop.f32.mrb[0].mxu1  ;;  %v449_v16 = vmul.f32 %v309_v12, %v309_v12 }
  0xe7   : > { %v312_v14 = vpop.f32.mrb[2].mxu0  ;;  %v692_v21 = vpop.f32.mrb[1].mxu1  ;;  %v457_v4 = vmul.f32 %v341_v15, %v341_v15 }
  0xe8   : > { %v626_v17 = vpack.c.bf16 %v312_v14, %v309_v12  ;;  %v429_v18 = vadd.f32 %v312_v14, %v309_v12  ;;  %v450_v19 = vmul.f32 %v312_v14, %v312_v14  ;;  %v677_v20 = vpop.f32.mrb[3].mxu0  ;;  %v344_v22 = vpop.f32.mrb[2].mxu1 }
  0xe9   : > { %v646_v24 = vpack.c.bf16 %v344_v22, %v341_v15  ;;  %v693_v25 = vpop.f32.mrb[3].mxu1  ;;  %v458_v7 = vmul.f32 %v344_v22, %v344_v22 }
  0xea   : > { %627 = vst [vmem:[%s799_s26] sm:$0xff] %v626_v17   ;;  %v462_v23 = vadd.f32 %v450_v19, %v449_v16 }
  0xeb   : > { %656 = vst [vmem:[%s799_s26 + $0x20] sm:$0xff] %v646_v24  }
  0xed   : > { %v317_v26 = vpop.f32.mrb[4].mxu0 }
  0xee   : > { %v430_v27 = vadd.f32 %v429_v18, %v317_v26  ;;  %v451_v28 = vmul.f32 %v317_v26, %v317_v26  ;;  %v680_v29 = vpop.f32.mrb[5].mxu0  ;;  %v349_v31 = vpop.f32.mrb[4].mxu1 }
  0xef   : > { %v320_v30 = vpop.f32.mrb[6].mxu0  ;;  %v696_v37 = vpop.f32.mrb[5].mxu1  ;;  %v459_v11 = vmul.f32 %v349_v31, %v349_v31 }
  0xf0   : > { %v463_v32 = vadd.f32 %v462_v23, %v451_v28  ;;  %v631_v33 = vpack.c.bf16 %v320_v30, %v317_v26  ;;  %v431_v34 = vadd.f32 %v430_v27, %v320_v30  ;;  %v452_v35 = vmul.f32 %v320_v30, %v320_v30  ;;  %v681_v36 = vpop.f32.mrb[7].mxu0  ;;  %v352_v38 = vpop.f32.mrb[6].mxu1 }
  0xf1   : > { %v651_v40 = vpack.c.bf16 %v352_v38, %v349_v31  ;;  %v697_v41 = vpop.f32.mrb[7].mxu1  ;;  %v460_v17 = vmul.f32 %v352_v38, %v352_v38 }
  0xf2   : > { %653 = vst [vmem:[%s799_s26 + $0x8] sm:$0xff] %v631_v33   ;;  %v464_v39 = vadd.f32 %v463_v32, %v452_v35 }
  0xf3   : > { %657 = vst [vmem:[%s799_s26 + $0x28] sm:$0xff] %v651_v40  }
  0xf5   : > { %v325_v42 = vpop.f32.mrb[8].mxu0 }
  0xf6   : > { %v432_v43 = vadd.f32 %v431_v34, %v325_v42  ;;  %v453_v44 = vmul.f32 %v325_v42, %v325_v42  ;;  %v684_v45 = vpop.f32.mrb[9].mxu0  ;;  %v357_v47 = vpop.f32.mrb[8].mxu1 }
  0xf7   : > { %v328_v46 = vpop.f32.mrb[10].mxu0  ;;  %v700_v53 = vpop.f32.mrb[9].mxu1  ;;  %v622_v54 = vpack.c.bf16 %v357_v47, %v357_v47  ;;  %v461_v10 = vmul.f32 %v357_v47, %v357_v47  ;;  %v441_v14 = vsel %vm440_vm3, %v357_v47, 0.0 }
  0xf8   : > { %v465_v48 = vadd.f32 %v464_v39, %v453_v44  ;;  %v636_v49 = vpack.c.bf16 %v328_v46, %v325_v42  ;;  %v433_v50 = vadd.f32 %v432_v43, %v328_v46  ;;  %v454_v51 = vmul.f32 %v328_v46, %v328_v46  ;;  %v685_v52 = vpop.f32.mrb[11].mxu0  ;;  %v360_v55 = vpop.f32.mrb[10].mxu1 }
  0xf9   : > { %v701_v57 = vpop.f32.mrb[11].mxu1  ;;  %428 = vst [vmem:[%s799_s26 + $0x30] sm:$0x3] %v622_v54  ;;  %v473_v19 = vsel %vm440_vm3, %v461_v10, 0.0 }
  0xfa   : > { %654 = vst [vmem:[%s799_s26 + $0x10] sm:$0xff] %v636_v49   ;;  %v466_v56 = vadd.f32 %v465_v48, %v454_v51 }
  0xfd   : > { %v333_v58 = vpop.f32.mrb[12].mxu0 }
  0xfe   : > { %v434_v59 = vadd.f32 %v433_v50, %v333_v58  ;;  %v455_v60 = vmul.f32 %v333_v58, %v333_v58  ;;  %v688_v61 = vpop.f32.mrb[13].mxu0 }
  0xff   : > { %v336_v62 = vpop.f32.mrb[14].mxu0 }
 0x100   : > { %v467_v63 = vadd.f32 %v466_v56, %v455_v60  ;;  %v641_v0 = vpack.c.bf16 %v336_v62, %v333_v58  ;;  %v435_v1 = vadd.f32 %v434_v59, %v336_v62  ;;  %v456_v2 = vmul.f32 %v336_v62, %v336_v62  ;;  %v689_v3 = vpop.f32.mrb[15].mxu0 }
 0x102   : > { %655 = vst [vmem:[%s799_s26 + $0x18] sm:$0xff] %v641_v0   ;;  %v436_v5 = vadd.f32 %v435_v1, %v341_v15  ;;  %v468_v6 = vadd.f32 %v467_v63, %v456_v2 }
 0x104   : > { %v469_v8 = vadd.f32 %v468_v6, %v457_v4  ;;  %v437_v9 = vadd.f32 %v436_v5, %v344_v22 }
 0x106   : > { %v438_v12 = vadd.f32 %v437_v9, %v349_v31  ;;  %v470_v13 = vadd.f32 %v469_v8, %v458_v7 }
 0x108   : > { %v439_v16 = vadd.f32 %v438_v12, %v352_v38  ;;  %v471_v18 = vadd.f32 %v470_v13, %v459_v11 }
 0x10a   : > { %v472_v20 = vadd.f32 %v471_v18, %v460_v17  ;;  %v442_v21 = vadd.f32 %v441_v14, %v439_v16 }
 0x10c   : > { %v443_v23 = vrot.slane %v442_v21, 4  ;;  %v474_v24 = vadd.f32 %v473_v19, %v472_v20 }
 0x10e   : > { %v444_v15 = vadd.f32 %v443_v23, %v442_v21  ;;  %v475_v25 = vrot.slane %v474_v24, 4 }
 0x110   : > { %v445_v26 = vrot.slane %v444_v15, 2  ;;  %v476_v27 = vadd.f32 %v475_v25, %v474_v24 }
 0x112   : > { %v446_v22 = vadd.f32 %v445_v26, %v444_v15  ;;  %v477_v28 = vrot.slane %v476_v27, 2 }
 0x114   : > { %v447_v29 = vrot.slane %v446_v22, 1  ;;  %v478_v30 = vadd.f32 %v477_v28, %v476_v27 }
 0x116   : > { %v479_v31 = vrot.slane %v478_v30, 1  ;;  %v448_v32 = vadd.f32 %v447_v29, %v446_v22 }
 0x118   : > { %v480_v33 = vadd.f32 %v479_v31, %v478_v30 }
 0x11a   : > { %v482_v34 = vsel %vm481_vm4, %v448_v32, %v480_v33 }
 0x11b   : > { %483 = vst [vmem:[%s181_s30] sm:$0x3] %v482_v34 }
 0x11c PF: > { %s14_s12 = sadd.s32 1, %s735_s12  }
 0x11d   : > { %p11_p4 = scmp.ge.s32.totalorder %s14_s12, 4  }
 0x11f   :  { %13 = sbr.rel (!%p11_p4) target bundleno = 1 (0x1), region = 70 }

// kernel: resblock_q_forward.7
= control target key start
LH: loop header
LB: loop body
LE: loop exit
PB: predicated region body
PF: predicated region fallthrough
CT: control target
= control target key end

     0   :  { %s778_s21 = smov 0   ;;  %s911_s0 = inlined_call_operand.vmem [shape: bf16[2,100,128], index: 0, kind: input, shape index: {}]   ;;  %s912_s1 = inlined_call_operand.vmem [shape: f32[1,128], index: 1, kind: input, shape index: {}]   ;;  %s913_s2 = inlined_call_operand.vmem [shape: f32[1,128], index: 2, kind: input, shape index: {}]   ;;  %s914_s3 = inlined_call_operand.vmem [shape: bf16[2,100,128], index: 3, kind: input, shape index: {}]   ;;  %s915_s4 = inlined_call_operand.vmem [shape: f32[1,128], index: 4, kind: input, shape index: {}]   ;;  %s916_s5 = inlined_call_operand.vmem [shape: f32[1,128], index: 5, kind: input, shape index: {}]   ;;  %s917_s6 = inlined_call_operand.vmem [shape: f32[2,100,128], index: 6, kind: output, shape index: {}]  }
   0x1 LB: > { %s627_s22 = sadd.s32 4294967295, %s741_s21   ;;  %p631_p0 = scmp.ge.s32.totalorder %s741_s21, 1  ;;  %s741_s21 = sphi %s778_s21, %s16_s21  }
   0x2   : > { %p222_p1 = scmp.lt.s32.totalorder %s741_s21, 3 }
   0x4   : > { %p223_p2 = pnand %p631_p0, %p222_p1 }
   0x5   : > { %p257_p3 = scmp.lt.s32.totalorder (!%p223_p2), %s627_s22, 1  ;;  %v802_v0 = vld [vmem:[%s915_s4] ss:$0 sm:$0xff] (!%p223_p2) }
   0x6   : > { %226 = sbr.rel (%p223_p2) target bundleno = 87 (0x57), region = 44  ;;  %v807_v1 = vld [vmem:[%s912_s1] ss:$0 sm:$0xff] (!%p223_p2) }
   0x7   : > { %v816_v10 = vld [vmem:[%s916_s5] ss:$0 sm:$0xff] (!%p223_p2) }
   0x8   : > { %v821_v11 = vld [vmem:[%s913_s2] ss:$0 sm:$0xff] (!%p223_p2) }
   0xd   : > { %s919_s22 = smov (!%p257_p3, %s627_s22), 1 }
   0xe   : > { %s699_s23 = smul.u32 52, %s919_s22 }
   0xf   : > { %s700_s14 = smul.u32 104, %s919_s22 }
  0x10   : > { %s792_s26 = scalar_lea.vmem %s911_s0, %s699_s23  ;;  %s797_s29 = scalar_lea.vmem %s914_s3, %s699_s23 }
  0x11   : > { %v642_v2 = vld [vmem:[%s797_s29] sm:$0xff]   ;;  %v689_v4 = vld [vmem:[%s797_s29 + $0x8] sm:$0xff]   ;;  %v690_v24 = vld [vmem:[%s797_s29 + $0x10] sm:$0xff]   ;;  %s864_s17 = scalar_lea.vmem %s917_s6, %s700_s14 }
  0x12   : > { %v666_v3 = vld [vmem:[%s792_s26] sm:$0xff]   ;;  %v643_v5 = vunpack.c.l.bf16 %v642_v2  ;;  %v644_v7 = vunpack.c.h.bf16 %v642_v2  ;;  %v694_v9 = vld [vmem:[%s792_s26 + $0x8] sm:$0xff]   ;;  %v647_v12 = vunpack.c.l.bf16 %v689_v4  ;;  %v648_v14 = vunpack.c.h.bf16 %v689_v4  ;;  %v695_v25 = vld [vmem:[%s792_s26 + $0x10] sm:$0xff]  }
  0x13   : > { %v667_v6 = vunpack.c.l.bf16 %v666_v3  ;;  %v668_v8 = vunpack.c.h.bf16 %v666_v3  ;;  %v671_v13 = vunpack.c.l.bf16 %v694_v9  ;;  %v672_v15 = vunpack.c.h.bf16 %v694_v9  ;;  %v691_v50 = vld [vmem:[%s797_s29 + $0x18] sm:$0xff]  }
  0x14   : > { %v305_v16 = vmul.f32 %v643_v5, %v802_v0  ;;  %v306_v18 = vmul.f32 %v644_v7, %v802_v0  ;;  %v307_v20 = vmul.f32 %v647_v12, %v802_v0  ;;  %v308_v22 = vmul.f32 %v648_v14, %v802_v0  ;;  %v849_v55 = vld [vmem:[%s792_s26 + $0x18] sm:$0xff]  }
  0x15   : > { %v436_v17 = vmul.f32 %v667_v6, %v807_v1  ;;  %v437_v19 = vmul.f32 %v668_v8, %v807_v1  ;;  %v438_v21 = vmul.f32 %v671_v13, %v807_v1  ;;  %v439_v23 = vmul.f32 %v672_v15, %v807_v1 }
  0x16   : > { %v325_v26 = vadd.f32 %v816_v10, %v305_v16  ;;  %v326_v28 = vadd.f32 %v816_v10, %v306_v18  ;;  %v327_v30 = vadd.f32 %v816_v10, %v307_v20  ;;  %v328_v32 = vadd.f32 %v816_v10, %v308_v22 }
  0x17   : > { %v456_v27 = vadd.f32 %v821_v11, %v436_v17  ;;  %v457_v29 = vadd.f32 %v821_v11, %v437_v19  ;;  %v458_v31 = vadd.f32 %v821_v11, %v438_v21  ;;  %v459_v33 = vadd.f32 %v821_v11, %v439_v23 }
  0x18   : > { %v338_v34 = vmax.f32 %v325_v26, 0.0  ;;  %v339_v35 = vmax.f32 %v326_v28, 0.0  ;;  %v651_v36 = vunpack.c.l.bf16 %v690_v24  ;;  %v675_v37 = vunpack.c.l.bf16 %v695_v25 }
  0x19   : > { %v340_v38 = vmax.f32 %v327_v30, 0.0  ;;  %v341_v39 = vmax.f32 %v328_v32, 0.0  ;;  %v652_v40 = vunpack.c.h.bf16 %v690_v24  ;;  %v676_v41 = vunpack.c.h.bf16 %v695_v25 }
  0x1a   : > { %v351_v42 = vmin.f32 %v338_v34, 1.0  ;;  %v352_v43 = vmin.f32 %v339_v35, 1.0  ;;  %v309_v44 = vmul.f32 %v651_v36, %v802_v0  ;;  %v440_v45 = vmul.f32 %v675_v37, %v807_v1 }
  0x1b   : > { %v353_v46 = vmin.f32 %v340_v38, 1.0  ;;  %v354_v47 = vmin.f32 %v341_v39, 1.0  ;;  %v310_v48 = vmul.f32 %v652_v40, %v802_v0  ;;  %v441_v49 = vmul.f32 %v676_v41, %v807_v1 }
  0x1c   : > { %v364_v51 = vmul.f32 15.0, %v351_v42  ;;  %v365_v52 = vmul.f32 15.0, %v352_v43  ;;  %v329_v53 = vadd.f32 %v816_v10, %v309_v44  ;;  %v460_v54 = vadd.f32 %v821_v11, %v440_v45 }
  0x1d   : > { %v366_v56 = vmul.f32 15.0, %v353_v46  ;;  %v367_v57 = vmul.f32 15.0, %v354_v47  ;;  %v330_v58 = vadd.f32 %v816_v10, %v310_v48  ;;  %v461_v59 = vadd.f32 %v821_v11, %v441_v49 }
  0x1e   : > { %v701_v60 = vround.rtne.f32 %v364_v51  ;;  %v702_v61 = vround.rtne.f32 %v365_v52  ;;  %v342_v62 = vmax.f32 %v329_v53, 0.0  ;;  %v655_v63 = vunpack.c.l.bf16 %v691_v50 }
  0x1f   : > { %v703_v2 = vround.rtne.f32 %v366_v56  ;;  %v704_v3 = vround.rtne.f32 %v367_v57  ;;  %v343_v4 = vmax.f32 %v330_v58, 0.0  ;;  %v679_v5 = vunpack.c.l.bf16 %v849_v55  ;;  %v692_v57 = vld [vmem:[%s797_s29 + $0x20] sm:$0xff]  }
  0x20   : > { %v390_v6 = vmul.f32 0.06666667, %v701_v60  ;;  %v391_v7 = vmul.f32 0.06666667, %v702_v61  ;;  %v355_v8 = vmin.f32 %v342_v62, 1.0  ;;  %v311_v9 = vmul.f32 %v655_v63, %v802_v0  ;;  %v697_v62 = vld [vmem:[%s792_s26 + $0x20] sm:$0xff]  }
  0x21   : > { %v392_v12 = vmul.f32 0.06666667, %v703_v2  ;;  %v393_v13 = vmul.f32 0.06666667, %v704_v3  ;;  %v356_v14 = vmin.f32 %v343_v4, 1.0  ;;  %v442_v15 = vmul.f32 %v679_v5, %v807_v1 }
  0x22   : > { %v469_v16 = vadd.f32 %v456_v27, %v390_v6  ;;  %v470_v17 = vadd.f32 %v457_v29, %v391_v7  ;;  %v368_v18 = vmul.f32 15.0, %v355_v8  ;;  %v331_v19 = vadd.f32 %v816_v10, %v311_v9 }
  0x23   : > { %v471_v20 = vadd.f32 %v458_v31, %v392_v12  ;;  %v472_v21 = vadd.f32 %v459_v33, %v393_v13  ;;  %v369_v22 = vmul.f32 15.0, %v356_v14  ;;  %v462_v23 = vadd.f32 %v821_v11, %v442_v15 }
  0x24   : > { %v482_v24 = vmax.f32 %v469_v16, 0.0  ;;  %v483_v25 = vmax.f32 %v470_v17, 0.0  ;;  %v705_v26 = vround.rtne.f32 %v368_v18  ;;  %v344_v28 = vmax.f32 %v331_v19, 0.0 }
  0x25   : > { %v484_v30 = vmax.f32 %v471_v20, 0.0  ;;  %v485_v32 = vmax.f32 %v472_v21, 0.0  ;;  %v706_v34 = vround.rtne.f32 %v369_v22  ;;  %v656_v35 = vunpack.c.h.bf16 %v691_v50  ;;  %v693_v21 = vld [vmem:[%s797_s29 + $0x28] sm:$0xff]  }
  0x26   : > { %v495_v36 = vmin.f32 %v482_v24, 1.0  ;;  %v496_v27 = vmin.f32 %v483_v25, 1.0  ;;  %v394_v29 = vmul.f32 0.06666667, %v705_v26  ;;  %v357_v37 = vmin.f32 %v344_v28, 1.0 }
  0x27   : > { %v497_v38 = vmin.f32 %v484_v30, 1.0  ;;  %v498_v31 = vmin.f32 %v485_v32, 1.0  ;;  %v395_v39 = vmul.f32 0.06666667, %v706_v34  ;;  %v312_v33 = vmul.f32 %v656_v35, %v802_v0 }
  0x28   : > { %v508_v40 = vmul.f32 15.0, %v495_v36  ;;  %v509_v41 = vmul.f32 15.0, %v496_v27  ;;  %v473_v42 = vadd.f32 %v460_v54, %v394_v29  ;;  %v370_v43 = vmul.f32 15.0, %v357_v37  ;;  %v698_v36 = vld [vmem:[%s792_s26 + $0x28] sm:$0xff]  }
  0x29   : > { %v510_v44 = vmul.f32 15.0, %v497_v38  ;;  %v511_v45 = vmul.f32 15.0, %v498_v31  ;;  %v474_v46 = vadd.f32 %v461_v59, %v395_v39  ;;  %v332_v47 = vadd.f32 %v816_v10, %v312_v33 }
  0x2a   : > { %v714_v48 = vround.rtne.f32 %v508_v40  ;;  %v715_v49 = vround.rtne.f32 %v509_v41  ;;  %v486_v50 = vmax.f32 %v473_v42, 0.0  ;;  %v707_v51 = vround.rtne.f32 %v370_v43 }
  0x2b   : > { %v716_v52 = vround.rtne.f32 %v510_v44  ;;  %v717_v53 = vround.rtne.f32 %v511_v45  ;;  %v487_v54 = vmax.f32 %v474_v46, 0.0  ;;  %v345_v56 = vmax.f32 %v332_v47, 0.0 }
  0x2c   : > { %v534_v58 = vmul.f32 0.06666667, %v714_v48  ;;  %v535_v59 = vmul.f32 0.06666667, %v715_v49  ;;  %v499_v60 = vmin.f32 %v486_v50, 1.0  ;;  %v680_v61 = vunpack.c.h.bf16 %v849_v55 }
  0x2d   : > { %v536_v63 = vmul.f32 0.06666667, %v716_v52  ;;  %v537_v2 = vmul.f32 0.06666667, %v717_v53  ;;  %v500_v3 = vmin.f32 %v487_v54, 1.0  ;;  %v358_v4 = vmin.f32 %v345_v56, 1.0 }
  0x2e   : > { %547 = vst [vmem:[%s864_s17] sm:$0xff] %v534_v58  ;;  %548 = vst [vmem:[%s864_s17 + $0x8] sm:$0xff] %v535_v59  ;;  %v512_v5 = vmul.f32 15.0, %v499_v60  ;;  %v396_v6 = vmul.f32 0.06666667, %v707_v51  ;;  %v443_v7 = vmul.f32 %v680_v61, %v807_v1  ;;  %v659_v8 = vunpack.c.l.bf16 %v692_v57  ;;  %v284_v49 = vld [vmem:[%s797_s29 + $0x30] sm:$0x3] }
  0x2f   : > { %549 = vst [vmem:[%s864_s17 + $0x10] sm:$0xff] %v536_v63  ;;  %550 = vst [vmem:[%s864_s17 + $0x18] sm:$0xff] %v537_v2  ;;  %v513_v9 = vmul.f32 15.0, %v500_v3  ;;  %v371_v12 = vmul.f32 15.0, %v358_v4  ;;  %v660_v13 = vunpack.c.h.bf16 %v692_v57  ;;  %v683_v16 = vunpack.c.l.bf16 %v697_v62  ;;  %v415_v63 = vld [vmem:[%s792_s26 + $0x30] sm:$0x3] }
  0x30   : > { %v718_v14 = vround.rtne.f32 %v512_v5  ;;  %v475_v55 = vadd.f32 %v462_v23, %v396_v6  ;;  %v313_v15 = vmul.f32 %v659_v8, %v802_v0  ;;  %v463_v19 = vadd.f32 %v821_v11, %v443_v7 }
  0x31   : > { %v719_v17 = vround.rtne.f32 %v513_v9  ;;  %v708_v18 = vround.rtne.f32 %v371_v12  ;;  %v314_v20 = vmul.f32 %v660_v13, %v802_v0  ;;  %v684_v26 = vunpack.c.h.bf16 %v697_v62 }
  0x32   : > { %v538_v22 = vmul.f32 0.06666667, %v718_v14  ;;  %v488_v24 = vmax.f32 %v475_v55, 0.0  ;;  %v333_v25 = vadd.f32 %v816_v10, %v313_v15  ;;  %v663_v35 = vunpack.c.l.bf16 %v693_v21 }
  0x33   : > { %v539_v28 = vmul.f32 0.06666667, %v719_v17  ;;  %v397_v30 = vmul.f32 0.06666667, %v708_v18  ;;  %v334_v23 = vadd.f32 %v816_v10, %v314_v20  ;;  %v444_v29 = vmul.f32 %v683_v16, %v807_v1 }
  0x34   : > { %551 = vst [vmem:[%s864_s17 + $0x20] sm:$0xff] %v538_v22  ;;  %v501_v32 = vmin.f32 %v488_v24, 1.0  ;;  %v346_v34 = vmax.f32 %v333_v25, 0.0  ;;  %v664_v38 = vunpack.c.h.bf16 %v693_v21  ;;  %v445_v33 = vmul.f32 %v684_v26, %v807_v1 }
  0x35   : > { %552 = vst [vmem:[%s864_s17 + $0x28] sm:$0xff] %v539_v28  ;;  %v476_v27 = vadd.f32 %v463_v19, %v397_v30  ;;  %v347_v37 = vmax.f32 %v334_v23, 0.0  ;;  %v315_v40 = vmul.f32 %v663_v35, %v802_v0  ;;  %v687_v43 = vunpack.c.l.bf16 %v698_v36 }
  0x36   : > { %v514_v31 = vmul.f32 15.0, %v501_v32  ;;  %v359_v39 = vmin.f32 %v346_v34, 1.0  ;;  %v316_v44 = vmul.f32 %v664_v38, %v802_v0  ;;  %v688_v48 = vunpack.c.h.bf16 %v698_v36 }
  0x37   : > { %v489_v41 = vmax.f32 %v476_v27, 0.0  ;;  %v360_v42 = vmin.f32 %v347_v37, 1.0  ;;  %v335_v47 = vadd.f32 %v816_v10, %v315_v40  ;;  %v464_v51 = vadd.f32 %v821_v11, %v444_v29 }
  0x38   : > { %v720_v45 = vround.rtne.f32 %v514_v31  ;;  %v372_v46 = vmul.f32 15.0, %v359_v39  ;;  %v336_v53 = vadd.f32 %v816_v10, %v316_v44  ;;  %v465_v57 = vadd.f32 %v821_v11, %v445_v33 }
  0x39   : > { %v502_v50 = vmin.f32 %v489_v41, 1.0  ;;  %v373_v52 = vmul.f32 15.0, %v360_v42  ;;  %v348_v58 = vmax.f32 %v335_v47, 0.0  ;;  %v297_v62 = vunpack.c.l.bf16 %v284_v49 }
  0x3a   : > { %v540_v54 = vmul.f32 0.06666667, %v720_v45  ;;  %v709_v56 = vround.rtne.f32 %v372_v46  ;;  %v349_v61 = vmax.f32 %v336_v53, 0.0  ;;  %v446_v4 = vmul.f32 %v687_v43, %v807_v1 }
  0x3b   : > { %v515_v59 = vmul.f32 15.0, %v502_v50  ;;  %v710_v60 = vround.rtne.f32 %v373_v52  ;;  %v361_v3 = vmin.f32 %v348_v58, 1.0  ;;  %v447_v5 = vmul.f32 %v688_v48, %v807_v1 }
  0x3c   : > { %553 = vst [vmem:[%s864_s17 + $0x30] sm:$0xff] %v540_v54  ;;  %v398_v2 = vmul.f32 0.06666667, %v709_v56  ;;  %v362_v8 = vmin.f32 %v349_v61, 1.0  ;;  %v317_v9 = vmul.f32 %v802_v0, %v297_v62  ;;  %v428_v14 = vunpack.c.l.bf16 %v415_v63 }
  0x3d   : > { %v721_v6 = vround.rtne.f32 %v515_v59  ;;  %v399_v7 = vmul.f32 0.06666667, %v710_v60  ;;  %v374_v13 = vmul.f32 15.0, %v361_v3  ;;  %v466_v20 = vadd.f32 %v821_v11, %v446_v4 }
  0x3e   : > { %v477_v12 = vadd.f32 %v464_v51, %v398_v2  ;;  %v375_v16 = vmul.f32 15.0, %v362_v8  ;;  %v337_v17 = vadd.f32 %v816_v10, %v317_v9  ;;  %v467_v24 = vadd.f32 %v821_v11, %v447_v5 }
  0x3f   : > { %v541_v55 = vmul.f32 0.06666667, %v721_v6  ;;  %v478_v15 = vadd.f32 %v465_v57, %v399_v7  ;;  %v711_v19 = vround.rtne.f32 %v374_v13  ;;  %v448_v32 = vmul.f32 %v807_v1, %v428_v14 }
  0x40   : > { %v490_v18 = vmax.f32 %v477_v12, 0.0  ;;  %v712_v22 = vround.rtne.f32 %v375_v16  ;;  %v350_v25 = vmax.f32 %v337_v17, 0.0 }
  0x41   : > { %554 = vst [vmem:[%s864_s17 + $0x38] sm:$0xff] %v541_v55  ;;  %v491_v21 = vmax.f32 %v478_v15, 0.0  ;;  %v400_v0 = vmul.f32 0.06666667, %v711_v19  ;;  %v468_v33 = vadd.f32 %v821_v11, %v448_v32 }
  0x42   : > { %v503_v26 = vmin.f32 %v490_v18, 1.0  ;;  %v401_v30 = vmul.f32 0.06666667, %v712_v22  ;;  %v363_v23 = vmin.f32 %v350_v25, 1.0 }
  0x43   : > { %v504_v28 = vmin.f32 %v491_v21, 1.0  ;;  %v479_v10 = vadd.f32 %v466_v20, %v400_v0 }
  0x44   : > { %v516_v34 = vmul.f32 15.0, %v503_v26  ;;  %v480_v36 = vadd.f32 %v467_v24, %v401_v30  ;;  %v376_v27 = vmul.f32 15.0, %v363_v23 }
  0x45   : > { %v517_v35 = vmul.f32 15.0, %v504_v28  ;;  %v492_v37 = vmax.f32 %v479_v10, 0.0 }
  0x46   : > { %v722_v29 = vround.rtne.f32 %v516_v34  ;;  %v493_v31 = vmax.f32 %v480_v36, 0.0  ;;  %v713_v39 = vround.rtne.f32 %v376_v27 }
  0x47   : > { %v723_v38 = vround.rtne.f32 %v517_v35  ;;  %v505_v41 = vmin.f32 %v492_v37, 1.0 }
  0x48   : > { %v542_v40 = vmul.f32 0.06666667, %v722_v29  ;;  %v506_v1 = vmin.f32 %v493_v31, 1.0  ;;  %v402_v43 = vmul.f32 0.06666667, %v713_v39 }
  0x49   : > { %v543_v42 = vmul.f32 0.06666667, %v723_v38  ;;  %v518_v44 = vmul.f32 15.0, %v505_v41 }
  0x4a   : > { %555 = vst [vmem:[%s864_s17 + $0x40] sm:$0xff] %v542_v40  ;;  %v519_v45 = vmul.f32 15.0, %v506_v1  ;;  %v481_v46 = vadd.f32 %v468_v33, %v402_v43 }
  0x4b   : > { %556 = vst [vmem:[%s864_s17 + $0x48] sm:$0xff] %v543_v42  ;;  %v724_v47 = vround.rtne.f32 %v518_v44 }
  0x4c   : > { %v725_v48 = vround.rtne.f32 %v519_v45  ;;  %v494_v49 = vmax.f32 %v481_v46, 0.0 }
  0x4d   : > { %v544_v50 = vmul.f32 0.06666667, %v724_v47 }
  0x4e   : > { %v545_v51 = vmul.f32 0.06666667, %v725_v48  ;;  %v507_v52 = vmin.f32 %v494_v49, 1.0 }
  0x4f   : > { %557 = vst [vmem:[%s864_s17 + $0x50] sm:$0xff] %v544_v50 }
  0x50   : > { %558 = vst [vmem:[%s864_s17 + $0x58] sm:$0xff] %v545_v51  ;;  %v520_v11 = vmul.f32 15.0, %v507_v52 }
  0x52   : > { %v726_v53 = vround.rtne.f32 %v520_v11 }
  0x54   : > { %v546_v54 = vmul.f32 0.06666667, %v726_v53 }
  0x56   : > { %559 = vst [vmem:[%s864_s17 + $0x60] sm:$0xf] %v546_v54 }
  0x57 PF: > { %s16_s21 = sadd.s32 1, %s741_s21  }
  0x58   : > { %p13_p4 = scmp.ge.s32.totalorder %s16_s21, 4  }
  0x5a   :  { %15 = sbr.rel (!%p13_p4) target bundleno = 1 (0x1), region = 77 }

// kernel: resblock_q_forward.5
= control target key start
LH: loop header
LB: loop body
LE: loop exit
PB: predicated region body
PF: predicated region fallthrough
CT: control target
= control target key end

     0   :  { %s724_s12 = smov 0   ;;  %s774_s0 = inlined_call_operand.vmem [shape: bf16[2,100,4], index: 0, kind: input, shape index: {}]   ;;  %s775_s1 = inlined_call_operand.vmem [shape: bf16[4,128], index: 1, kind: input, shape index: {}]   ;;  %s776_s2 = inlined_call_operand.vmem [shape: bf16[2,100,128], index: 2, kind: output, shape index: {0}]   ;;  %s777_s3 = inlined_call_operand.vmem [shape: f32[2,2,128], index: 3, kind: output, shape index: {1}]  }
   0x1 LB: > { %s551_s13 = sadd.s32 4294967295, %s700_s12   ;;  %p555_p0 = scmp.ge.s32.totalorder %s700_s12, 1  ;;  %s700_s12 = sphi %s724_s12, %s14_s12  }
   0x2   : > { %p140_p1 = scmp.lt.s32.totalorder %s700_s12, 3 }
   0x4   : > { %p141_p2 = pnand %p555_p0, %p140_p1 }
   0x5   : > { %v196_v0 = vld [vmem:[%s775_s1] sm:$0x3] (!%p141_p2)  ;;  %vm252_vm0 = vcmask (!%p141_p2), 1041408   ;;  %p168_p3 = scmp.lt.s32.totalorder (!%p141_p2), %s551_s13, 1  ;;  %v702_v1 = vmov (!%p141_p2), 0.0   ;;  %vm703_vm1 = vmmov (!%p141_p2), 0  }
   0x6   : > { %144 = sbr.rel (%p141_p2) target bundleno = 284 (0x11c), region = 28  ;;  %644 = vmatprep.subr.bf16.mxu0 (!%p141_p2), %v702_v1  ;;  %v254_v2 = vsel (!%p141_p2), %vm252_vm0, %v196_v0, 0  ;;  %646 = vmatprep.mubr.msk.bf16.mxu0 (!%p141_p2), %vm703_vm1, %v702_v1  ;;  %vm230_vm2 = vcmask (!%p141_p2), 31744   ;;  %vm421_vm3 = vcmask (!%p141_p2), 1043456   ;;  %vm462_vm4 = vcmask (!%p141_p2), 1040384  }
   0x7   : > { %645 = vmatpush3.bf16.msra.mxu0 (!%p141_p2), %v254_v2  ;;  %674 = vmatprep.subr.bf16.mxu1 (!%p141_p2), %v702_v1 }
   0x8   : > { %675 = vmatpush3.bf16.msra.mxu1 (!%p141_p2), %v254_v2  ;;  %662 = vmatprep.mubr.msk.bf16.mxu1 (!%p141_p2), %vm703_vm1, %v702_v1 }
   0xd   : > { %s779_s13 = smov (!%p168_p3, %s551_s13), 1 }
   0xe   : > { %s676_s16 = smul.u32 52, %s779_s13  ;;  %s558_s23 = sshll.u32 %s779_s13, 1 }
   0xf   : > { %s181_s26 = scalar_lea.vmem %s777_s3, %s558_s23 }
  0x10   : > { %s172_s19 = scalar_lea.vmem %s774_s0, %s676_s16  ;;  %s758_s22 = scalar_lea.vmem %s776_s2, %s676_s16 }
  0x11   : > { %v687_v3 = vld [vmem:[%s172_s19] sm:$0xff]   ;;  %v688_v5 = vld [vmem:[%s172_s19 + $0x8] sm:$0xff]   ;;  %v689_v7 = vld [vmem:[%s172_s19 + $0x10] sm:$0xff]  }
  0x12   : > { %647 = vmatmul.mubr.msk.bf16.vlgmr.msra.gmra.mrb[0].mxu0 %vm230_vm2, %v687_v3  ;;  %v690_v4 = vld [vmem:[%s172_s19 + $0x20] sm:$0xff]   ;;  %v692_v6 = vld [vmem:[%s172_s19 + $0x28] sm:$0xff]   ;;  %v693_v8 = vld [vmem:[%s172_s19 + $0x30] ss:$0 sps:$4 sm:$0x33]  }
  0x13   : > { %650 = vmatprep.mubr.msk.bf16.mxu0 %vm703_vm1, %v702_v1  ;;  %663 = vmatmul.mubr.msk.bf16.vlgmr.msra.gmra.mrb[0].mxu1 %vm230_vm2, %v690_v4  ;;  %v691_v9 = vld [vmem:[%s172_s19 + $0x18] sm:$0xff]  }
  0x14   : > { %666 = vmatprep.mubr.msk.bf16.mxu1 %vm703_vm1, %v702_v1 }
  0x1a   : > { %651 = vmatmul.mubr.msk.bf16.gmra.mrb[4].mxu0 %vm230_vm2, %v688_v5 }
  0x1b   : > { %654 = vmatprep.mubr.msk.bf16.mxu0 %vm703_vm1, %v702_v1  ;;  %667 = vmatmul.mubr.msk.bf16.gmra.mrb[4].mxu1 %vm230_vm2, %v692_v6 }
  0x1c   : > { %670 = vmatprep.mubr.msk.bf16.mxu1 %vm703_vm1, %v702_v1 }
  0x22   : > { %655 = vmatmul.mubr.msk.bf16.gmra.mrb[8].mxu0 %vm230_vm2, %v689_v7 }
  0x23   : > { %658 = vmatprep.mubr.msk.bf16.mxu0 %vm703_vm1, %v702_v1  ;;  %671 = vmatmul.mubr.msk.bf16.gmra.mrb[8].mxu1 %vm230_vm2, %v693_v8 }
  0x2a   : > { %659 = vmatmul.mubr.msk.bf16.gmra.mrb[12].mxu0 %vm230_vm2, %v691_v9 }
  0xe5   : > { %v290_v10 = vpop.f32.mrb[0].mxu0 }
  0xe6   : > { %v648_v11 = vpop.f32.mrb[1].mxu0  ;;  %v430_v13 = vmul.f32 %v290_v10, %v290_v10  ;;  %v322_v18 = vpop.f32.mrb[0].mxu1 }
  0xe7   : > { %v293_v12 = vpop.f32.mrb[2].mxu0  ;;  %v664_v19 = vpop.f32.mrb[1].mxu1  ;;  %v438_v2 = vmul.f32 %v322_v18, %v322_v18 }
  0xe8   : > { %v604_v14 = vpack.c.bf16 %v293_v12, %v290_v10  ;;  %v410_v15 = vadd.f32 %v293_v12, %v290_v10  ;;  %v431_v16 = vmul.f32 %v293_v12, %v293_v12  ;;  %v649_v17 = vpop.f32.mrb[3].mxu0  ;;  %v325_v21 = vpop.f32.mrb[2].mxu1 }
  0xe9   : > { %v624_v22 = vpack.c.bf16 %v325_v21, %v322_v18  ;;  %v665_v23 = vpop.f32.mrb[3].mxu1  ;;  %v439_v5 = vmul.f32 %v325_v21, %v325_v21 }
  0xea   : > { %605 = vst [vmem:[%s758_s22] sm:$0xff] %v604_v14   ;;  %v443_v20 = vadd.f32 %v431_v16, %v430_v13 }
  0xeb   : > { %634 = vst [vmem:[%s758_s22 + $0x20] sm:$0xff] %v624_v22  }
  0xed   : > { %v298_v24 = vpop.f32.mrb[4].mxu0 }
  0xee   : > { %v411_v25 = vadd.f32 %v410_v15, %v298_v24  ;;  %v432_v26 = vmul.f32 %v298_v24, %v298_v24  ;;  %v652_v27 = vpop.f32.mrb[5].mxu0  ;;  %v330_v34 = vpop.f32.mrb[4].mxu1 }
  0xef   : > { %v301_v28 = vpop.f32.mrb[6].mxu0  ;;  %v668_v35 = vpop.f32.mrb[5].mxu1  ;;  %v440_v9 = vmul.f32 %v330_v34, %v330_v34 }
  0xf0   : > { %v444_v29 = vadd.f32 %v443_v20, %v432_v26  ;;  %v609_v30 = vpack.c.bf16 %v301_v28, %v298_v24  ;;  %v412_v31 = vadd.f32 %v411_v25, %v301_v28  ;;  %v433_v32 = vmul.f32 %v301_v28, %v301_v28  ;;  %v653_v33 = vpop.f32.mrb[7].mxu0  ;;  %v333_v37 = vpop.f32.mrb[6].mxu1 }
  0xf1   : > { %v629_v38 = vpack.c.bf16 %v333_v37, %v330_v34  ;;  %v669_v39 = vpop.f32.mrb[7].mxu1  ;;  %v441_v14 = vmul.f32 %v333_v37, %v333_v37 }
  0xf2   : > { %631 = vst [vmem:[%s758_s22 + $0x8] sm:$0xff] %v609_v30   ;;  %v445_v36 = vadd.f32 %v444_v29, %v433_v32 }
  0xf3   : > { %635 = vst [vmem:[%s758_s22 + $0x28] sm:$0xff] %v629_v38  }
  0xf5   : > { %v306_v40 = vpop.f32.mrb[8].mxu0 }
  0xf6   : > { %v413_v41 = vadd.f32 %v412_v31, %v306_v40  ;;  %v434_v42 = vmul.f32 %v306_v40, %v306_v40  ;;  %v656_v43 = vpop.f32.mrb[9].mxu0  ;;  %v338_v50 = vpop.f32.mrb[8].mxu1 }
  0xf7   : > { %v309_v44 = vpop.f32.mrb[10].mxu0  ;;  %v600_v51 = vpack.c.bf16 %v338_v50, %v338_v50  ;;  %v672_v52 = vpop.f32.mrb[9].mxu1  ;;  %v442_v8 = vmul.f32 %v338_v50, %v338_v50  ;;  %v422_v12 = vsel %vm421_vm3, %v338_v50, 0.0 }
  0xf8   : > { %v446_v45 = vadd.f32 %v445_v36, %v434_v42  ;;  %v614_v46 = vpack.c.bf16 %v309_v44, %v306_v40  ;;  %v414_v47 = vadd.f32 %v413_v41, %v309_v44  ;;  %v435_v48 = vmul.f32 %v309_v44, %v309_v44  ;;  %v657_v49 = vpop.f32.mrb[11].mxu0  ;;  %v341_v54 = vpop.f32.mrb[10].mxu1 }
  0xf9   : > { %409 = vst [vmem:[%s758_s22 + $0x30] sm:$0x3] %v600_v51  ;;  %v673_v55 = vpop.f32.mrb[11].mxu1  ;;  %v454_v16 = vsel %vm421_vm3, %v442_v8, 0.0 }
  0xfa   : > { %632 = vst [vmem:[%s758_s22 + $0x10] sm:$0xff] %v614_v46   ;;  %v447_v53 = vadd.f32 %v446_v45, %v435_v48 }
  0xfd   : > { %v314_v56 = vpop.f32.mrb[12].mxu0 }
  0xfe   : > { %v415_v57 = vadd.f32 %v414_v47, %v314_v56  ;;  %v436_v58 = vmul.f32 %v314_v56, %v314_v56  ;;  %v660_v59 = vpop.f32.mrb[13].mxu0 }
  0xff   : > { %v317_v60 = vpop.f32.mrb[14].mxu0 }
 0x100   : > { %v448_v61 = vadd.f32 %v447_v53, %v436_v58  ;;  %v619_v62 = vpack.c.bf16 %v317_v60, %v314_v56  ;;  %v416_v63 = vadd.f32 %v415_v57, %v317_v60  ;;  %v437_v0 = vmul.f32 %v317_v60, %v317_v60  ;;  %v661_v1 = vpop.f32.mrb[15].mxu0 }
 0x102   : > { %633 = vst [vmem:[%s758_s22 + $0x18] sm:$0xff] %v619_v62   ;;  %v417_v3 = vadd.f32 %v416_v63, %v322_v18  ;;  %v449_v4 = vadd.f32 %v448_v61, %v437_v0 }
 0x104   : > { %v450_v6 = vadd.f32 %v449_v4, %v438_v2  ;;  %v418_v7 = vadd.f32 %v417_v3, %v325_v21 }
 0x106   : > { %v419_v10 = vadd.f32 %v418_v7, %v330_v34  ;;  %v451_v11 = vadd.f32 %v450_v6, %v439_v5 }
 0x108   : > { %v420_v13 = vadd.f32 %v419_v10, %v333_v37  ;;  %v452_v15 = vadd.f32 %v451_v11, %v440_v9 }
 0x10a   : > { %v453_v17 = vadd.f32 %v452_v15, %v441_v14  ;;  %v423_v19 = vadd.f32 %v422_v12, %v420_v13 }
 0x10c   : > { %v424_v20 = vrot.slane %v423_v19, 4  ;;  %v455_v22 = vadd.f32 %v454_v16, %v453_v17 }
 0x10e   : > { %v425_v18 = vadd.f32 %v424_v20, %v423_v19  ;;  %v456_v23 = vrot.slane %v455_v22, 4 }
 0x110   : > { %v426_v24 = vrot.slane %v425_v18, 2  ;;  %v457_v25 = vadd.f32 %v456_v23, %v455_v22 }
 0x112   : > { %v427_v21 = vadd.f32 %v426_v24, %v425_v18  ;;  %v458_v26 = vrot.slane %v457_v25, 2 }
 0x114   : > { %v428_v27 = vrot.slane %v427_v21, 1  ;;  %v459_v28 = vadd.f32 %v458_v26, %v457_v25 }
 0x116   : > { %v460_v29 = vrot.slane %v459_v28, 1  ;;  %v429_v30 = vadd.f32 %v428_v27, %v427_v21 }
 0x118   : > { %v461_v31 = vadd.f32 %v460_v29, %v459_v28 }
 0x11a   : > { %v463_v32 = vsel %vm462_vm4, %v429_v30, %v461_v31 }
 0x11b   : > { %464 = vst [vmem:[%s181_s26] sm:$0x3] %v463_v32 }
 0x11c PF: > { %s14_s12 = sadd.s32 1, %s700_s12  }
 0x11d   : > { %p11_p4 = scmp.ge.s32.totalorder %s14_s12, 4  }
 0x11f   :  { %13 = sbr.rel (!%p11_p4) target bundleno = 1 (0x1), region = 70 }

// kernel: resblock_q_forward.6
= control target key start
LH: loop header
LB: loop body
LE: loop exit
PB: predicated region body
PF: predicated region fallthrough
CT: control target
= control target key end

     0   :  { %s4182_s21 = smov 0   ;;  %s5159_s0 = inlined_call_operand.vmem [shape: f32[100,1], index: 0, kind: input, shape index: {}]   ;;  %s5160_s1 = inlined_call_operand.vmem [shape: bf16[2,100,128], index: 1, kind: input, shape index: {}]   ;;  %s5161_s2 = inlined_call_operand.vmem [shape: bf16[9,128,128], index: 2, kind: input, shape index: {}]   ;;  %s5162_s3 = inlined_call_operand.vmem [shape: f32[1,128], index: 3, kind: input, shape index: {}]   ;;  %s5163_s4 = inlined_call_operand.vmem [shape: f32[1,128], index: 4, kind: input, shape index: {}]   ;;  %s5164_s5 = inlined_call_operand.vmem [shape: bf16[2,100,128], index: 5, kind: output, shape index: {0}]   ;;  %s5165_s6 = inlined_call_operand.vmem [shape: f32[2,2,128], index: 6, kind: output, shape index: {1}]  }
   0x1 LB: > { %s2843_s22 = sadd.s32 4294967295, %s4142_s21   ;;  %p2847_p0 = scmp.ge.s32.totalorder %s4142_s21, 1  ;;  %s4142_s21 = sphi %s4182_s21, %s17_s21  }
   0x2   : > { %p215_p1 = scmp.lt.s32.totalorder %s4142_s21, 3 }
   0x4   : > { %p216_p2 = pnand %p2847_p0, %p215_p1 }
   0x5   : > { %v266_v0 = vld [vmem:[%s5159_s0 + $0x10] sm:$0xff] (!%p216_p2)  ;;  %v264_v1 = vld [vmem:[%s5159_s0] sm:$0xff] (!%p216_p2)  ;;  %v4144_v2 = vmov (!%p216_p2), 0   ;;  %v267_v3 = vld [vmem:[%s5159_s0 + $0x18] sm:$0xff] (!%p216_p2)  ;;  %v4145_v5 = vmov (!%p216_p2), 0.0   ;;  %vm4146_vm0 = vmmov (!%p216_p2), 0  }
   0x6   : > { %219 = sbr.rel (%p216_p2) target bundleno = 636 (0x27c), region = 40  ;;  %4022 = vset.pattern.permute.xlu1 (!%p216_p2), %v4144_v2  ;;  %506 = vst [vmem:[#allocation2] sm:$0xf] (!%p216_p2), %v4144_v2  ;;  %507 = vst [vmem:[#allocation2 + $0x4] sm:$0xf] (!%p216_p2), %v4144_v2  ;;  %4021 = vset.pattern.permute.xlu0 (!%p216_p2), %v4144_v2  ;;  %v265_v4 = vld [vmem:[%s5159_s0 + $0x8] sm:$0xff] (!%p216_p2) }
   0x7   : > { %508 = vst [vmem:[#allocation2 + $0x8] sm:$0xf] (!%p216_p2), %v4144_v2  ;;  %509 = vst [vmem:[#allocation2 + $0xc] sm:$0xf] (!%p216_p2), %v4144_v2  ;;  %433 = vperm.xlu1 (!%p216_p2), %4022, %v266_v0   ;;  %423 = vperm.xlu0 (!%p216_p2), %4021, %v264_v1   ;;  %v269_v6 = vld [vmem:[%s5159_s0 + $0x28] sm:$0xff] (!%p216_p2)  ;;  %v268_v7 = vld [vmem:[%s5159_s0 + $0x20] sm:$0xff] (!%p216_p2) }
   0x8   : > { %510 = vst [vmem:[#allocation2 + $0x10] sm:$0xf] (!%p216_p2), %v4144_v2  ;;  %511 = vst [vmem:[#allocation2 + $0x14] sm:$0xf] (!%p216_p2), %v4144_v2  ;;  %3551 = vmatprep.subr.bf16.mxu0 (!%p216_p2), %v4145_v5  ;;  %3375 = vmatprep.subr.bf16.mxu1 (!%p216_p2), %v4145_v5  ;;  %v4023_v8 = vld [vmem:[%s5161_s2 + $0x100] sm:$0xff] (!%p216_p2)   ;;  %v4025_v10 = vld [vmem:[%s5161_s2 + $0x108] sm:$0xff] (!%p216_p2)  }
   0x9   : > { %512 = vst [vmem:[#allocation2 + $0x18] sm:$0xf] (!%p216_p2), %v4144_v2  ;;  %513 = vst [vmem:[#allocation2 + $0x1c] sm:$0xf] (!%p216_p2), %v4144_v2  ;;  %v4024_v9 = vld [vmem:[%s5161_s2 + $0x40] sm:$0xff] (!%p216_p2)   ;;  %3552 = vmatpush3.bf16.msra.mxu0 (!%p216_p2), %v4023_v8  ;;  %v4026_v11 = vld [vmem:[%s5161_s2 + $0x48] sm:$0xff] (!%p216_p2)   ;;  %3567 = vmatprep.mubr.msk.bf16.mxu0 (!%p216_p2), %vm4146_vm0, %v4145_v5 }
   0xa   : > { %514 = vst [vmem:[#allocation2 + $0x20] sm:$0xf] (!%p216_p2), %v4144_v2  ;;  %515 = vst [vmem:[#allocation2 + $0x24] sm:$0xf] (!%p216_p2), %v4144_v2  ;;  %3553 = vmatprep.subr.bf16.mxu0 (!%p216_p2), %v4145_v5  ;;  %3376 = vmatpush3.bf16.msra.mxu1 (!%p216_p2), %v4024_v9  ;;  %v271_v12 = vld [vmem:[%s5159_s0 + $0x38] sm:$0xff] (!%p216_p2)  ;;  %v270_v13 = vld [vmem:[%s5159_s0 + $0x30] sm:$0xff] (!%p216_p2) }
   0xb   : > { %516 = vst [vmem:[#allocation2 + $0x28] sm:$0xf] (!%p216_p2), %v4144_v2  ;;  %517 = vst [vmem:[#allocation2 + $0x2c] sm:$0xf] (!%p216_p2), %v4144_v2  ;;  %438 = vperm.xlu1 (!%p216_p2), %4022, %v267_v3   ;;  %428 = vperm.xlu0 (!%p216_p2), %4021, %v265_v4   ;;  %v4027_v14 = vld [vmem:[%s5161_s2 + $0x110] sm:$0xff] (!%p216_p2)   ;;  %v273_v16 = vld [vmem:[%s5159_s0 + $0x48] sm:$0xff] (!%p216_p2) }
   0xc   : > { %518 = vst [vmem:[#allocation2 + $0x30] sm:$0xf] (!%p216_p2), %v4144_v2  ;;  %519 = vst [vmem:[#allocation2 + $0x34] sm:$0xf] (!%p216_p2), %v4144_v2  ;;  %3377 = vmatprep.subr.bf16.mxu1 (!%p216_p2), %v4145_v5  ;;  %v4028_v15 = vld [vmem:[%s5161_s2 + $0x50] sm:$0xff] (!%p216_p2)   ;;  %v272_v17 = vld [vmem:[%s5159_s0 + $0x40] sm:$0xff] (!%p216_p2)  ;;  %3391 = vmatprep.mubr.msk.bf16.mxu1 (!%p216_p2), %vm4146_vm0, %v4145_v5 }
   0xd   : > { %520 = vst [vmem:[#allocation2 + $0x38] sm:$0xf] %v4144_v2  ;;  %521 = vst [vmem:[#allocation2 + $0x3c] sm:$0xf] %v4144_v2  ;;  %3554 = vmatpush3.bf16.msra.mxu0 %v4025_v10  ;;  %v4029_v18 = vld [vmem:[%s5161_s2 + $0x118] sm:$0xff]   ;;  %v274_v21 = vld [vmem:[%s5159_s0 + $0x50] sm:$0xff] }
   0xe   : > { %3555 = vmatprep.subr.bf16.mxu0 %v4145_v5  ;;  %3378 = vmatpush3.bf16.msra.mxu1 %v4026_v11  ;;  %v4030_v19 = vld [vmem:[%s5161_s2 + $0x58] sm:$0xff]   ;;  %v4031_v22 = vld [vmem:[%s5161_s2 + $0x120] sm:$0xff]   ;;  %v4033_v25 = vld [vmem:[%s5161_s2 + $0x128] sm:$0xff]   ;;  %p249_p3 = scmp.lt.s32.totalorder %s2843_s22, 1  ;;  %vm665_vm1 = vcmask 1044480   ;;  %vm2238_vm6 = vcmask 1046528  }
   0xf   : > { %448 = vperm.xlu1 %4022, %v269_v6   ;;  %443 = vperm.xlu0 %4021, %v268_v7   ;;  %v275_v20 = vld [vmem:[%s5159_s0 + $0x58] sm:$0xff]  ;;  %v4032_v23 = vld [vmem:[%s5161_s2 + $0x60] sm:$0xff]   ;;  %v4034_v26 = vld [vmem:[%s5161_s2 + $0x68] sm:$0xff]   ;;  %vm1052_vm2 = vsmask.f32 4352  ;;  %vm2713_vm7 = vcmask 1043456  }
  0x10   : > { %3379 = vmatprep.subr.bf16.mxu1 %v4145_v5  ;;  %v276_v24 = vld [vmem:[%s5159_s0 + $0x60] sm:$0xf]  ;;  %v4035_v27 = vld [vmem:[%s5161_s2 + $0x130] sm:$0xff]   ;;  %v4037_v29 = vld [vmem:[%s5161_s2 + $0x138] sm:$0xff]   ;;  %s5197_s22 = smov (!%p249_p3, %s2843_s22), 1  ;;  %vm2754_vm8 = vcmask 1040384  }
  0x11   : > { %3556 = vmatpush3.bf16.msra.mxu0 %v4027_v14  ;;  %v4036_v28 = vld [vmem:[%s5161_s2 + $0x70] sm:$0xff]   ;;  %v4038_v30 = vld [vmem:[%s5161_s2 + $0x78] sm:$0xff]   ;;  %s3996_s13 = smul.u32 52, %s5197_s22  ;;  %v4319_v36 = vld [vmem:[%s5162_s3] ss:$0 sm:$0xff] }
  0x12   : > { %3557 = vmatprep.subr.bf16.mxu0 %v4145_v5  ;;  %3380 = vmatpush3.bf16.msra.mxu1 %v4028_v15  ;;  %v4326_v43 = vld [vmem:[%s5163_s4] ss:$0 sm:$0xff]  ;;  %vm1731_vm3 = vsmask.f32 7424  ;;  %vm825_vm4 = vsmask.f32 5376 }
  0x13   : > { %458 = vperm.xlu1 %4022, %v271_v12   ;;  %453 = vperm.xlu0 %4021, %v270_v13   ;;  %s4311_s16 = scalar_lea.vmem %s5160_s1, %s3996_s13  ;;  %vm2429_vm5 = vsmask.f32 6400  ;;  %s5131_s27 = scalar_lea.vmem %s5164_s5, %s3996_s13 }
  0x14   : > { %3381 = vmatprep.subr.bf16.mxu1 %v4145_v5  ;;  %v3224_v31 = vld [vmem:[%s4311_s16 + $0x8] sm:$0xff]   ;;  %v3141_v32 = vld [vmem:[%s4311_s16] sm:$0xff]   ;;  %v3225_v35 = vld [vmem:[%s4311_s16 + $0x10] sm:$0xff]   ;;  %s2850_s13 = sshll.u32 %s5197_s22, 1 }
  0x15   : > { %3558 = vmatpush3.bf16.msra.mxu0 %v4029_v18  ;;  %v3146_v33 = vunpack.c.l.bf16 %v3224_v31  ;;  %v3142_v34 = vunpack.c.l.bf16 %v3141_v32  ;;  %v3147_v37 = vunpack.c.h.bf16 %v3224_v31  ;;  %v3143_v38 = vunpack.c.h.bf16 %v3141_v32  ;;  %v3226_v46 = vld [vmem:[%s4311_s16 + $0x18] sm:$0xff]   ;;  %v3227_v55 = vld [vmem:[%s4311_s16 + $0x20] sm:$0xff]   ;;  %v3228_v63 = vld [vmem:[%s4311_s16 + $0x28] sm:$0xff]   ;;  %s262_s30 = scalar_lea.vmem %s5165_s6, %s2850_s13 }
  0x16   : > { %3559 = vmatprep.subr.bf16.mxu0 %v4145_v5  ;;  %3382 = vmatpush3.bf16.msra.mxu1 %v4030_v19  ;;  %v3151_v40 = vunpack.c.h.bf16 %v3225_v35  ;;  %v3150_v42 = vunpack.c.l.bf16 %v3225_v35  ;;  %v3155_v51 = vunpack.c.h.bf16 %v3226_v46  ;;  %v3154_v52 = vunpack.c.l.bf16 %v3226_v46 }
  0x17   : > { %468 = vperm.xlu1 %4022, %v273_v16   ;;  %463 = vperm.xlu0 %4021, %v272_v17   ;;  %v312_v39 = vmul.f32 %v3146_v33, %v4319_v36  ;;  %v310_v41 = vmul.f32 %v3142_v34, %v4319_v36  ;;  %v313_v44 = vmul.f32 %v3147_v37, %v4319_v36  ;;  %v3159_v62 = vunpack.c.h.bf16 %v3227_v55  ;;  %v289_v16 = vld [vmem:[%s4311_s16 + $0x30] sm:$0x3] }
  0x18   : > { %3383 = vmatprep.subr.bf16.mxu1 %v4145_v5  ;;  %v311_v45 = vmul.f32 %v3143_v38, %v4319_v36  ;;  %v315_v48 = vmul.f32 %v3151_v40, %v4319_v36  ;;  %v314_v50 = vmul.f32 %v3150_v42, %v4319_v36  ;;  %v317_v60 = vmul.f32 %v3155_v51, %v4319_v36 }
  0x19   : > { %3560 = vmatpush3.bf16.msra.mxu0 %v4031_v22  ;;  %v332_v47 = vadd.f32 %v4326_v43, %v312_v39  ;;  %v330_v49 = vadd.f32 %v4326_v43, %v310_v41  ;;  %v333_v53 = vadd.f32 %v4326_v43, %v313_v44  ;;  %v316_v61 = vmul.f32 %v3154_v52, %v4319_v36 }
  0x1a   : > { %3561 = vmatprep.subr.bf16.mxu0 %v4145_v5  ;;  %3384 = vmatpush3.bf16.msra.mxu1 %v4032_v23  ;;  %v331_v54 = vadd.f32 %v4326_v43, %v311_v45  ;;  %v335_v57 = vadd.f32 %v4326_v43, %v315_v48  ;;  %v334_v59 = vadd.f32 %v4326_v43, %v314_v50  ;;  %v3158_v2 = vunpack.c.l.bf16 %v3227_v55 }
  0x1b   : > { %478 = vperm.xlu1 %4022, %v275_v20   ;;  %473 = vperm.xlu0 %4021, %v274_v21   ;;  %v345_v56 = vmax.f32 %v332_v47, 0.0  ;;  %v343_v58 = vmax.f32 %v330_v49, 0.0  ;;  %v346_v0 = vmax.f32 %v333_v53, 0.0  ;;  %v3163_v8 = vunpack.c.h.bf16 %v3228_v63 }
  0x1c   : > { %3385 = vmatprep.subr.bf16.mxu1 %v4145_v5  ;;  %v344_v1 = vmax.f32 %v331_v54, 0.0  ;;  %v348_v4 = vmax.f32 %v335_v57, 0.0  ;;  %v347_v7 = vmax.f32 %v334_v59, 0.0  ;;  %v3162_v9 = vunpack.c.l.bf16 %v3228_v63 }
  0x1d   : > { %3562 = vmatpush3.bf16.msra.mxu0 %v4033_v25  ;;  %v358_v3 = vmax.f32 %v345_v56, 0.0  ;;  %v356_v6 = vmax.f32 %v343_v58, 0.0  ;;  %v337_v10 = vadd.f32 %v4326_v43, %v317_v60  ;;  %v336_v11 = vadd.f32 %v4326_v43, %v316_v61 }
  0x1e   : > { %3563 = vmatprep.subr.bf16.mxu0 %v4145_v5  ;;  %3386 = vmatpush3.bf16.msra.mxu1 %v4034_v26  ;;  %v319_v12 = vmul.f32 %v3159_v62, %v4319_v36  ;;  %v359_v13 = vmax.f32 %v346_v0, 0.0  ;;  %v357_v14 = vmax.f32 %v344_v1, 0.0  ;;  %v318_v15 = vmul.f32 %v3158_v2, %v4319_v36 }
  0x1f   : > { %483 = vperm.xlu0 %4021, %v276_v24   ;;  %3387 = vmatprep.subr.bf16.mxu1 %v4145_v5  ;;  %v371_v17 = vmin.f32 %v358_v3, 1.0  ;;  %v361_v18 = vmax.f32 %v348_v4, 0.0  ;;  %v369_v19 = vmin.f32 %v356_v6, 1.0  ;;  %v360_v20 = vmax.f32 %v347_v7, 0.0 }
  0x20   : > { %v321_v21 = vmul.f32 %v3163_v8, %v4319_v36  ;;  %v320_v22 = vmul.f32 %v3162_v9, %v4319_v36  ;;  %v350_v23 = vmax.f32 %v337_v10, 0.0  ;;  %v349_v24 = vmax.f32 %v336_v11, 0.0 }
  0x21   : > { %3564 = vmatpush3.bf16.msra.mxu0 %v4035_v27  ;;  %v339_v25 = vadd.f32 %v4326_v43, %v319_v12  ;;  %v302_v26 = vunpack.c.l.bf16 %v289_v16  ;;  %v372_v27 = vmin.f32 %v359_v13, 1.0  ;;  %v374_v31 = vmin.f32 %v361_v18, 1.0 }
  0x22   : > { %3565 = vmatprep.subr.bf16.mxu0 %v4145_v5  ;;  %3388 = vmatpush3.bf16.msra.mxu1 %v4036_v28  ;;  %v370_v28 = vmin.f32 %v357_v14, 1.0  ;;  %v382_v32 = vmul.f32 15.0, %v369_v19  ;;  %v373_v33 = vmin.f32 %v360_v20, 1.0  ;;  %v341_v34 = vadd.f32 %v4326_v43, %v321_v21 }
  0x23   : > { %3389 = vmatprep.subr.bf16.mxu1 %v4145_v5  ;;  %v340_v35 = vadd.f32 %v4326_v43, %v320_v22  ;;  %v363_v37 = vmax.f32 %v350_v23, 0.0  ;;  %v362_v38 = vmax.f32 %v349_v24, 0.0  ;;  %v352_v39 = vmax.f32 %v339_v25, 0.0 }
  0x24   : > { %v322_v40 = vmul.f32 %v4319_v36, %v302_v26  ;;  %v385_v41 = vmul.f32 15.0, %v372_v27  ;;  %v383_v42 = vmul.f32 15.0, %v370_v28  ;;  %v387_v46 = vmul.f32 15.0, %v374_v31 }
  0x25   : > { %3566 = vmatpush3.bf16.msra.mxu0 %v4037_v29  ;;  %v338_v29 = vadd.f32 %v4326_v43, %v318_v15  ;;  %v3997_v47 = vround.rtne.f32 %v382_v32  ;;  %v386_v48 = vmul.f32 15.0, %v373_v33  ;;  %v354_v49 = vmax.f32 %v341_v34, 0.0 }
  0x26   : > { %3595 = vmatprep.subr.bf16.mxu0 %v4145_v5  ;;  %3390 = vmatpush3.bf16.msra.mxu1 %v4038_v30  ;;  %v384_v30 = vmul.f32 15.0, %v371_v17  ;;  %v353_v50 = vmax.f32 %v340_v35, 0.0  ;;  %v376_v51 = vmin.f32 %v363_v37, 1.0  ;;  %v375_v52 = vmin.f32 %v362_v38, 1.0 }
  0x27   : > { %3419 = vmatprep.subr.bf16.mxu1 %v4145_v5  ;;  %v351_v44 = vmax.f32 %v338_v29, 0.0  ;;  %v365_v53 = vmax.f32 %v352_v39, 0.0  ;;  %v342_v54 = vadd.f32 %v4326_v43, %v322_v40  ;;  %v4000_v55 = vround.rtne.f32 %v385_v41  ;;  %v4374_v40 = vld [vmem:[#allocation2 + $0x4] sm:$0xf]  ;;  %v612_v41 = vld [vmem:[#allocation2] sm:$0x8] }
  0x28   : > { %v3999_v45 = vround.rtne.f32 %v384_v30  ;;  %v3998_v56 = vround.rtne.f32 %v383_v42  ;;  %v4002_v59 = vround.rtne.f32 %v387_v46  ;;  %v408_v36 = vmul.f32 0.06666667, %v3997_v47 }
  0x29   : > { %v364_v57 = vmax.f32 %v351_v44, 0.0  ;;  %v4001_v60 = vround.rtne.f32 %v386_v48  ;;  %v367_v61 = vmax.f32 %v354_v49, 0.0  ;;  %v366_v62 = vmax.f32 %v353_v50, 0.0  ;;  %v1246_v50 = vld [vmem:[#allocation2 + $0x4] sm:$0x8] }
  0x2a   : > { %v410_v58 = vmul.f32 0.06666667, %v3999_v45  ;;  %v389_v1 = vmul.f32 15.0, %v376_v51  ;;  %v388_v2 = vmul.f32 15.0, %v375_v52  ;;  %v378_v3 = vmin.f32 %v365_v53, 1.0  ;;  %v4041_v53 = vld [vmem:[%s5161_s2 + $0x140] sm:$0xff]  }
  0x2b   : > { %v355_v4 = vmax.f32 %v342_v54, 0.0  ;;  %v411_v6 = vmul.f32 0.06666667, %v4000_v55  ;;  %v409_v7 = vmul.f32 0.06666667, %v3998_v56  ;;  %v377_v43 = vmin.f32 %v364_v57, 1.0 }
  0x2c   : > { %v413_v8 = vmul.f32 0.06666667, %v4002_v59  ;;  %v412_v10 = vmul.f32 0.06666667, %v4001_v60  ;;  %v380_v11 = vmin.f32 %v367_v61, 1.0  ;;  %v379_v12 = vmin.f32 %v366_v62, 1.0 }
  0x2d   : > { %v4004_v15 = vround.rtne.f32 %v389_v1  ;;  %v4003_v16 = vround.rtne.f32 %v388_v2  ;;  %v391_v17 = vmul.f32 15.0, %v378_v3  ;;  %v368_v18 = vmax.f32 %v355_v4, 0.0 }
  0x2e   : > { %v390_v22 = vmul.f32 15.0, %v377_v43  ;;  %v393_v25 = vmul.f32 15.0, %v380_v11  ;;  %v392_v26 = vmul.f32 15.0, %v379_v12  ;;  %v4383_v51 = vcombine.low %v612_v41, %v4374_v40 }
  0x2f   : > { %v415_v29 = vmul.f32 0.06666667, %v4004_v15  ;;  %v414_v30 = vmul.f32 0.06666667, %v4003_v16  ;;  %v381_v31 = vmin.f32 %v368_v18, 1.0  ;;  %v4006_v34 = vround.rtne.f32 %v391_v17 }
  0x30   : > { %v4005_v35 = vround.rtne.f32 %v390_v22  ;;  %v4008_v38 = vround.rtne.f32 %v393_v25  ;;  %v4007_v39 = vround.rtne.f32 %v392_v26  ;;  %v666_v4 = vrot.slane %v4383_v51, 3  ;;  %v4049_v26 = vld [vmem:[%s5161_s2 + $0x150] sm:$0xff]  }
  0x31   : > { %v394_v45 = vmul.f32 15.0, %v381_v31  ;;  %v417_v48 = vmul.f32 0.06666667, %v4006_v34 }
  0x32   : > { %v416_v49 = vmul.f32 0.06666667, %v4005_v35  ;;  %v419_v54 = vmul.f32 0.06666667, %v4008_v38  ;;  %v418_v55 = vmul.f32 0.06666667, %v4007_v39 }
  0x86   : > { %v4356_v63 = vpop.permute.xlu1 %433  ;;  %v4358_v0 = vpop.permute.xlu0 %423 }
  0x87   : > { %v488_v9 = vmul.f32 %v4356_v63, %v410_v58  ;;  %v486_v19 = vmul.f32 %v4358_v0, %v408_v36  ;;  %v4009_v36 = vround.rtne.f32 %v394_v45 }
  0x8a   : > { %v4361_v13 = vpop.permute.xlu1 %438  ;;  %v4363_v14 = vpop.permute.xlu0 %428 }
  0x8b   : > { %v489_v20 = vmul.f32 %v4361_v13, %v411_v6  ;;  %v487_v21 = vmul.f32 %v4363_v14, %v409_v7 }
  0x8d   : > { %v3172_v23 = vpack.c.bf16 %v489_v20, %v488_v9  ;;  %v3167_v24 = vpack.c.bf16 %v487_v21, %v486_v19  ;;  %v4046_v9 = vld [vmem:[%s5161_s2] sm:$0xff]   ;;  %v420_v21 = vmul.f32 0.06666667, %v4009_v36 }
  0x8e   : > { %v4368_v27 = vpop.permute.xlu1 %448  ;;  %v4370_v28 = vpop.permute.xlu0 %443  ;;  %v4055_v36 = vld [vmem:[%s5161_s2 + $0x160] sm:$0xff]  }
  0x8f   : > { %3230 = vst [vmem:[#allocation2 + $0x10] sm:$0xff] %v3172_v23   ;;  %3229 = vst [vmem:[#allocation2 + $0x8] sm:$0xff] %v3167_v24   ;;  %v491_v32 = vmul.f32 %v4368_v27, %v413_v8  ;;  %v490_v33 = vmul.f32 %v4370_v28, %v412_v10  ;;  %v4045_v8 = vld [vmem:[%s5161_s2 + $0x148] sm:$0xff]  }
  0x91   : > { %v3177_v37 = vpack.c.bf16 %v491_v32, %v490_v33 }
  0x92   : > { %v4376_v42 = vpop.permute.xlu1 %458  ;;  %v4378_v44 = vpop.permute.xlu0 %453 }
  0x93   : > { %3231 = vst [vmem:[#allocation2 + $0x18] sm:$0xff] %v3177_v37   ;;  %v493_v46 = vmul.f32 %v4376_v42, %v415_v29  ;;  %v492_v47 = vmul.f32 %v4378_v44, %v414_v30  ;;  %v4052_v29 = vld [vmem:[%s5161_s2 + $0x8] sm:$0xff]  }
  0x95   : > { %v3182_v52 = vpack.c.bf16 %v493_v46, %v492_v47 }
  0x96   : > { %v4388_v56 = vpop.permute.xlu1 %468  ;;  %v4390_v57 = vpop.permute.xlu0 %463  ;;  %v1247_v58 = vld [vmem:[#allocation2 + $0x8] sm:$0xf]  ;;  %v1248_v59 = vld [vmem:[#allocation2 + $0xc] sm:$0xf]  ;;  %v1249_v3 = vld [vmem:[#allocation2 + $0x10] sm:$0xf] }
  0x97   : > { %3232 = vst [vmem:[#allocation2 + $0x20] sm:$0xff] %v3182_v52   ;;  %v495_v60 = vmul.f32 %v4388_v56, %v417_v48  ;;  %v494_v61 = vmul.f32 %v4390_v57, %v416_v49  ;;  %v2947_v62 = vcombine.low %v1246_v50, %v1247_v58  ;;  %v4394_v1 = vcombine.low %v1247_v58, %v1248_v59  ;;  %v4396_v2 = vld [vmem:[#allocation2 + $0x8] sm:$0xff]   ;;  %v1250_v23 = vld [vmem:[#allocation2 + $0x14] sm:$0xf]  ;;  %v4051_v48 = vld [vmem:[%s5161_s2 + $0x158] sm:$0xff]  }
  0x98   : > { %v2948_v6 = vcombine.low %v1248_v59, %v1249_v3  ;;  %v667_v15 = vrot.slane %v4396_v2, 3  ;;  %v4417_v24 = vld [vmem:[#allocation2 + $0x10] sm:$0xff]   ;;  %v4431_v39 = vcombine.low %v1249_v3, %v1250_v23 }
  0x99   : > { %v3187_v7 = vpack.c.bf16 %v495_v60, %v494_v61  ;;  %v1313_v43 = vshrl.u32 %v2947_v62, 16  ;;  %3568 = vmatmul.mubr.bf16.vlgmr.msra.gmra.mrb[0].mxu0 %v4394_v1  ;;  %v1316_v10 = vshll.u32 %v2947_v62, 16  ;;  %v669_v45 = vrot.slane %v4417_v24, 3  ;;  %v4058_v49 = vld [vmem:[%s5161_s2 + $0x10] sm:$0xff]  }
  0x9a   : > { %3596 = vmatpush3.bf16.msra.mxu0 %v4041_v53  ;;  %v4406_v11 = vpop.permute.xlu1 %478  ;;  %v4408_v12 = vpop.permute.xlu0 %473  ;;  %3571 = vmatprep.mubr.msk.bf16.mxu0 %vm4146_vm0, %v4145_v5  ;;  %v1321_v16 = vshrl.u32 %v2948_v6, 16  ;;  %v1324_v17 = vshll.u32 %v2948_v6, 16  ;;  %v1251_v18 = vld [vmem:[#allocation2 + $0x18] sm:$0xf]  ;;  %v668_v22 = vsel %vm665_vm1, %v666_v4, %v667_v15  ;;  %v1252_v41 = vld [vmem:[#allocation2 + $0x1c] sm:$0xf] }
  0x9b   : > { %3233 = vst [vmem:[#allocation2 + $0x28] sm:$0xff] %v3187_v7   ;;  %v497_v19 = vmul.f32 %v4406_v11, %v419_v54  ;;  %v496_v20 = vmul.f32 %v4408_v12, %v418_v55  ;;  %3597 = vmatprep.subr.bf16.mxu0 %v4145_v5  ;;  %3392 = vmatmul.mubr.bf16.vlgmr.msra.gmra.mrb[0].mxu1 %v668_v22  ;;  %v1315_v31 = vrot.slane %v1313_v43, 3  ;;  %v1318_v32 = vrot.slane %v1316_v10, 4  ;;  %v4457_v59 = vld [vmem:[#allocation2 + $0x18] sm:$0xff]   ;;  %v4057_v43 = vld [vmem:[%s5161_s2 + $0x168] sm:$0xff]  }
  0x9c   : > { %v4425_v30 = vcombine.low %v1250_v23, %v1251_v18  ;;  %3420 = vmatpush3.bf16.msra.mxu1 %v4046_v9  ;;  %v1323_v34 = vrot.slane %v1321_v16, 3  ;;  %v1326_v35 = vrot.slane %v1324_v17, 4  ;;  %3395 = vmatprep.mubr.msk.bf16.mxu1 %vm4146_vm0, %v4145_v5  ;;  %v670_v58 = vsel %vm665_vm1, %v667_v15, %v669_v45  ;;  %v4067_v6 = vld [vmem:[%s5161_s2 + $0x18] sm:$0xff]   ;;  %v4064_v16 = vld [vmem:[%s5161_s2 + $0x170] sm:$0xff]   ;;  %v582_v23 = vld [vmem:[#allocation2] sm:$0xc] }
  0x9d   : > { %v3192_v25 = vpack.c.bf16 %v497_v19, %v496_v20  ;;  %3421 = vmatprep.subr.bf16.mxu1 %v4145_v5  ;;  %v1319_v53 = vor.u32 %v1318_v32, %v1315_v31  ;;  %v4474_v3 = vcombine.low %v1251_v18, %v1252_v41  ;;  %v671_v7 = vrot.slane %v4457_v59, 3  ;;  %v4073_v18 = vld [vmem:[%s5161_s2 + $0x28] sm:$0xff]  }
  0x9e   : > { %3598 = vmatpush3.bf16.msra.mxu0 %v4045_v8  ;;  %v4427_v33 = vpop.permute.xlu0 %483  ;;  %v1253_v37 = vld [vmem:[#allocation2 + $0x20] sm:$0xf]  ;;  %v1254_v50 = vld [vmem:[#allocation2 + $0x24] sm:$0xf]  ;;  %v4448_v54 = vor.u32 %v1326_v35, %v1323_v34  ;;  %v1735_v9 = vshll.u32 %v4394_v1, 16  ;;  %v1740_v20 = vshll.u32 %v4431_v39, 16  ;;  %v2897_v34 = vcombine.low %v582_v23, %v4374_v40 }
  0x9f   : > { %3234 = vst [vmem:[#allocation2 + $0x30] sm:$0xff] %v3192_v25   ;;  %v498_v38 = vmul.f32 %v4427_v33, %v420_v21  ;;  %3599 = vmatprep.subr.bf16.mxu0 %v4145_v5  ;;  %v4437_v46 = vcombine.low %v1252_v41, %v1253_v37  ;;  %v4070_v8 = vld [vmem:[%s5161_s2 + $0x20] sm:$0xff]   ;;  %v672_v10 = vsel %vm665_vm1, %v669_v45, %v671_v7  ;;  %v1733_v22 = vshrl.u32 %v4394_v1, 16  ;;  %v4066_v25 = vld [vmem:[%s5161_s2 + $0x178] sm:$0xff]  }
  0xa0   : > { %3422 = vmatpush3.bf16.msra.mxu1 %v4052_v29  ;;  %v4471_v62 = vsel %vm1052_vm2, %v1319_v53, %v4448_v54  ;;  %v4497_v15 = vld [vmem:[#allocation2 + $0x20] sm:$0xff]   ;;  %v4506_v17 = vcombine.low %v1253_v37, %v1254_v50  ;;  %v1737_v19 = vrot.slane %v1735_v9, 1  ;;  %v1742_v29 = vrot.slane %v1740_v20, 1  ;;  %v4071_v53 = vld [vmem:[%s5161_s2 + $0x188] sm:$0xff]  }
  0xa1   : > { %v3126_v47 = vpack.c.bf16 %v498_v38, %v498_v38  ;;  %3572 = vmatmul.mubr.bf16.gmra.mrb[4].mxu0 %v4431_v39  ;;  %3423 = vmatprep.subr.bf16.mxu1 %v4145_v5  ;;  %v673_v21 = vrot.slane %v4497_v15, 3  ;;  %v4068_v35 = vld [vmem:[%s5161_s2 + $0x180] sm:$0xff]   ;;  %v1744_v37 = vshrl.u32 %v4431_v39, 16  ;;  %v4077_v38 = vld [vmem:[%s5161_s2 + $0x38] sm:$0xff]   ;;  %v1748_v45 = vshll.u32 %v4474_v3, 16 }
  0xa2   : > { %3600 = vmatpush3.bf16.msra.mxu0 %v4049_v26  ;;  %v4446_v52 = vld [vmem:[#allocation2 + $0x28] sm:$0xf]  ;;  %3575 = vmatprep.mubr.msk.bf16.mxu0 %vm4146_vm0, %v4145_v5  ;;  %v4465_v60 = vld [vmem:[#allocation2 + $0x2c] sm:$0xf]  ;;  %v4075_v26 = vld [vmem:[%s5161_s2 + $0x30] sm:$0xff]   ;;  %v1738_v1 = vor.u32 %v1737_v19, %v1733_v22  ;;  %v1330_v23 = vshrl.u32 %v4425_v30, 16 }
  0xa3   : > { %581 = vst [vmem:[#allocation2 + $0x38] sm:$0x3] %v3126_v47  ;;  %3601 = vmatprep.subr.bf16.mxu0 %v4145_v5  ;;  %v4454_v55 = vcombine.low %v1254_v50, %v4446_v52  ;;  %3396 = vmatmul.mubr.bf16.gmra.mrb[4].mxu1 %v670_v58  ;;  %v674_v31 = vsel %vm665_vm1, %v671_v7, %v673_v21  ;;  %v4526_v32 = vld [vmem:[#allocation2 + $0x28] sm:$0xff]   ;;  %v830_v50 = vshll.u32 %v2897_v34, 16  ;;  %v4579_v22 = vld [vmem:[#allocation2 + $0x14] sm:$0xff]  }
  0xa4   : > { %3399 = vmatprep.mubr.msk.bf16.mxu1 %vm4146_vm0, %v4145_v5  ;;  %3424 = vmatpush3.bf16.msra.mxu1 %v4058_v49  ;;  %v1743_v40 = vsel %vm1731_vm3, %v1738_v1, %v1742_v29  ;;  %v675_v41 = vrot.slane %v4526_v32, 3  ;;  %v827_v49 = vshrl.u32 %v2897_v34, 16  ;;  %v4548_v39 = vcombine.low %v4446_v52, %v4465_v60 }
  0xa5   : > { %3425 = vmatprep.subr.bf16.mxu1 %v4145_v5  ;;  %v1746_v58 = vor.u32 %v1744_v37, %v1742_v29  ;;  %v1756_v52 = vshll.u32 %v4506_v17, 16  ;;  %v4076_v29 = vld [vmem:[%s5161_s2 + $0x198] sm:$0xff]   ;;  %v1339_v37 = vshrl.u32 %v4437_v46, 16 }
  0xa6   : > { %3602 = vmatpush3.bf16.msra.mxu0 %v4051_v48  ;;  %v4467_v61 = vld [vmem:[#allocation2 + $0x30] sm:$0xf]  ;;  %v595_v48 = vld [vmem:[#allocation2 + $0x34] sm:$0x1]  ;;  %v1764_v9 = vshll.u32 %v4548_v39, 16 }
  0xa7   : > { %3603 = vmatprep.subr.bf16.mxu0 %v4145_v5  ;;  %v4478_v4 = vcombine.low %v4465_v60, %v4467_v61  ;;  %v4544_v47 = vld [vmem:[#allocation2 + $0x30] sm:$0xf]  ;;  %v4562_v60 = vrot.slane %v827_v49, 2  ;;  %v1348_v49 = vshrl.u32 %v4454_v55, 16 }
  0xa8   : > { %3426 = vmatpush3.bf16.msra.mxu1 %v4067_v6  ;;  %v1750_v6 = vrot.slane %v1748_v45, 1  ;;  %v4558_v7 = vcombine.low %v4544_v47, %v595_v48  ;;  %v4591_v1 = vrot.slane %v1764_v9, 1  ;;  %v1342_v48 = vshll.u32 %v4437_v46, 16  ;;  %v4078_v46 = vld [vmem:[%s5161_s2 + $0x1a0] sm:$0xff]  }
  0xa9   : > { %3576 = vmatmul.mubr.bf16.gmra.mrb[8].mxu0 %v4474_v3  ;;  %3427 = vmatprep.subr.bf16.mxu1 %v4145_v5 }
  0xaa   : > { %3604 = vmatpush3.bf16.msra.mxu0 %v4055_v36  ;;  %3579 = vmatprep.mubr.msk.bf16.mxu0 %vm4146_vm0, %v4145_v5  ;;  %v676_v36 = vsel %vm665_vm1, %v673_v21, %v675_v41  ;;  %v1751_v19 = vsel %vm1731_vm3, %v1746_v58, %v1750_v6  ;;  %v677_v20 = vrot.slane %v4558_v7, 3  ;;  %v1758_v21 = vrot.slane %v1756_v52, 1  ;;  %v4626_v52 = vld [vmem:[#allocation2 + $0x2c] sm:$0xff]  }
  0xab   : > { %3605 = vmatprep.subr.bf16.mxu0 %v4145_v5  ;;  %3400 = vmatmul.mubr.bf16.gmra.mrb[8].mxu1 %v672_v10  ;;  %v5167_v10 = vshrl.u32 %v4396_v2, 16 }
  0xac   : > { %3403 = vmatprep.mubr.msk.bf16.mxu1 %vm4146_vm0, %v4145_v5  ;;  %3428 = vmatpush3.bf16.msra.mxu1 %v4070_v8  ;;  %v4074_v8 = vld [vmem:[%s5161_s2 + $0x190] sm:$0xff]  }
  0xad   : > { %3429 = vmatprep.subr.bf16.mxu1 %v4145_v5 }
  0xae   : > { %3606 = vmatpush3.bf16.msra.mxu0 %v4057_v43  ;;  %v4564_v43 = vrot.slane %v830_v50, 3  ;;  %v1351_v50 = vshll.u32 %v4454_v55, 16  ;;  %v5175_v55 = vshrl.u32 %v4417_v24, 16 }
  0xaf   : > { %3607 = vmatprep.subr.bf16.mxu0 %v4145_v5 }
  0xb0   : > { %3430 = vmatpush3.bf16.msra.mxu1 %v4073_v18  ;;  %v4575_v18 = vld [vmem:[#allocation2 + $0x34] sm:$0xf] }
  0xb1   : > { %3580 = vmatmul.mubr.bf16.gmra.mrb[12].mxu0 %v4506_v17  ;;  %3431 = vmatprep.subr.bf16.mxu1 %v4145_v5  ;;  %v4595_v34 = vcombine.low %v4467_v61, %v4575_v18  ;;  %v4607_v61 = vld [vmem:[#allocation2 + $0x1c] sm:$0xff]  }
  0xb2   : > { %3608 = vmatpush3.bf16.msra.mxu0 %v4064_v16  ;;  %3611 = vmatprep.mubr.msk.bf16.mxu0 %vm4146_vm0, %v4145_v5  ;;  %v5166_v16 = vshll.u32 %v4396_v2, 16 }
  0xb3   : > { %3609 = vmatprep.subr.bf16.mxu0 %v4145_v5  ;;  %3404 = vmatmul.mubr.bf16.gmra.mrb[12].mxu1 %v674_v31  ;;  %v1760_v31 = vshrl.u32 %v4506_v17, 16  ;;  %v678_v17 = vsel %vm665_vm1, %v675_v41, %v677_v20 }
  0xb4   : > { %3407 = vmatprep.mubr.msk.bf16.mxu1 %vm4146_vm0, %v4145_v5  ;;  %3432 = vmatpush3.bf16.msra.mxu1 %v4075_v26  ;;  %v1752_v26 = vshrl.u32 %v4474_v3, 16  ;;  %v837_v3 = vrot.slane %v5167_v10, 2 }
  0xb5   : > { %3433 = vmatprep.subr.bf16.mxu1 %v4145_v5  ;;  %v1762_v45 = vor.u32 %v1760_v31, %v1758_v21  ;;  %v5169_v31 = vshrl.u32 %v4607_v61, 16 }
  0xb6   : > { %3610 = vmatpush3.bf16.msra.mxu0 %v4066_v25 }
  0xb7   : > { %3639 = vmatprep.subr.bf16.mxu0 %v4145_v5  ;;  %v1767_v41 = vsel %vm1731_vm3, %v1762_v45, %v4591_v1  ;;  %v1350_v45 = vrot.slane %v1348_v49, 3 }
  0xb8   : > { %3434 = vmatpush3.bf16.msra.mxu1 %v4077_v38  ;;  %v840_v38 = vrot.slane %v5166_v16, 3  ;;  %v1353_v16 = vrot.slane %v1351_v50, 4  ;;  %v1357_v50 = vshrl.u32 %v4478_v4, 16 }
  0xb9   : > { %3612 = vmatmul.mubr.bf16.vlgmr.msra.gmra.mrb[0].mxu0 %v1743_v40  ;;  %3463 = vmatprep.subr.bf16.mxu1 %v4145_v5  ;;  %v1754_v40 = vor.u32 %v1752_v26, %v1750_v6  ;;  %v4624_v6 = vld [vmem:[#allocation2 + $0x24] sm:$0xff]   ;;  %v5170_v26 = vshll.u32 %v4607_v61, 16 }
  0xba   : > { %3640 = vmatpush3.bf16.msra.mxu0 %v4068_v35  ;;  %3615 = vmatprep.mubr.msk.bf16.mxu0 %vm4146_vm0, %v4145_v5  ;;  %v1333_v35 = vshll.u32 %v4425_v30, 16  ;;  %v5168_v30 = vshrl.u32 %v4579_v22, 16  ;;  %v5177_v10 = vshll.u32 %v4624_v6, 16 }
  0xbb   : > { %3641 = vmatprep.subr.bf16.mxu0 %v4145_v5  ;;  %3408 = vmatmul.mubr.bf16.gmra.mrb[16].mxu1 %v676_v36  ;;  %v1759_v58 = vsel %vm1731_vm3, %v1754_v40, %v1758_v21  ;;  %v1772_v36 = vshll.u32 %v4595_v34, 16  ;;  %v1332_v21 = vrot.slane %v1330_v23, 3  ;;  %v4081_v23 = vld [vmem:[%s5161_s2 + $0x1a8] sm:$0xff]  }
  0xbc   : > { %3411 = vmatprep.mubr.msk.bf16.mxu1 %vm4146_vm0, %v4145_v5  ;;  %v1335_v40 = vrot.slane %v1333_v35, 4  ;;  %v5173_v35 = vshrl.u32 %v4626_v52, 16 }
  0xbe   : > { %3642 = vmatpush3.bf16.msra.mxu0 %v4071_v53  ;;  %v5176_v53 = vshll.u32 %v4626_v52, 16 }
  0xbf   : > { %3643 = vmatprep.subr.bf16.mxu0 %v4145_v5 }
  0xc1   : > { %3616 = vmatmul.mubr.bf16.gmra.mrb[4].mxu0 %v1751_v19  ;;  %v5171_v19 = vshll.u32 %v4579_v22, 16 }
  0xc2   : > { %3644 = vmatpush3.bf16.msra.mxu0 %v4074_v8  ;;  %3619 = vmatprep.mubr.msk.bf16.mxu0 %vm4146_vm0, %v4145_v5  ;;  %v4628_v8 = vor.u32 %v840_v38, %v837_v3  ;;  %v1341_v3 = vrot.slane %v1339_v37, 3  ;;  %v1344_v38 = vrot.slane %v1342_v48, 4  ;;  %v1354_v48 = vor.u32 %v1353_v16, %v1350_v45 }
  0xc3   : > { %3645 = vmatprep.subr.bf16.mxu0 %v4145_v5  ;;  %3412 = vmatmul.mubr.bf16.gmra.mrb[20].mxu1 %v678_v17  ;;  %v4637_v17 = vld [vmem:[#allocation2 + $0x34] sm:$0xff]   ;;  %v2439_v49 = vrot.slane %v5171_v19, 2  ;;  %v2442_v45 = vrot.slane %v5169_v31, 1 }
  0xc4   : > { %3415 = vmatprep.mubr.msk.bf16.mxu1 %vm4146_vm0, %v4145_v5  ;;  %v1345_v37 = vor.u32 %v1344_v38, %v1341_v3  ;;  %v5174_v16 = vshrl.u32 %v4637_v17, 16  ;;  %v1359_v38 = vrot.slane %v1357_v50, 3 }
  0xc6   : > { %3646 = vmatpush3.bf16.msra.mxu0 %v4076_v29  ;;  %v2438_v29 = vrot.slane %v5168_v30, 1  ;;  %v5172_v30 = vshrl.u32 %v4624_v6, 16 }
  0xc7   : > { %3647 = vmatprep.subr.bf16.mxu0 %v4145_v5 }
  0xc8   : > { %v4670_v3 = vor.u32 %v2439_v49, %v2438_v29  ;;  %v846_v49 = vrot.slane %v5175_v55, 2  ;;  %v4713_v55 = vld [vmem:[#allocation2 + $0x38] ss:$0 sps:$4 sm:$0x77]  }
  0xc9   : > { %3620 = vmatmul.mubr.bf16.gmra.mrb[8].mxu0 %v1759_v58  ;;  %v1336_v58 = vor.u32 %v1335_v40, %v1332_v21  ;;  %v4659_v21 = vld [vmem:[#allocation2 + $0x38] sm:$0x3] }
  0xca   : > { %3623 = vmatprep.mubr.msk.bf16.mxu0 %vm4146_vm0, %v4145_v5  ;;  %3648 = vmatpush3.bf16.msra.mxu0 %v4078_v46  ;;  %v4651_v46 = vrot.slane %v1772_v36, 1  ;;  %v4668_v36 = vsel %vm1052_vm2, %v1345_v37, %v1354_v48  ;;  %v2953_v29 = vcombine.low %v4575_v18, %v4659_v21 }
  0xcb   : > { %3649 = vmatprep.subr.bf16.mxu0 %v4145_v5  ;;  %v4657_v9 = vsel %vm1052_vm2, %v4448_v54, %v1336_v58  ;;  %3416 = vmatmul.mubr.bf16.gmra.mrb[24].mxu1 %v677_v20  ;;  %v4665_v40 = vsel %vm1052_vm2, %v1336_v58, %v1345_v37  ;;  %v4084_v54 = vld [vmem:[%s5161_s2 + $0x1b0] sm:$0xff]   ;;  %v1360_v20 = vshll.u32 %v4478_v4, 16  ;;  %v2443_v58 = vrot.slane %v5170_v26, 2 }
  0xcc   : > { %3435 = vmatprep.mubr.msk.bf16.mxu1 %vm4146_vm0, %v4145_v5  ;;  %v2447_v37 = vrot.slane %v5177_v10, 2  ;;  %v2450_v4 = vrot.slane %v5173_v35, 1  ;;  %v2451_v26 = vrot.slane %v5176_v53, 2  ;;  %v1366_v19 = vshrl.u32 %v2953_v29, 16  ;;  %v4079_v35 = vld [vmem:[%s5161_s2 + $0x80] sm:$0xff]  }
  0xcd   : > { %v1362_v50 = vrot.slane %v1360_v20, 4  ;;  %v2444_v31 = vor.u32 %v2443_v58, %v2442_v45  ;;  %v1369_v18 = vshll.u32 %v2953_v29, 16  ;;  %v4086_v20 = vld [vmem:[%s5161_s2 + $0x1b8] sm:$0xff]   ;;  %v5178_v29 = vshll.u32 %v4637_v17, 16 }
  0xce   : > { %3650 = vmatpush3.bf16.msra.mxu0 %v4081_v23  ;;  %v2446_v23 = vrot.slane %v5172_v30, 1  ;;  %v2454_v30 = vrot.slane %v5174_v16, 1  ;;  %v2452_v58 = vor.u32 %v2451_v26, %v2450_v4 }
  0xcf   : > { %3651 = vmatprep.subr.bf16.mxu0 %v4145_v5  ;;  %v1363_v45 = vor.u32 %v1362_v50, %v1359_v38  ;;  %v1371_v53 = vrot.slane %v1369_v18, 4  ;;  %v5180_v38 = vor.u32 %v4564_v43, %v4562_v60  ;;  %v4082_v60 = vld [vmem:[%s5161_s2 + $0x88] sm:$0xff]  }
  0xd0   : > { %v2448_v25 = vor.u32 %v2447_v37, %v2446_v23  ;;  %v2455_v23 = vrot.slane %v5178_v29, 2  ;;  %v5179_v37 = vshll.u32 %v4417_v24, 16 }
  0xd1   : > { %3624 = vmatmul.mubr.bf16.gmra.mrb[12].mxu0 %v1767_v41  ;;  %v4707_v41 = vsel %vm2429_vm5, %v4670_v3, %v2444_v31  ;;  %v842_v26 = vsel %vm825_vm4, %v5180_v38, %v4628_v8  ;;  %v4725_v4 = vsel %vm1052_vm2, %v1354_v48, %v1363_v45  ;;  %v856_v48 = vshll.u32 %v4457_v59, 16  ;;  %v4771_v38 = vld [vmem:[#allocation2 + $0x10] sm:$0xf] }
  0xd2   : > { %3627 = vmatprep.mubr.msk.bf16.mxu0 %vm4146_vm0, %v4145_v5  ;;  %3652 = vmatpush3.bf16.msra.mxu0 %v4084_v54  ;;  %v849_v16 = vrot.slane %v5179_v37, 3  ;;  %v1368_v54 = vrot.slane %v1366_v19, 3  ;;  %v4717_v10 = vsel %vm2429_vm5, %v2444_v31, %v2448_v25  ;;  %v4728_v50 = vsel %vm2429_vm5, %v2448_v25, %v2452_v58 }
  0xd3   : > { %3653 = vmatprep.subr.bf16.mxu0 %v4145_v5  ;;  %v4730_v29 = vor.u32 %v2455_v23, %v2454_v30  ;;  %3436 = vmatmul.mubr.bf16.vlgmr.msra.gmra.mrb[0].mxu1 %v842_v26  ;;  %v5181_v31 = vshrl.u32 %v4548_v39, 16  ;;  %v1780_v25 = vshll.u32 %v4713_v55, 16 }
  0xd4   : > { %v4732_v19 = vor.u32 %v1371_v53, %v1368_v54  ;;  %3464 = vmatpush3.bf16.msra.mxu1 %v4079_v35  ;;  %3439 = vmatprep.mubr.msk.bf16.mxu1 %vm4146_vm0, %v4145_v5  ;;  %v850_v53 = vor.u32 %v849_v16, %v846_v49  ;;  %v853_v35 = vshrl.u32 %v4457_v59, 16  ;;  %v1943_v16 = vld [vmem:[#allocation2 + $0xc] sm:$0xf]  ;;  %v858_v54 = vrot.slane %v856_v48, 3  ;;  %v4113_v59 = vld [vmem:[%s5161_s2 + $0xe0] sm:$0xff]  }
  0xd5   : > { %v1770_v18 = vor.u32 %v5181_v31, %v4591_v1  ;;  %v4744_v43 = vsel %vm2429_vm5, %v2452_v58, %v4730_v29  ;;  %3465 = vmatprep.subr.bf16.mxu1 %v4145_v5  ;;  %v1776_v58 = vshrl.u32 %v4595_v34, 16  ;;  %v1782_v23 = vrot.slane %v1780_v25, 1  ;;  %v4091_v25 = vld [vmem:[%s5161_s2 + $0xa0] sm:$0xff]  }
  0xd6   : > { %3654 = vmatpush3.bf16.msra.mxu0 %v4086_v20  ;;  %v4750_v30 = vsel %vm1052_vm2, %v1363_v45, %v4732_v19  ;;  %v4085_v20 = vld [vmem:[%s5161_s2 + $0x90] sm:$0xff]   ;;  %v851_v49 = vsel %vm825_vm4, %v4628_v8, %v850_v53  ;;  %v855_v37 = vrot.slane %v853_v35, 2  ;;  %v3034_v8 = vcombine.low %v1943_v16, %v4771_v38 }
  0xd7   : > { %v1775_v1 = vsel %vm1731_vm3, %v1770_v18, %v4651_v46  ;;  %3683 = vmatprep.subr.bf16.mxu0 %v4145_v5  ;;  %v1778_v45 = vor.u32 %v1776_v58, %v4651_v46  ;;  %v4087_v46 = vld [vmem:[%s5161_s2 + $0x98] sm:$0xff]   ;;  %v862_v18 = vshrl.u32 %v4497_v15, 16  ;;  %v1784_v16 = vshrl.u32 %v4713_v55, 16 }
  0xd8   : > { %3466 = vmatpush3.bf16.msra.mxu1 %v4082_v60  ;;  %v859_v31 = vor.u32 %v858_v54, %v855_v37  ;;  %v865_v60 = vshll.u32 %v4497_v15, 16  ;;  %v2007_v55 = vshrl.u32 %v3034_v8, 16 }
  0xd9   : > { %3628 = vmatmul.mubr.bf16.gmra.mrb[16].mxu0 %v1775_v1  ;;  %3467 = vmatprep.subr.bf16.mxu1 %v4145_v5  ;;  %v1783_v26 = vsel %vm1731_vm3, %v1778_v45, %v1782_v23  ;;  %v864_v58 = vrot.slane %v862_v18, 2  ;;  %v2009_v45 = vshll.u32 %v3034_v8, 16  ;;  %v1786_v37 = vor.u32 %v1784_v16, %v1782_v23  ;;  %v4090_v8 = vld [vmem:[%s5161_s2 + $0x1c0] sm:$0xff]  }
  0xda   : > { %3631 = vmatprep.mubr.msk.bf16.mxu0 %vm4146_vm0, %v4145_v5  ;;  %v860_v1 = vsel %vm825_vm4, %v850_v53, %v859_v31  ;;  %v5182_v23 = vshll.u32 %v4579_v22, 16 }
  0xdb   : > { %3440 = vmatmul.mubr.bf16.gmra.mrb[4].mxu1 %v851_v49  ;;  %v4094_v49 = vld [vmem:[%s5161_s2 + $0xa8] sm:$0xff]   ;;  %v2011_v54 = vrot.slane %v2009_v45, 1 }
  0xdc   : > { %3443 = vmatprep.mubr.msk.bf16.mxu1 %vm4146_vm0, %v4145_v5  ;;  %3468 = vmatpush3.bf16.msra.mxu1 %v4085_v20  ;;  %v867_v20 = vrot.slane %v865_v60, 3 }
  0xdd   : > { %3469 = vmatprep.subr.bf16.mxu1 %v4145_v5 }
  0xde   : > { %v868_v53 = vor.u32 %v867_v20, %v864_v58  ;;  %v2012_v20 = vor.u32 %v2011_v54, %v2007_v55  ;;  %v880_v54 = vshrl.u32 %v4558_v7, 16  ;;  %v883_v55 = vshll.u32 %v4558_v7, 16 }
  0xdf   : > { %v5184_v7 = vshrl.u32 %v4579_v22, 16 }
  0xe0   : > { %3470 = vmatpush3.bf16.msra.mxu1 %v4087_v46  ;;  %v871_v46 = vshrl.u32 %v4526_v32, 16  ;;  %v869_v58 = vsel %vm825_vm4, %v859_v31, %v868_v53  ;;  %v4099_v31 = vld [vmem:[%s5161_s2 + $0xb8] sm:$0xff]  }
  0xe1   : > { %3632 = vmatmul.mubr.bf16.gmra.mrb[20].mxu0 %v1783_v26  ;;  %3471 = vmatprep.subr.bf16.mxu1 %v4145_v5  ;;  %v874_v26 = vshll.u32 %v4526_v32, 16  ;;  %v4120_v32 = vld [vmem:[%s5161_s2 + $0xf8] sm:$0xff]  }
  0xe2   : > { %3635 = vmatprep.mubr.msk.bf16.mxu0 %vm4146_vm0, %v4145_v5  ;;  %v873_v45 = vrot.slane %v871_v46, 2 }
  0xe3   : > { %3444 = vmatmul.mubr.bf16.gmra.mrb[8].mxu1 %v860_v1  ;;  %v2016_v1 = vrot.slane %v5182_v23, 1  ;;  %v876_v16 = vrot.slane %v874_v26, 3 }
  0xe4   : > { %3447 = vmatprep.mubr.msk.bf16.mxu1 %vm4146_vm0, %v4145_v5  ;;  %3472 = vmatpush3.bf16.msra.mxu1 %v4091_v25  ;;  %v4097_v25 = vld [vmem:[%s5161_s2 + $0xb0] sm:$0xff]  }
  0xe5   : > { %3473 = vmatprep.subr.bf16.mxu1 %v4145_v5 }
  0xe8   : > { %3474 = vmatpush3.bf16.msra.mxu1 %v4094_v49  ;;  %v2017_v49 = vsel %vm1731_vm3, %v2012_v20, %v2016_v1 }
  0xe9   : > { %3636 = vmatmul.mubr.bf16.gmra.mrb[24].mxu0 %v1786_v37  ;;  %3475 = vmatprep.subr.bf16.mxu1 %v4145_v5  ;;  %v877_v37 = vor.u32 %v876_v16, %v873_v45  ;;  %v882_v45 = vrot.slane %v880_v54, 2  ;;  %v885_v16 = vrot.slane %v883_v55, 3  ;;  %v5185_v55 = vshll.u32 %v4624_v6, 16 }
  0xea   : > { %3655 = vmatprep.mubr.msk.bf16.mxu0 %vm4146_vm0, %v4145_v5 }
  0xeb   : > { %3448 = vmatmul.mubr.bf16.gmra.mrb[12].mxu1 %v869_v58  ;;  %v878_v23 = vsel %vm825_vm4, %v868_v53, %v877_v37  ;;  %v5183_v58 = vshll.u32 %v4607_v61, 16 }
  0xec   : > { %3451 = vmatprep.mubr.msk.bf16.mxu1 %vm4146_vm0, %v4145_v5  ;;  %3476 = vmatpush3.bf16.msra.mxu1 %v4097_v25  ;;  %v4092_v25 = vld [vmem:[%s5161_s2 + $0x1c8] sm:$0xff]  }
  0xed   : > { %3477 = vmatprep.subr.bf16.mxu1 %v4145_v5  ;;  %v2024_v20 = vrot.slane %v5183_v58, 1 }
  0xf0   : > { %3478 = vmatpush3.bf16.msra.mxu1 %v4099_v31  ;;  %v4095_v31 = vld [vmem:[%s5161_s2 + $0x1d0] sm:$0xff]  }
  0xf1   : > { %3656 = vmatmul.mubr.bf16.vlgmr.msra.gmra.mrb[0].mxu0 %v2017_v49  ;;  %3507 = vmatprep.subr.bf16.mxu1 %v4145_v5  ;;  %v886_v49 = vor.u32 %v885_v16, %v882_v45  ;;  %v4101_v45 = vld [vmem:[%s5161_s2 + $0x1e0] sm:$0xff]   ;;  %v1054_v16 = vshrl.u32 %v4383_v51, 16 }
  0xf2   : > { %3684 = vmatpush3.bf16.msra.mxu0 %v4090_v8  ;;  %3659 = vmatprep.mubr.msk.bf16.mxu0 %vm4146_vm0, %v4145_v5  ;;  %v2020_v8 = vor.u32 %v5184_v7, %v2016_v1  ;;  %v4098_v1 = vld [vmem:[%s5161_s2 + $0x1d8] sm:$0xff]   ;;  %v1057_v7 = vshll.u32 %v4383_v51, 16  ;;  %v5189_v51 = vshll.u32 %v4396_v2, 16 }
  0xf3   : > { %3685 = vmatprep.subr.bf16.mxu0 %v4145_v5  ;;  %3452 = vmatmul.mubr.bf16.gmra.mrb[16].mxu1 %v878_v23  ;;  %v887_v54 = vsel %vm825_vm4, %v877_v37, %v886_v49  ;;  %v5186_v23 = vshrl.u32 %v4607_v61, 16 }
  0xf4   : > { %3455 = vmatprep.mubr.msk.bf16.mxu1 %vm4146_vm0, %v4145_v5  ;;  %v2025_v53 = vsel %vm1731_vm3, %v2020_v8, %v2024_v20  ;;  %v1056_v8 = vrot.slane %v1054_v16, 3  ;;  %v4107_v16 = vld [vmem:[%s5161_s2 + $0x1f0] sm:$0xff]  }
  0xf5   : > { %v2028_v58 = vor.u32 %v5186_v23, %v2024_v20  ;;  %v4104_v20 = vld [vmem:[%s5161_s2 + $0x1e8] sm:$0xff]   ;;  %v1062_v23 = vrot.slane %v5189_v51, 4 }
  0xf6   : > { %3686 = vmatpush3.bf16.msra.mxu0 %v4092_v25  ;;  %v2032_v25 = vrot.slane %v5185_v55, 1 }
  0xf7   : > { %3687 = vmatprep.subr.bf16.mxu0 %v4145_v5 }
  0xf8   : > { %v2033_v37 = vsel %vm1731_vm3, %v2028_v58, %v2032_v25  ;;  %v5190_v58 = vshrl.u32 %v4624_v6, 16 }
  0xf9   : > { %3660 = vmatmul.mubr.bf16.gmra.mrb[4].mxu0 %v2025_v53 }
  0xfa   : > { %3688 = vmatpush3.bf16.msra.mxu0 %v4095_v31  ;;  %3663 = vmatprep.mubr.msk.bf16.mxu0 %vm4146_vm0, %v4145_v5  ;;  %v5187_v31 = vshll.u32 %v4626_v52, 16 }
  0xfb   : > { %3689 = vmatprep.subr.bf16.mxu0 %v4145_v5  ;;  %3456 = vmatmul.mubr.bf16.gmra.mrb[20].mxu1 %v887_v54  ;;  %v5188_v54 = vshrl.u32 %v4396_v2, 16  ;;  %v4102_v2 = vld [vmem:[%s5161_s2 + $0xc0] sm:$0xff]  }
  0xfc   : > { %3459 = vmatprep.mubr.msk.bf16.mxu1 %vm4146_vm0, %v4145_v5  ;;  %v2040_v53 = vrot.slane %v5187_v31, 1 }
  0xfd   : > { %v1061_v55 = vrot.slane %v5188_v54, 3 }
  0xfe   : > { %3690 = vmatpush3.bf16.msra.mxu0 %v4098_v1  ;;  %v1059_v1 = vrot.slane %v1057_v7, 4 }
  0xff   : > { %3691 = vmatprep.subr.bf16.mxu0 %v4145_v5  ;;  %v1063_v31 = vor.u32 %v1062_v23, %v1061_v55  ;;  %v5193_v55 = vshll.u32 %v4417_v24, 16  ;;  %v4904_v23 = vld [vmem:[#allocation2 + $0x3c] ss:$0 sps:$4 sm:$0x77]  }
 0x100   : > { %v1060_v7 = vor.u32 %v1059_v1, %v1056_v8  ;;  %v5192_v1 = vshrl.u32 %v4417_v24, 16 }
 0x101   : > { %3664 = vmatmul.mubr.bf16.gmra.mrb[8].mxu0 %v2033_v37  ;;  %v1066_v51 = vrot.slane %v5193_v55, 4  ;;  %v4110_v55 = vld [vmem:[%s5161_s2 + $0xd8] sm:$0xff]  }
 0x102   : > { %3667 = vmatprep.mubr.msk.bf16.mxu0 %vm4146_vm0, %v4145_v5  ;;  %3692 = vmatpush3.bf16.msra.mxu0 %v4101_v45  ;;  %v2036_v45 = vor.u32 %v5190_v58, %v2032_v25  ;;  %v1064_v25 = vsel %vm1052_vm2, %v1060_v7, %v1063_v31  ;;  %v1065_v54 = vrot.slane %v5192_v1, 3  ;;  %v5194_v58 = vshrl.u32 %v4626_v52, 16 }
 0x103   : > { %3693 = vmatprep.subr.bf16.mxu0 %v4145_v5  ;;  %3460 = vmatmul.mubr.bf16.gmra.mrb[24].mxu1 %v886_v49  ;;  %v4109_v49 = vld [vmem:[%s5161_s2 + $0x1f8] sm:$0xff]   ;;  %v1069_v1 = vrot.slane %v853_v35, 3  ;;  %v2058_v35 = vshrl.u32 %v4904_v23, 16 }
 0x104   : > { %3479 = vmatprep.mubr.msk.bf16.mxu1 %vm4146_vm0, %v4145_v5  ;;  %v2041_v37 = vsel %vm1731_vm3, %v2036_v45, %v2040_v53  ;;  %v2044_v45 = vor.u32 %v5194_v58, %v2040_v53  ;;  %v1067_v7 = vor.u32 %v1066_v51, %v1065_v54  ;;  %v4108_v53 = vld [vmem:[%s5161_s2 + $0xd0] sm:$0xff]   ;;  %v1070_v54 = vrot.slane %v856_v48, 4 }
 0x105   : > { %v1073_v51 = vrot.slane %v862_v18, 3  ;;  %v1074_v58 = vrot.slane %v865_v60, 4  ;;  %v4118_v18 = vld [vmem:[%s5161_s2 + $0xf0] sm:$0xff]   ;;  %v2240_v60 = vrot.slane %v4579_v22, 1  ;;  %v4112_v22 = vld [vmem:[%s5161_s2 + $0x200] sm:$0xff]  }
 0x106   : > { %3694 = vmatpush3.bf16.msra.mxu0 %v4104_v20  ;;  %v5191_v20 = vshll.u32 %v4637_v17, 16 }
 0x107   : > { %3695 = vmatprep.subr.bf16.mxu0 %v4145_v5 }
 0x108   : > { %v2048_v8 = vrot.slane %v5191_v20, 1 }
 0x109   : > { %3668 = vmatmul.mubr.bf16.gmra.mrb[12].mxu0 %v2041_v37  ;;  %v2054_v37 = vshll.u32 %v4904_v23, 16 }
 0x10a   : > { %3671 = vmatprep.mubr.msk.bf16.mxu0 %vm4146_vm0, %v4145_v5  ;;  %3696 = vmatpush3.bf16.msra.mxu0 %v4107_v16  ;;  %v4105_v16 = vld [vmem:[%s5161_s2 + $0xc8] sm:$0xff]   ;;  %v2049_v24 = vsel %vm1731_vm3, %v2044_v45, %v2048_v8 }
 0x10b   : > { %3697 = vmatprep.subr.bf16.mxu0 %v4145_v5  ;;  %3480 = vmatmul.mubr.bf16.vlgmr.msra.gmra.mrb[0].mxu1 %v1064_v25  ;;  %v1068_v25 = vsel %vm1052_vm2, %v1063_v31, %v1067_v7 }
 0x10c   : > { %3508 = vmatpush3.bf16.msra.mxu1 %v4102_v2  ;;  %3483 = vmatprep.mubr.msk.bf16.mxu1 %vm4146_vm0, %v4145_v5  ;;  %v2056_v2 = vrot.slane %v2054_v37, 1  ;;  %v2217_v37 = vld [vmem:[#allocation2 + $0xc] sm:$0xe] }
 0x10d   : > { %3509 = vmatprep.subr.bf16.mxu1 %v4145_v5  ;;  %v4958_v15 = vcombine.low %v2217_v37, %v4771_v38  ;;  %v2246_v37 = vrot.slane %v4626_v52, 1  ;;  %v4124_v52 = vld [vmem:[%s5161_s2 + $0x238] sm:$0xff]  }
 0x10e   : > { %3698 = vmatpush3.bf16.msra.mxu0 %v4109_v49  ;;  %v5195_v49 = vshrl.u32 %v4637_v17, 16  ;;  %v2060_v45 = vor.u32 %v2058_v35, %v2056_v2  ;;  %v4117_v35 = vld [vmem:[%s5161_s2 + $0x210] sm:$0xff]  }
 0x10f   : > { %3727 = vmatprep.subr.bf16.mxu0 %v4145_v5 }
 0x110   : > { %3510 = vmatpush3.bf16.msra.mxu1 %v4105_v16  ;;  %v2052_v20 = vor.u32 %v5195_v49, %v2048_v8  ;;  %v1071_v8 = vor.u32 %v1070_v54, %v1069_v1  ;;  %v4116_v16 = vld [vmem:[%s5161_s2 + $0xe8] sm:$0xff]   ;;  %v2239_v49 = vrot.slane %v4958_v15, 1 }
 0x111   : > { %3672 = vmatmul.mubr.bf16.gmra.mrb[16].mxu0 %v2049_v24  ;;  %3511 = vmatprep.subr.bf16.mxu1 %v4145_v5  ;;  %v1075_v24 = vor.u32 %v1074_v58, %v1073_v51  ;;  %v4114_v1 = vld [vmem:[%s5161_s2 + $0x208] sm:$0xff]   ;;  %v2244_v58 = vrot.slane %v4624_v6, 1 }
 0x112   : > { %3675 = vmatprep.mubr.msk.bf16.mxu0 %vm4146_vm0, %v4145_v5  ;;  %v2057_v31 = vsel %vm1731_vm3, %v2052_v20, %v2056_v2  ;;  %v1072_v48 = vsel %vm1052_vm2, %v1067_v7, %v1071_v8  ;;  %v1031_v7 = vld [vmem:[#allocation2 + $0x34] sm:$0x3]  ;;  %v1077_v2 = vrot.slane %v871_v46, 3  ;;  %v4122_v6 = vld [vmem:[%s5161_s2 + $0x228] sm:$0xff]  }
 0x113   : > { %3484 = vmatmul.mubr.bf16.gmra.mrb[4].mxu1 %v1068_v25  ;;  %v1078_v25 = vrot.slane %v874_v26, 4  ;;  %v2922_v38 = vcombine.low %v4544_v47, %v1031_v7  ;;  %v2241_v47 = vsel %vm2238_vm6, %v2239_v49, %v2240_v60  ;;  %v2247_v7 = vsel %vm2238_vm6, %v2244_v58, %v2246_v37  ;;  %v4132_v49 = vld [vmem:[%s5161_s2 + $0x120] sm:$0xff]  }
 0x114   : > { %3487 = vmatprep.mubr.msk.bf16.mxu1 %vm4146_vm0, %v4145_v5  ;;  %3512 = vmatpush3.bf16.msra.mxu1 %v4108_v53  ;;  %v1076_v53 = vsel %vm1052_vm2, %v1071_v8, %v1075_v24 }
 0x115   : > { %3513 = vmatprep.subr.bf16.mxu1 %v4145_v5  ;;  %v1079_v46 = vor.u32 %v1078_v25, %v1077_v2  ;;  %v1082_v26 = vshrl.u32 %v2922_v38, 16  ;;  %v1085_v20 = vshll.u32 %v2922_v38, 16  ;;  %v4130_v2 = vld [vmem:[%s5161_s2 + $0x110] sm:$0xff]   ;;  %v2434_v38 = vshll.u32 %v4958_v15, 16 }
 0x117   : > { %v1080_v54 = vsel %vm1052_vm2, %v1075_v24, %v1079_v46  ;;  %v1087_v8 = vrot.slane %v1085_v20, 4  ;;  %v4123_v24 = vld [vmem:[%s5161_s2 + $0x230] sm:$0xff]  }
 0x118   : > { %3514 = vmatpush3.bf16.msra.mxu1 %v4110_v55  ;;  %v2242_v55 = vrot.slane %v4607_v61, 1  ;;  %v4119_v61 = vld [vmem:[%s5161_s2 + $0x218] sm:$0xff]  }
 0x119   : > { %3676 = vmatmul.mubr.bf16.gmra.mrb[20].mxu0 %v2057_v31  ;;  %3515 = vmatprep.subr.bf16.mxu1 %v4145_v5  ;;  %v1084_v31 = vrot.slane %v1082_v26, 3 }
 0x11a   : > { %3679 = vmatprep.mubr.msk.bf16.mxu0 %vm4146_vm0, %v4145_v5 }
 0x11b   : > { %3488 = vmatmul.mubr.bf16.gmra.mrb[8].mxu1 %v1072_v48  ;;  %v1088_v48 = vor.u32 %v1087_v8, %v1084_v31 }
 0x11c   : > { %3491 = vmatprep.mubr.msk.bf16.mxu1 %vm4146_vm0, %v4145_v5  ;;  %3516 = vmatpush3.bf16.msra.mxu1 %v4113_v59  ;;  %v2243_v59 = vsel %vm2238_vm6, %v2240_v60, %v2242_v55  ;;  %v4128_v60 = vld [vmem:[%s5161_s2 + $0x100] sm:$0xff]  }
 0x11d   : > { %3517 = vmatprep.subr.bf16.mxu1 %v4145_v5  ;;  %v1089_v51 = vsel %vm1052_vm2, %v1079_v46, %v1088_v48 }
 0x120   : > { %3518 = vmatpush3.bf16.msra.mxu1 %v4116_v16  ;;  %v2245_v16 = vsel %vm2238_vm6, %v2242_v55, %v2244_v58 }
 0x121   : > { %3680 = vmatmul.mubr.bf16.gmra.mrb[24].mxu0 %v2060_v45  ;;  %3519 = vmatprep.subr.bf16.mxu1 %v4145_v5  ;;  %v4121_v45 = vld [vmem:[%s5161_s2 + $0x220] sm:$0xff]  }
 0x122   : > { %3699 = vmatprep.mubr.msk.bf16.mxu0 %vm4146_vm0, %v4145_v5 }
 0x123   : > { %3492 = vmatmul.mubr.bf16.gmra.mrb[12].mxu1 %v1076_v53 }
 0x124   : > { %3495 = vmatprep.mubr.msk.bf16.mxu1 %vm4146_vm0, %v4145_v5  ;;  %3520 = vmatpush3.bf16.msra.mxu1 %v4118_v18  ;;  %v2248_v18 = vrot.slane %v4637_v17, 1  ;;  %v4129_v17 = vld [vmem:[%s5161_s2 + $0x108] sm:$0xff]  }
 0x125   : > { %3521 = vmatprep.subr.bf16.mxu1 %v4145_v5 }
 0x126   : > { %v2249_v53 = vsel %vm2238_vm6, %v2246_v37, %v2248_v18 }
 0x128   : > { %3522 = vmatpush3.bf16.msra.mxu1 %v4120_v32  ;;  %v4133_v32 = vld [vmem:[%s5161_s2 + $0x128] sm:$0xff]  }
 0x129   : > { %3700 = vmatmul.mubr.bf16.vlgmr.msra.gmra.mrb[0].mxu0 %v2241_v47  ;;  %3771 = vmatprep.subr.bf16.mxu1 %v4145_v5  ;;  %v4134_v47 = vld [vmem:[%s5161_s2 + $0x130] sm:$0xff]  }
 0x12a   : > { %3728 = vmatpush3.bf16.msra.mxu0 %v4112_v22  ;;  %3703 = vmatprep.mubr.msk.bf16.mxu0 %vm4146_vm0, %v4145_v5 }
 0x12b   : > { %3729 = vmatprep.subr.bf16.mxu0 %v4145_v5  ;;  %3496 = vmatmul.mubr.bf16.gmra.mrb[16].mxu1 %v1080_v54 }
 0x12c   : > { %3499 = vmatprep.mubr.msk.bf16.mxu1 %vm4146_vm0, %v4145_v5 }
 0x12e   : > { %3730 = vmatpush3.bf16.msra.mxu0 %v4114_v1 }
 0x12f   : > { %3731 = vmatprep.subr.bf16.mxu0 %v4145_v5 }
 0x131   : > { %3704 = vmatmul.mubr.bf16.gmra.mrb[4].mxu0 %v2243_v59 }
 0x132   : > { %3732 = vmatpush3.bf16.msra.mxu0 %v4117_v35  ;;  %3707 = vmatprep.mubr.msk.bf16.mxu0 %vm4146_vm0, %v4145_v5 }
 0x133   : > { %3733 = vmatprep.subr.bf16.mxu0 %v4145_v5  ;;  %3500 = vmatmul.mubr.bf16.gmra.mrb[20].mxu1 %v1089_v51 }
 0x134   : > { %3503 = vmatprep.mubr.msk.bf16.mxu1 %vm4146_vm0, %v4145_v5 }
 0x136   : > { %3734 = vmatpush3.bf16.msra.mxu0 %v4119_v61 }
 0x137   : > { %3735 = vmatprep.subr.bf16.mxu0 %v4145_v5 }
 0x139   : > { %3708 = vmatmul.mubr.bf16.gmra.mrb[8].mxu0 %v2245_v16 }
 0x13a   : > { %3711 = vmatprep.mubr.msk.bf16.mxu0 %vm4146_vm0, %v4145_v5  ;;  %3736 = vmatpush3.bf16.msra.mxu0 %v4121_v45 }
 0x13b   : > { %3737 = vmatprep.subr.bf16.mxu0 %v4145_v5  ;;  %3504 = vmatmul.mubr.bf16.gmra.mrb[24].mxu1 %v1088_v48 }
 0x13c   : > { %3523 = vmatprep.mubr.msk.bf16.mxu1 %vm4146_vm0, %v4145_v5 }
 0x13e   : > { %3738 = vmatpush3.bf16.msra.mxu0 %v4122_v6 }
 0x13f   : > { %3739 = vmatprep.subr.bf16.mxu0 %v4145_v5 }
 0x141   : > { %3712 = vmatmul.mubr.bf16.gmra.mrb[12].mxu0 %v2247_v7 }
 0x142   : > { %3715 = vmatprep.mubr.msk.bf16.mxu0 %vm4146_vm0, %v4145_v5  ;;  %3740 = vmatpush3.bf16.msra.mxu0 %v4123_v24 }
 0x143   : > { %3741 = vmatprep.subr.bf16.mxu0 %v4145_v5  ;;  %3524 = vmatmul.mubr.bf16.vlgmr.msra.gmra.mrb[0].mxu1 %v4471_v62  ;;  %v2250_v62 = vrot.slane %v4904_v23, 1  ;;  %v2431_v23 = vshrl.u32 %v4958_v15, 16 }
 0x144   : > { %3779 = vmatpush3.bf16.msra.mxu1 %v4128_v60  ;;  %3527 = vmatprep.mubr.msk.bf16.mxu1 %vm4146_vm0, %v4145_v5 }
 0x145   : > { %3772 = vmatprep.subr.bf16.mxu1 %v4145_v5  ;;  %v2251_v25 = vsel %vm2238_vm6, %v2248_v18, %v2250_v62  ;;  %v2433_v22 = vrot.slane %v2431_v23, 1 }
 0x146   : > { %3742 = vmatpush3.bf16.msra.mxu0 %v4124_v52 }
 0x148   : > { %3780 = vmatpush3.bf16.msra.mxu1 %v4129_v17 }
 0x149   : > { %3716 = vmatmul.mubr.bf16.gmra.mrb[16].mxu0 %v2249_v53  ;;  %3773 = vmatprep.subr.bf16.mxu1 %v4145_v5 }
 0x14a   : > { %3719 = vmatprep.mubr.msk.bf16.mxu0 %vm4146_vm0, %v4145_v5 }
 0x14b   : > { %3528 = vmatmul.mubr.bf16.gmra.mrb[4].mxu1 %v4657_v9  ;;  %v4131_v9 = vld [vmem:[%s5161_s2 + $0x118] sm:$0xff]  }
 0x14c   : > { %3531 = vmatprep.mubr.msk.bf16.mxu1 %vm4146_vm0, %v4145_v5  ;;  %3781 = vmatpush3.bf16.msra.mxu1 %v4130_v2 }
 0x14d   : > { %3774 = vmatprep.subr.bf16.mxu1 %v4145_v5 }
 0x150   : > { %3782 = vmatpush3.bf16.msra.mxu1 %v4131_v9 }
 0x151   : > { %3720 = vmatmul.mubr.bf16.gmra.mrb[20].mxu0 %v2251_v25  ;;  %3775 = vmatprep.subr.bf16.mxu1 %v4145_v5 }
 0x152   : > { %3723 = vmatprep.mubr.msk.bf16.mxu0 %vm4146_vm0, %v4145_v5 }
 0x153   : > { %3532 = vmatmul.mubr.bf16.gmra.mrb[8].mxu1 %v4665_v40  ;;  %v2436_v40 = vrot.slane %v2434_v38, 2 }
 0x154   : > { %3535 = vmatprep.mubr.msk.bf16.mxu1 %vm4146_vm0, %v4145_v5  ;;  %3783 = vmatpush3.bf16.msra.mxu1 %v4132_v49 }
 0x155   : > { %3776 = vmatprep.subr.bf16.mxu1 %v4145_v5  ;;  %v2437_v15 = vor.u32 %v2436_v40, %v2433_v22 }
 0x157   : > { %v2441_v46 = vsel %vm2429_vm5, %v2437_v15, %v4670_v3  ;;  %v4126_v3 = vld [vmem:[#allocation2 + $0x3c] ss:$0 sps:$4 sm:$0xff]  }
 0x158   : > { %3784 = vmatpush3.bf16.msra.mxu1 %v4133_v32 }
 0x159   : > { %3724 = vmatmul.mubr.bf16.gmra.mrb[24].mxu0 %v2250_v62  ;;  %3777 = vmatprep.subr.bf16.mxu1 %v4145_v5 }
 0x15a   : > { %3743 = vmatprep.mubr.msk.bf16.mxu0 %vm4146_vm0, %v4145_v5 }
 0x15b   : > { %3536 = vmatmul.mubr.bf16.gmra.mrb[12].mxu1 %v4668_v36  ;;  %v4135_v36 = vld [vmem:[%s5161_s2 + $0x138] sm:$0xff]  }
 0x15c   : > { %3539 = vmatprep.mubr.msk.bf16.mxu1 %vm4146_vm0, %v4145_v5  ;;  %3785 = vmatpush3.bf16.msra.mxu1 %v4134_v47 }
 0x15d   : > { %3778 = vmatprep.subr.bf16.mxu1 %v4145_v5 }
 0x160   : > { %3786 = vmatpush3.bf16.msra.mxu1 %v4135_v36 }
 0x161   : > { %3744 = vmatmul.mubr.bf16.vlgmr.msra.gmra.mrb[0].mxu0 %v2441_v46 }
 0x162   : > { %3747 = vmatprep.mubr.msk.bf16.mxu0 %vm4146_vm0, %v4145_v5 }
 0x163   : > { %3540 = vmatmul.mubr.bf16.gmra.mrb[16].mxu1 %v4725_v4  ;;  %v2462_v4 = vshll.u32 %v4126_v3, 16 }
 0x164   : > { %3543 = vmatprep.mubr.msk.bf16.mxu1 %vm4146_vm0, %v4145_v5 }
 0x169   : > { %3748 = vmatmul.mubr.bf16.gmra.mrb[4].mxu0 %v4707_v41  ;;  %v2459_v41 = vshrl.u32 %v4126_v3, 16 }
 0x16a   : > { %3751 = vmatprep.mubr.msk.bf16.mxu0 %vm4146_vm0, %v4145_v5 }
 0x16b   : > { %3544 = vmatmul.mubr.bf16.gmra.mrb[20].mxu1 %v4750_v30  ;;  %v2464_v30 = vrot.slane %v2462_v4, 2 }
 0x16c   : > { %3547 = vmatprep.mubr.msk.bf16.mxu1 %vm4146_vm0, %v4145_v5 }
 0x171   : > { %3752 = vmatmul.mubr.bf16.gmra.mrb[8].mxu0 %v4717_v10  ;;  %v2461_v10 = vrot.slane %v2459_v41, 1 }
 0x172   : > { %3755 = vmatprep.mubr.msk.bf16.mxu0 %vm4146_vm0, %v4145_v5 }
 0x173   : > { %3548 = vmatmul.mubr.bf16.gmra.mrb[24].mxu1 %v4732_v19  ;;  %v2465_v19 = vor.u32 %v2464_v30, %v2461_v10 }
 0x174   : > { %3583 = vmatprep.mubr.msk.bf16.mxu1 %vm4146_vm0, %v4145_v5 }
 0x179   : > { %3756 = vmatmul.mubr.bf16.gmra.mrb[12].mxu0 %v4728_v50  ;;  %v2466_v50 = vsel %vm2429_vm5, %v4730_v29, %v2465_v19 }
 0x17a   : > { %3759 = vmatprep.mubr.msk.bf16.mxu0 %vm4146_vm0, %v4145_v5 }
 0x17b   : > { %3584 = vmatmul.mubr.bf16.vlgmr.msra.gmra.mrb[16].mxu1 %v4548_v39  ;;  %v2984_v39 = vcombine.low %v4659_v21, %v4659_v21 }
 0x17c   : > { %3587 = vmatprep.mubr.msk.bf16.mxu1 %vm4146_vm0, %v4145_v5 }
 0x181   : > { %3760 = vmatmul.mubr.bf16.gmra.mrb[16].mxu0 %v4744_v43 }
 0x182   : > { %3763 = vmatprep.mubr.msk.bf16.mxu0 %vm4146_vm0, %v4145_v5 }
 0x183   : > { %3588 = vmatmul.mubr.bf16.gmra.mrb[20].mxu1 %v4595_v34 }
 0x184   : > { %3591 = vmatprep.mubr.msk.bf16.mxu1 %vm4146_vm0, %v4145_v5 }
 0x189   : > { %3764 = vmatmul.mubr.bf16.gmra.mrb[20].mxu0 %v2466_v50 }
 0x18a   : > { %3767 = vmatprep.mubr.msk.bf16.mxu0 %vm4146_vm0, %v4145_v5 }
 0x18b   : > { %3592 = vmatmul.mubr.bf16.gmra.mrb[24].mxu1 %v2984_v39 }
 0x191   : > { %3768 = vmatmul.mubr.bf16.gmra.mrb[24].mxu0 %v2465_v19 }
 0x216   : > { %v1463_v43 = vpop.f32.mrb[0].mxu1 }
 0x217   : > { %v3525_v26 = vpop.f32.mrb[1].mxu1 }
 0x218   : > { %v1466_v20 = vpop.f32.mrb[2].mxu1 }
 0x219   : > { %v3526_v1 = vpop.f32.mrb[3].mxu1 }
 0x21e   : > { %v1471_v34 = vpop.f32.mrb[4].mxu1 }
 0x21f   : > { %v3529_v54 = vpop.f32.mrb[5].mxu1 }
 0x220   : > { %v1474_v55 = vpop.f32.mrb[6].mxu1 }
 0x221   : > { %v3530_v31 = vpop.f32.mrb[7].mxu1 }
 0x226   : > { %v1479_v8 = vpop.f32.mrb[8].mxu1 }
 0x227   : > { %v3533_v29 = vpop.f32.mrb[9].mxu1 }
 0x228   : > { %v1482_v35 = vpop.f32.mrb[10].mxu1 }
 0x229   : > { %v3534_v59 = vpop.f32.mrb[11].mxu1 }
 0x22e   : > { %v1487_v48 = vpop.f32.mrb[12].mxu1 }
 0x22f   : > { %v3537_v5 = vpop.f32.mrb[13].mxu1 }
 0x230   : > { %v1490_v61 = vpop.f32.mrb[14].mxu1 }
 0x231   : > { %v3538_v51 = vpop.f32.mrb[15].mxu1 }
 0x234   : > { %v2556_v21 = vpop.f32.mrb[0].mxu0 }
 0x235   : > { %v3787_v58 = vadd.f32 %v2556_v21, %v1463_v43  ;;  %v3745_v45 = vpop.f32.mrb[1].mxu0 }
 0x236   : > { %v2559_v16 = vpop.f32.mrb[2].mxu0 }
 0x237   : > { %v2689_v6 = vmul.f32 %v3787_v58, %v4358_v0  ;;  %v3788_v37 = vadd.f32 %v2559_v16, %v1466_v20  ;;  %v3746_v24 = vpop.f32.mrb[3].mxu0 }
 0x239   : > { %v3197_v7 = vpack.c.bf16 %v3788_v37, %v3787_v58  ;;  %v2690_v52 = vmul.f32 %v3788_v37, %v4363_v14  ;;  %v2722_v18 = vmul.f32 %v2689_v6, %v2689_v6 }
 0x23b   : > { %3198 = vst [vmem:[%s5131_s27] sm:$0xff] %v3197_v7   ;;  %v2702_v60 = vadd.f32 %v2690_v52, %v2689_v6  ;;  %v2723_v53 = vmul.f32 %v2690_v52, %v2690_v52 }
 0x23c   : > { %v2564_v17 = vpop.f32.mrb[4].mxu0 }
 0x23d   : > { %v2735_v62 = vadd.f32 %v2723_v53, %v2722_v18  ;;  %v3789_v0 = vadd.f32 %v2564_v17, %v1471_v34  ;;  %v3749_v2 = vpop.f32.mrb[5].mxu0 }
 0x23e   : > { %v2567_v25 = vpop.f32.mrb[6].mxu0 }
 0x23f   : > { %v2691_v9 = vmul.f32 %v3789_v0, %v4356_v63  ;;  %v3790_v23 = vadd.f32 %v2567_v25, %v1474_v55  ;;  %v3750_v38 = vpop.f32.mrb[7].mxu0 }
 0x241   : > { %v2703_v49 = vadd.f32 %v2702_v60, %v2691_v9  ;;  %v2724_v22 = vmul.f32 %v2691_v9, %v2691_v9  ;;  %v3202_v40 = vpack.c.bf16 %v3790_v23, %v3789_v0  ;;  %v2692_v32 = vmul.f32 %v3790_v23, %v4361_v13 }
 0x243   : > { %v2736_v14 = vadd.f32 %v2735_v62, %v2724_v22  ;;  %3235 = vst [vmem:[%s5131_s27 + $0x8] sm:$0xff] %v3202_v40   ;;  %v2704_v15 = vadd.f32 %v2703_v49, %v2692_v32  ;;  %v2725_v47 = vmul.f32 %v2692_v32, %v2692_v32 }
 0x244   : > { %v2572_v46 = vpop.f32.mrb[8].mxu0 }
 0x245   : > { %v2737_v36 = vadd.f32 %v2736_v14, %v2725_v47  ;;  %v3791_v3 = vadd.f32 %v2572_v46, %v1479_v8  ;;  %v3753_v41 = vpop.f32.mrb[9].mxu0 }
 0x246   : > { %v2575_v4 = vpop.f32.mrb[10].mxu0 }
 0x247   : > { %v2693_v10 = vmul.f32 %v3791_v3, %v4370_v28  ;;  %v3792_v63 = vadd.f32 %v2575_v4, %v1482_v35  ;;  %v3754_v30 = vpop.f32.mrb[11].mxu0 }
 0x249   : > { %v2705_v19 = vadd.f32 %v2704_v15, %v2693_v10  ;;  %v2726_v50 = vmul.f32 %v2693_v10, %v2693_v10  ;;  %v3207_v39 = vpack.c.bf16 %v3792_v63, %v3791_v3  ;;  %v2694_v43 = vmul.f32 %v3792_v63, %v4368_v27 }
 0x24b   : > { %v2738_v13 = vadd.f32 %v2737_v36, %v2726_v50  ;;  %3236 = vst [vmem:[%s5131_s27 + $0x10] sm:$0xff] %v3207_v39   ;;  %v2706_v26 = vadd.f32 %v2705_v19, %v2694_v43  ;;  %v2727_v20 = vmul.f32 %v2694_v43, %v2694_v43 }
 0x24c   : > { %v2580_v1 = vpop.f32.mrb[12].mxu0 }
 0x24d   : > { %v2739_v34 = vadd.f32 %v2738_v13, %v2727_v20  ;;  %v3793_v54 = vadd.f32 %v2580_v1, %v1487_v48  ;;  %v3757_v55 = vpop.f32.mrb[13].mxu0 }
 0x24e   : > { %v2583_v31 = vpop.f32.mrb[14].mxu0  ;;  %v1675_v35 = vpop.f32.mrb[16].mxu1 }
 0x24f   : > { %v2695_v8 = vmul.f32 %v3793_v54, %v4378_v44  ;;  %v3794_v28 = vadd.f32 %v2583_v31, %v1490_v61  ;;  %v3758_v29 = vpop.f32.mrb[15].mxu0  ;;  %v3585_v21 = vpop.f32.mrb[17].mxu1 }
 0x250   : > { %v1678_v58 = vpop.f32.mrb[18].mxu1 }
 0x251   : > { %v2707_v59 = vadd.f32 %v2706_v26, %v2695_v8  ;;  %v2728_v5 = vmul.f32 %v2695_v8, %v2695_v8  ;;  %v3212_v51 = vpack.c.bf16 %v3794_v28, %v3793_v54  ;;  %v2696_v27 = vmul.f32 %v3794_v28, %v4376_v42  ;;  %v3586_v37 = vpop.f32.mrb[19].mxu1 }
 0x253   : > { %v2740_v45 = vadd.f32 %v2739_v34, %v2728_v5  ;;  %3237 = vst [vmem:[%s5131_s27 + $0x18] sm:$0xff] %v3212_v51   ;;  %v2708_v16 = vadd.f32 %v2707_v59, %v2696_v27  ;;  %v2729_v6 = vmul.f32 %v2696_v27, %v2696_v27 }
 0x254   : > { %v2588_v48 = vpop.f32.mrb[16].mxu0 }
 0x255   : > { %v2741_v24 = vadd.f32 %v2740_v45, %v2729_v6  ;;  %v3795_v7 = vadd.f32 %v2588_v48, %v1675_v35  ;;  %v3761_v44 = vpop.f32.mrb[17].mxu0 }
 0x256   : > { %v2591_v61 = vpop.f32.mrb[18].mxu0  ;;  %v1683_v53 = vpop.f32.mrb[20].mxu1 }
 0x257   : > { %v2697_v52 = vmul.f32 %v3795_v7, %v4390_v57  ;;  %v3796_v18 = vadd.f32 %v2591_v61, %v1678_v58  ;;  %v3762_v60 = vpop.f32.mrb[19].mxu0  ;;  %v3589_v2 = vpop.f32.mrb[21].mxu1 }
 0x258   : > { %v1686_v25 = vpop.f32.mrb[22].mxu1 }
 0x259   : > { %v2709_v17 = vadd.f32 %v2708_v16, %v2697_v52  ;;  %v2730_v42 = vmul.f32 %v2697_v52, %v2697_v52  ;;  %v3217_v62 = vpack.c.bf16 %v3796_v18, %v3795_v7  ;;  %v2698_v0 = vmul.f32 %v3796_v18, %v4388_v56  ;;  %v3590_v49 = vpop.f32.mrb[23].mxu1 }
 0x25b   : > { %v2742_v9 = vadd.f32 %v2741_v24, %v2730_v42  ;;  %3238 = vst [vmem:[%s5131_s27 + $0x20] sm:$0xff] %v3217_v62   ;;  %v2710_v23 = vadd.f32 %v2709_v17, %v2698_v0  ;;  %v2731_v38 = vmul.f32 %v2698_v0, %v2698_v0 }
 0x25c   : > { %v2596_v22 = vpop.f32.mrb[20].mxu0 }
 0x25d   : > { %v2743_v40 = vadd.f32 %v2742_v9, %v2731_v38  ;;  %v3797_v32 = vadd.f32 %v2596_v22, %v1683_v53  ;;  %v3765_v57 = vpop.f32.mrb[21].mxu0 }
 0x25e   : > { %v2599_v14 = vpop.f32.mrb[22].mxu0  ;;  %v1691_v36 = vpop.f32.mrb[24].mxu1 }
 0x25f   : > { %v2699_v15 = vmul.f32 %v3797_v32, %v4408_v12  ;;  %v3798_v47 = vadd.f32 %v2599_v14, %v1686_v25  ;;  %v3766_v46 = vpop.f32.mrb[23].mxu0  ;;  %v3593_v10 = vpop.f32.mrb[25].mxu1 }
 0x260   : > { %v1694_v63 = vpop.f32.mrb[26].mxu1 }
 0x261   : > { %v2711_v3 = vadd.f32 %v2710_v23, %v2699_v15  ;;  %v2732_v56 = vmul.f32 %v2699_v15, %v2699_v15  ;;  %v3222_v41 = vpack.c.bf16 %v3798_v47, %v3797_v32  ;;  %v2700_v4 = vmul.f32 %v3798_v47, %v4406_v11  ;;  %v3594_v39 = vpop.f32.mrb[27].mxu1 }
 0x263   : > { %v2744_v30 = vadd.f32 %v2743_v40, %v2732_v56  ;;  %3239 = vst [vmem:[%s5131_s27 + $0x28] sm:$0xff] %v3222_v41   ;;  %v2712_v19 = vadd.f32 %v2711_v3, %v2700_v4  ;;  %v2733_v50 = vmul.f32 %v2700_v4, %v2700_v4 }
 0x264   : > { %v2604_v43 = vpop.f32.mrb[24].mxu0 }
 0x265   : > { %v2745_v13 = vadd.f32 %v2744_v30, %v2733_v50  ;;  %v3799_v26 = vadd.f32 %v2604_v43, %v1691_v36  ;;  %v3769_v12 = vpop.f32.mrb[25].mxu0 }
 0x266   : > { %v2607_v20 = vpop.f32.mrb[26].mxu0 }
 0x267   : > { %v3139_v1 = vpack.c.bf16 %v3799_v26, %v3799_v26  ;;  %v2701_v34 = vmul.f32 %v3799_v26, %v4427_v33  ;;  %v3770_v54 = vpop.f32.mrb[27].mxu0 }
 0x269   : > { %2688 = vst [vmem:[%s5131_s27 + $0x30] sm:$0x3] %v3139_v1  ;;  %v2714_v11 = vsel %vm2713_vm7, %v2701_v34, 0.0  ;;  %v2734_v55 = vmul.f32 %v2701_v34, %v2701_v34 }
 0x26a   : > { %v2715_v31 = vadd.f32 %v2714_v11, %v2712_v19 }
 0x26b   : > { %v2746_v8 = vsel %vm2713_vm7, %v2734_v55, 0.0 }
 0x26c   : > { %v2716_v28 = vrot.slane %v2715_v31, 4  ;;  %v2747_v29 = vadd.f32 %v2746_v8, %v2745_v13 }
 0x26e   : > { %v2717_v35 = vadd.f32 %v2716_v28, %v2715_v31  ;;  %v2748_v59 = vrot.slane %v2747_v29, 4 }
 0x270   : > { %v2718_v5 = vrot.slane %v2717_v35, 2  ;;  %v2749_v51 = vadd.f32 %v2748_v59, %v2747_v29 }
 0x272   : > { %v2719_v27 = vadd.f32 %v2718_v5, %v2717_v35  ;;  %v2750_v21 = vrot.slane %v2749_v51, 2 }
 0x274   : > { %v2720_v58 = vrot.slane %v2719_v27, 1  ;;  %v2751_v45 = vadd.f32 %v2750_v21, %v2749_v51 }
 0x276   : > { %v2752_v16 = vrot.slane %v2751_v45, 1  ;;  %v2721_v33 = vadd.f32 %v2720_v58, %v2719_v27 }
 0x278   : > { %v2753_v6 = vadd.f32 %v2752_v16, %v2751_v45 }
 0x27a   : > { %v2755_v37 = vsel %vm2754_vm8, %v2721_v33, %v2753_v6 }
 0x27b   : > { %2756 = vst [vmem:[%s262_s30] sm:$0x3] %v2755_v37 }
 0x27c PF: > { %s17_s21 = sadd.s32 1, %s4142_s21  }
 0x27d   : > { %p14_p4 = scmp.ge.s32.totalorder %s17_s21, 4  }
 0x27f   :  { %16 = sbr.rel (!%p14_p4) target bundleno = 1 (0x1), region = 90 }

</bundles_post_ra>
